<compile_context>
chip_gen: v5e
topology: v5e:2x2
jax: 0.10.0
libtpu: 0.0.40
codegen_flags: <defaults>
</compile_context>

<pallas_src>
import jax
import jax.numpy as jnp
from jax.experimental import pallas as pl
from jax.experimental.pallas import tpu as pltpu

NUM_HIDDENS = 256
NUM_HEADS = 4
HEAD_DIM = NUM_HIDDENS // NUM_HEADS  # 64
FFN_HIDDEN = 1024
LN_EPS = 1e-5
SM_SCALE = 1.0 / (HEAD_DIM ** 0.5)


# ---------------------------------------------------------------------------
# In-kernel helpers (operate on values already resident in vregs/VMEM)
# ---------------------------------------------------------------------------
def _mha(q, k, v, wo):
    """Multi-head attention core. q:(Tq,H) k,v:(Tk,H) wo:(H,H) -> (Tq,H).

    Per-head results are pushed straight through the row-sliced output
    projection and accumulated (no head concat).  The reference's masked_fill
    is a no-op, so no masking is applied -- matches the PyTorch semantics.
    """
    out = jnp.zeros((q.shape[0], NUM_HIDDENS), jnp.float32)
    for h in range(NUM_HEADS):  # static, unrolled
        lo = h * HEAD_DIM
        qh = q[:, lo:lo + HEAD_DIM]
        kh = k[:, lo:lo + HEAD_DIM]
        vh = v[:, lo:lo + HEAD_DIM]
        # scores = qh @ kh.T  (contract on head_dim; no explicit transpose)
        s = jax.lax.dot_general(qh, kh, (((1,), (1,)), ((), ())),
                                preferred_element_type=jnp.float32) * SM_SCALE
        s = s - jnp.max(s, axis=-1, keepdims=True)
        p = jnp.exp(s)
        p = p * pl.reciprocal(jnp.sum(p, axis=-1, keepdims=True), approx=True)
        oh = jnp.dot(p, vh, preferred_element_type=jnp.float32)          # (Tq, 64)
        out = out + jnp.dot(oh, wo[lo:lo + HEAD_DIM, :],
                            preferred_element_type=jnp.float32)          # (Tq, H)
    return out


def _add_norm(x, x1, gamma, beta):
    """X + LayerNorm(X1); dropout == identity at inference."""
    mean = jnp.mean(x1, axis=-1, keepdims=True)
    var = jnp.mean(jnp.square(x1 - mean), axis=-1, keepdims=True)
    ln = (x1 - mean) * jax.lax.rsqrt(var + LN_EPS) * gamma + beta
    return x + ln


# ---------------------------------------------------------------------------
# Fused decoder block kernel (one grid step == one batch element)
# ---------------------------------------------------------------------------
def _decoder_blk_kernel(xt_ref, xen_ref,
                        sa_wqkv_ref, sa_wo_ref,
                        ca_wq_ref, ca_wkv_ref, ca_wo_ref,
                        ffn_w1_ref, ffn_w2_ref,
                        ln1_g_ref, ln1_b_ref,
                        ln2_g_ref, ln2_b_ref,
                        ln3_g_ref, ln3_b_ref,
                        o_ref):
    H = NUM_HIDDENS
    x_t = xt_ref[...]     # (T, H)  -- leading batch dim squeezed away
    x_en = xen_ref[...]   # (S, H)

    # 1) masked self-attention (mask is a no-op in the reference) + AddNorm
    qkv = jnp.dot(x_t, sa_wqkv_ref[...],
                  preferred_element_type=jnp.float32)                     # (T, 3H)
    x1 = _mha(qkv[:, 0:H], qkv[:, H:2 * H], qkv[:, 2 * H:3 * H], sa_wo_ref[...])
    x_t = _add_norm(x_t, x1, ln1_g_ref[...], ln1_b_ref[...])

    # 2) cross-attention + AddNorm
    q = jnp.dot(x_t, ca_wq_ref[...], preferred_element_type=jnp.float32)  # (T, H)
    kv = jnp.dot(x_en, ca_wkv_ref[...],
                 preferred_element_type=jnp.float32)                      # (S, 2H)
    x1 = _mha(q, kv[:, 0:H], kv[:, H:2 * H], ca_wo_ref[...])
    x_t = _add_norm(x_t, x1, ln2_g_ref[...], ln2_b_ref[...])

    # 3) position-wise FFN (ReLU after BOTH linears, per reference) + AddNorm
    hdn = jnp.maximum(jnp.dot(x_t, ffn_w1_ref[...],
                              preferred_element_type=jnp.float32), 0.0)   # (T, 1024)
    y = jnp.maximum(jnp.dot(hdn, ffn_w2_ref[...],
                            preferred_element_type=jnp.float32), 0.0)     # (T, H)
    x_t = _add_norm(x_t, y, ln3_g_ref[...], ln3_b_ref[...])

    o_ref[...] = x_t


def decoder_blk_pallas(params, X_t, X_en):
    B, T, H = X_t.shape
    S = X_en.shape[1]

    def act_spec(L):
        return pl.BlockSpec((pl.Squeezed(), L, H), lambda b: (b, 0, 0))

    def w_spec(shape):
        # Constant block index across the batch grid -> weights stay VMEM-resident.
        return pl.BlockSpec(shape, lambda b, _s=shape: (0,) * len(_s))

    in_specs = [
        act_spec(T),                 # X_t
        act_spec(S),                 # X_en
        w_spec((H, 3 * H)),          # sa_wqkv (fused Wq|Wk|Wv, pre-transposed)
        w_spec((H, H)),              # sa_wo
        w_spec((H, H)),              # ca_wq
        w_spec((H, 2 * H)),          # ca_wkv (fused Wk|Wv)
        w_spec((H, H)),              # ca_wo
        w_spec((H, FFN_HIDDEN)),     # ffn_w1
        w_spec((FFN_HIDDEN, H)),     # ffn_w2
        w_spec((1, H)), w_spec((1, H)),   # ln1 gamma/beta
        w_spec((1, H)), w_spec((1, H)),   # ln2 gamma/beta
        w_spec((1, H)), w_spec((1, H)),   # ln3 gamma/beta
    ]

    return pl.pallas_call(
        _decoder_blk_kernel,
        out_shape=jax.ShapeDtypeStruct((B, T, H), jnp.float32),
        grid_spec=pltpu.PrefetchScalarGridSpec(
            num_scalar_prefetch=0,
            grid=(B,),
            in_specs=in_specs,
            out_specs=pl.BlockSpec((pl.Squeezed(), T, H), lambda b: (b, 0, 0)),
        ),
        compiler_params=pltpu.CompilerParams(
            dimension_semantics=("parallel",),
            vmem_limit_bytes=32 * 1024 * 1024,
        ),
    )(X_t, X_en,
      params["sa_wqkv"], params["sa_wo"],
      params["ca_wq"], params["ca_wkv"], params["ca_wo"],
      params["ffn_w1"], params["ffn_w2"],
      params["ln1_g"], params["ln1_b"],
      params["ln2_g"], params["ln2_b"],
      params["ln3_g"], params["ln3_b"])


@jax.jit
def decoder_blk(params, X_t, O_m, X_en, I_m):
    # O_m / I_m accepted for signature parity; they have no effect in the
    # reference (masked_fill result is discarded), so they are unused here.
    del O_m, I_m
    return decoder_blk_pallas(params, X_t, X_en)


def init_params(key):
    H = NUM_HIDDENS

    def lin(k, shape):
        # (in, out) pre-transposed weight, Kaiming-ish scale.
        return jax.random.normal(k, shape, jnp.float32) / jnp.sqrt(jnp.float32(shape[0]))

    keys = jax.random.split(key, 10)
    sa_wq, sa_wk, sa_wv, sa_wo = (lin(keys[i], (H, H)) for i in range(4))
    ca_wq, ca_wk, ca_wv, ca_wo = (lin(keys[4 + i], (H, H)) for i in range(4))
    params = {
        "sa_wqkv": jnp.concatenate([sa_wq, sa_wk, sa_wv], axis=1),   # (H, 3H)
        "sa_wo": sa_wo,
        "ca_wq": ca_wq,
        "ca_wkv": jnp.concatenate([ca_wk, ca_wv], axis=1),           # (H, 2H)
        "ca_wo": ca_wo,
        "ffn_w1": lin(keys[8], (H, FFN_HIDDEN)),
        "ffn_w2": lin(keys[9], (FFN_HIDDEN, H)),
    }
    # LayerNorm affine params (PyTorch default: gamma=1, beta=0), shaped (1, H)
    for i in (1, 2, 3):
        params[f"ln{i}_g"] = jnp.ones((1, H), jnp.float32)
        params[f"ln{i}_b"] = jnp.zeros((1, H), jnp.float32)
    return params


if __name__ == "__main__":
    B, T, S, H = 2, 8, 8, NUM_HIDDENS  # T, S <= 12 (tril_mask is 12x12 in reference)

    key = jax.random.PRNGKey(0)
    k_xt, k_xen, k_params = jax.random.split(key, 3)

    X_t = jax.random.normal(k_xt, (B, T, H), jnp.float32)
    X_en = jax.random.normal(k_xen, (B, S, H), jnp.float32)
    O_m = jnp.ones((B, T), jnp.float32)  # decoder padding mask (unused, see notes)
    I_m = jnp.ones((B, S), jnp.float32)  # encoder padding mask (unused, see notes)

    params = init_params(k_params)

    out = decoder_blk(params, X_t, O_m, X_en, I_m)
    out = jax.block_until_ready(out)

    assert out.shape == (B, T, H), out.shape
    assert jnp.isfinite(out).all()
    print("KERNEL_OK")
</pallas_src>

<mosaic_0001>
module attributes {stable_mosaic.version = 11 : i64} {
  func.func @_decoder_blk_kernel(%arg0: i32, %arg1: memref<1x8x256xf32, #tpu.memory_space<vmem>>, %arg2: memref<1x8x256xf32, #tpu.memory_space<vmem>>, %arg3: memref<256x768xf32, #tpu.memory_space<vmem>>, %arg4: memref<256x256xf32, #tpu.memory_space<vmem>>, %arg5: memref<256x256xf32, #tpu.memory_space<vmem>>, %arg6: memref<256x512xf32, #tpu.memory_space<vmem>>, %arg7: memref<256x256xf32, #tpu.memory_space<vmem>>, %arg8: memref<256x1024xf32, #tpu.memory_space<vmem>>, %arg9: memref<1024x256xf32, #tpu.memory_space<vmem>>, %arg10: memref<1x256xf32, #tpu.memory_space<vmem>>, %arg11: memref<1x256xf32, #tpu.memory_space<vmem>>, %arg12: memref<1x256xf32, #tpu.memory_space<vmem>>, %arg13: memref<1x256xf32, #tpu.memory_space<vmem>>, %arg14: memref<1x256xf32, #tpu.memory_space<vmem>>, %arg15: memref<1x256xf32, #tpu.memory_space<vmem>>, %arg16: memref<1x8x256xf32, #tpu.memory_space<vmem>>) attributes {dimension_semantics = [#tpu.dimension_semantics<parallel>], iteration_bounds = array<i64: 2>, scalar_prefetch = 0 : i64, scratch_operands = 0 : i64, tpu.core_type = #tpu.core_type<tc>, window_params = [{transform_indices = @transform_0, window_bounds = array<i64: 1, 8, 256>}, {transform_indices = @transform_1, window_bounds = array<i64: 1, 8, 256>}, {pipeline_mode = #tpu.pipeline_mode<synchronous>, transform_indices = @transform_2, window_bounds = array<i64: 256, 768>}, {pipeline_mode = #tpu.pipeline_mode<synchronous>, transform_indices = @transform_3, window_bounds = array<i64: 256, 256>}, {pipeline_mode = #tpu.pipeline_mode<synchronous>, transform_indices = @transform_4, window_bounds = array<i64: 256, 256>}, {pipeline_mode = #tpu.pipeline_mode<synchronous>, transform_indices = @transform_5, window_bounds = array<i64: 256, 512>}, {pipeline_mode = #tpu.pipeline_mode<synchronous>, transform_indices = @transform_6, window_bounds = array<i64: 256, 256>}, {pipeline_mode = #tpu.pipeline_mode<synchronous>, transform_indices = @transform_7, window_bounds = array<i64: 256, 1024>}, {pipeline_mode = #tpu.pipeline_mode<synchronous>, transform_indices = @transform_8, window_bounds = array<i64: 1024, 256>}, {pipeline_mode = #tpu.pipeline_mode<synchronous>, transform_indices = @transform_9, window_bounds = array<i64: 1, 256>}, {pipeline_mode = #tpu.pipeline_mode<synchronous>, transform_indices = @transform_10, window_bounds = array<i64: 1, 256>}, {pipeline_mode = #tpu.pipeline_mode<synchronous>, transform_indices = @transform_11, window_bounds = array<i64: 1, 256>}, {pipeline_mode = #tpu.pipeline_mode<synchronous>, transform_indices = @transform_12, window_bounds = array<i64: 1, 256>}, {pipeline_mode = #tpu.pipeline_mode<synchronous>, transform_indices = @transform_13, window_bounds = array<i64: 1, 256>}, {pipeline_mode = #tpu.pipeline_mode<synchronous>, transform_indices = @transform_14, window_bounds = array<i64: 1, 256>}, {transform_indices = @transform_15, window_bounds = array<i64: 1, 8, 256>}]} {
    %c0 = arith.constant 0 : index
    %c0_0 = arith.constant 0 : index
    %c0_1 = arith.constant 0 : index
    %0 = vector.load %arg1[%c0, %c0_0, %c0_1] : memref<1x8x256xf32, #tpu.memory_space<vmem>>, vector<1x8x256xf32>
    %1 = vector.shape_cast %0 : vector<1x8x256xf32> to vector<8x256xf32>
    %c0_2 = arith.constant 0 : index
    %c0_3 = arith.constant 0 : index
    %c0_4 = arith.constant 0 : index
    %2 = vector.load %arg2[%c0_2, %c0_3, %c0_4] : memref<1x8x256xf32, #tpu.memory_space<vmem>>, vector<1x8x256xf32>
    %3 = vector.shape_cast %2 : vector<1x8x256xf32> to vector<8x256xf32>
    %c0_5 = arith.constant 0 : index
    %c0_6 = arith.constant 0 : index
    %4 = vector.load %arg3[%c0_5, %c0_6] : memref<256x768xf32, #tpu.memory_space<vmem>>, vector<256x768xf32>
    %cst = arith.constant dense<0.000000e+00> : vector<8x768xf32>
    %5 = tpu.matmul %1, %4, %cst {dimension_numbers = #tpu.dot_dimension_numbers<[1], [0], [0], [1], [0, 0, 1, 1], [], []>} : vector<8x256xf32>, vector<256x768xf32>, vector<8x768xf32> -> vector<8x768xf32>
    %6 = vector.extract_strided_slice %5 {offsets = [0, 0], sizes = [8, 256], strides = [1, 1]} : vector<8x768xf32> to vector<8x256xf32>
    %7 = vector.extract_strided_slice %5 {offsets = [0, 256], sizes = [8, 256], strides = [1, 1]} : vector<8x768xf32> to vector<8x256xf32>
    %8 = vector.extract_strided_slice %5 {offsets = [0, 512], sizes = [8, 256], strides = [1, 1]} : vector<8x768xf32> to vector<8x256xf32>
    %c0_7 = arith.constant 0 : index
    %c0_8 = arith.constant 0 : index
    %9 = vector.load %arg4[%c0_7, %c0_8] : memref<256x256xf32, #tpu.memory_space<vmem>>, vector<256x256xf32>
    %cst_9 = arith.constant 0.000000e+00 : f32
    %10 = vector.broadcast %cst_9 : f32 to vector<8x256xf32>
    %11 = vector.extract_strided_slice %6 {offsets = [0, 0], sizes = [8, 64], strides = [1, 1]} : vector<8x256xf32> to vector<8x64xf32>
    %12 = vector.extract_strided_slice %7 {offsets = [0, 0], sizes = [8, 64], strides = [1, 1]} : vector<8x256xf32> to vector<8x64xf32>
    %13 = vector.extract_strided_slice %8 {offsets = [0, 0], sizes = [8, 64], strides = [1, 1]} : vector<8x256xf32> to vector<8x64xf32>
    %cst_10 = arith.constant dense<0.000000e+00> : vector<8x8xf32>
    %14 = tpu.matmul %11, %12, %cst_10 {dimension_numbers = #tpu.dot_dimension_numbers<[1], [1], [0], [0], [0, 0, 1, 0], [], []>} : vector<8x64xf32>, vector<8x64xf32>, vector<8x8xf32> -> vector<8x8xf32>
    %cst_11 = arith.constant 1.250000e-01 : f32
    %15 = vector.broadcast %cst_11 : f32 to vector<8x8xf32>
    %16 = arith.mulf %14, %15 : vector<8x8xf32>
    %cst_12 = arith.constant dense<0xFF800000> : vector<8xf32>
    %17 = vector.multi_reduction <maximumf>, %16, %cst_12 [1] : vector<8x8xf32> to vector<8xf32>
    %18 = vector.shape_cast %17 : vector<8xf32> to vector<8x1xf32>
    %19 = vector.broadcast %18 : vector<8x1xf32> to vector<8x8xf32>
    %20 = arith.subf %16, %19 : vector<8x8xf32>
    %21 = math.exp %20 : vector<8x8xf32>
    %cst_13 = arith.constant dense<0.000000e+00> : vector<8xf32>
    %22 = vector.multi_reduction <add>, %21, %cst_13 [1] : vector<8x8xf32> to vector<8xf32>
    %23 = vector.shape_cast %22 : vector<8xf32> to vector<8x1xf32>
    %24 = tpu.reciprocal %23 {approx = true} : vector<8x1xf32> -> vector<8x1xf32>
    %25 = vector.broadcast %24 : vector<8x1xf32> to vector<8x8xf32>
    %26 = arith.mulf %21, %25 : vector<8x8xf32>
    %cst_14 = arith.constant dense<0.000000e+00> : vector<8x64xf32>
    %27 = tpu.matmul %26, %13, %cst_14 {dimension_numbers = #tpu.dot_dimension_numbers<[1], [0], [0], [1], [0, 0, 1, 1], [], []>} : vector<8x8xf32>, vector<8x64xf32>, vector<8x64xf32> -> vector<8x64xf32>
    %28 = vector.extract_strided_slice %9 {offsets = [0, 0], sizes = [64, 256], strides = [1, 1]} : vector<256x256xf32> to vector<64x256xf32>
    %cst_15 = arith.constant dense<0.000000e+00> : vector<8x256xf32>
    %29 = tpu.matmul %27, %28, %cst_15 {dimension_numbers = #tpu.dot_dimension_numbers<[1], [0], [0], [1], [0, 0, 1, 1], [], []>} : vector<8x64xf32>, vector<64x256xf32>, vector<8x256xf32> -> vector<8x256xf32>
    %30 = arith.addf %10, %29 : vector<8x256xf32>
    %31 = vector.extract_strided_slice %6 {offsets = [0, 64], sizes = [8, 64], strides = [1, 1]} : vector<8x256xf32> to vector<8x64xf32>
    %32 = vector.extract_strided_slice %7 {offsets = [0, 64], sizes = [8, 64], strides = [1, 1]} : vector<8x256xf32> to vector<8x64xf32>
    %33 = vector.extract_strided_slice %8 {offsets = [0, 64], sizes = [8, 64], strides = [1, 1]} : vector<8x256xf32> to vector<8x64xf32>
    %cst_16 = arith.constant dense<0.000000e+00> : vector<8x8xf32>
    %34 = tpu.matmul %31, %32, %cst_16 {dimension_numbers = #tpu.dot_dimension_numbers<[1], [1], [0], [0], [0, 0, 1, 0], [], []>} : vector<8x64xf32>, vector<8x64xf32>, vector<8x8xf32> -> vector<8x8xf32>
    %cst_17 = arith.constant 1.250000e-01 : f32
    %35 = vector.broadcast %cst_17 : f32 to vector<8x8xf32>
    %36 = arith.mulf %34, %35 : vector<8x8xf32>
    %cst_18 = arith.constant dense<0xFF800000> : vector<8xf32>
    %37 = vector.multi_reduction <maximumf>, %36, %cst_18 [1] : vector<8x8xf32> to vector<8xf32>
    %38 = vector.shape_cast %37 : vector<8xf32> to vector<8x1xf32>
    %39 = vector.broadcast %38 : vector<8x1xf32> to vector<8x8xf32>
    %40 = arith.subf %36, %39 : vector<8x8xf32>
    %41 = math.exp %40 : vector<8x8xf32>
    %cst_19 = arith.constant dense<0.000000e+00> : vector<8xf32>
    %42 = vector.multi_reduction <add>, %41, %cst_19 [1] : vector<8x8xf32> to vector<8xf32>
    %43 = vector.shape_cast %42 : vector<8xf32> to vector<8x1xf32>
    %44 = tpu.reciprocal %43 {approx = true} : vector<8x1xf32> -> vector<8x1xf32>
    %45 = vector.broadcast %44 : vector<8x1xf32> to vector<8x8xf32>
    %46 = arith.mulf %41, %45 : vector<8x8xf32>
    %cst_20 = arith.constant dense<0.000000e+00> : vector<8x64xf32>
    %47 = tpu.matmul %46, %33, %cst_20 {dimension_numbers = #tpu.dot_dimension_numbers<[1], [0], [0], [1], [0, 0, 1, 1], [], []>} : vector<8x8xf32>, vector<8x64xf32>, vector<8x64xf32> -> vector<8x64xf32>
    %48 = vector.extract_strided_slice %9 {offsets = [64, 0], sizes = [64, 256], strides = [1, 1]} : vector<256x256xf32> to vector<64x256xf32>
    %cst_21 = arith.constant dense<0.000000e+00> : vector<8x256xf32>
    %49 = tpu.matmul %47, %48, %cst_21 {dimension_numbers = #tpu.dot_dimension_numbers<[1], [0], [0], [1], [0, 0, 1, 1], [], []>} : vector<8x64xf32>, vector<64x256xf32>, vector<8x256xf32> -> vector<8x256xf32>
    %50 = arith.addf %30, %49 : vector<8x256xf32>
    %51 = vector.extract_strided_slice %6 {offsets = [0, 128], sizes = [8, 64], strides = [1, 1]} : vector<8x256xf32> to vector<8x64xf32>
    %52 = vector.extract_strided_slice %7 {offsets = [0, 128], sizes = [8, 64], strides = [1, 1]} : vector<8x256xf32> to vector<8x64xf32>
    %53 = vector.extract_strided_slice %8 {offsets = [0, 128], sizes = [8, 64], strides = [1, 1]} : vector<8x256xf32> to vector<8x64xf32>
    %cst_22 = arith.constant dense<0.000000e+00> : vector<8x8xf32>
    %54 = tpu.matmul %51, %52, %cst_22 {dimension_numbers = #tpu.dot_dimension_numbers<[1], [1], [0], [0], [0, 0, 1, 0], [], []>} : vector<8x64xf32>, vector<8x64xf32>, vector<8x8xf32> -> vector<8x8xf32>
    %cst_23 = arith.constant 1.250000e-01 : f32
    %55 = vector.broadcast %cst_23 : f32 to vector<8x8xf32>
    %56 = arith.mulf %54, %55 : vector<8x8xf32>
    %cst_24 = arith.constant dense<0xFF800000> : vector<8xf32>
    %57 = vector.multi_reduction <maximumf>, %56, %cst_24 [1] : vector<8x8xf32> to vector<8xf32>
    %58 = vector.shape_cast %57 : vector<8xf32> to vector<8x1xf32>
    %59 = vector.broadcast %58 : vector<8x1xf32> to vector<8x8xf32>
    %60 = arith.subf %56, %59 : vector<8x8xf32>
    %61 = math.exp %60 : vector<8x8xf32>
    %cst_25 = arith.constant dense<0.000000e+00> : vector<8xf32>
    %62 = vector.multi_reduction <add>, %61, %cst_25 [1] : vector<8x8xf32> to vector<8xf32>
    %63 = vector.shape_cast %62 : vector<8xf32> to vector<8x1xf32>
    %64 = tpu.reciprocal %63 {approx = true} : vector<8x1xf32> -> vector<8x1xf32>
    %65 = vector.broadcast %64 : vector<8x1xf32> to vector<8x8xf32>
    %66 = arith.mulf %61, %65 : vector<8x8xf32>
    %cst_26 = arith.constant dense<0.000000e+00> : vector<8x64xf32>
    %67 = tpu.matmul %66, %53, %cst_26 {dimension_numbers = #tpu.dot_dimension_numbers<[1], [0], [0], [1], [0, 0, 1, 1], [], []>} : vector<8x8xf32>, vector<8x64xf32>, vector<8x64xf32> -> vector<8x64xf32>
    %68 = vector.extract_strided_slice %9 {offsets = [128, 0], sizes = [64, 256], strides = [1, 1]} : vector<256x256xf32> to vector<64x256xf32>
    %cst_27 = arith.constant dense<0.000000e+00> : vector<8x256xf32>
    %69 = tpu.matmul %67, %68, %cst_27 {dimension_numbers = #tpu.dot_dimension_numbers<[1], [0], [0], [1], [0, 0, 1, 1], [], []>} : vector<8x64xf32>, vector<64x256xf32>, vector<8x256xf32> -> vector<8x256xf32>
    %70 = arith.addf %50, %69 : vector<8x256xf32>
    %71 = vector.extract_strided_slice %6 {offsets = [0, 192], sizes = [8, 64], strides = [1, 1]} : vector<8x256xf32> to vector<8x64xf32>
    %72 = vector.extract_strided_slice %7 {offsets = [0, 192], sizes = [8, 64], strides = [1, 1]} : vector<8x256xf32> to vector<8x64xf32>
    %73 = vector.extract_strided_slice %8 {offsets = [0, 192], sizes = [8, 64], strides = [1, 1]} : vector<8x256xf32> to vector<8x64xf32>
    %cst_28 = arith.constant dense<0.000000e+00> : vector<8x8xf32>
    %74 = tpu.matmul %71, %72, %cst_28 {dimension_numbers = #tpu.dot_dimension_numbers<[1], [1], [0], [0], [0, 0, 1, 0], [], []>} : vector<8x64xf32>, vector<8x64xf32>, vector<8x8xf32> -> vector<8x8xf32>
    %cst_29 = arith.constant 1.250000e-01 : f32
    %75 = vector.broadcast %cst_29 : f32 to vector<8x8xf32>
    %76 = arith.mulf %74, %75 : vector<8x8xf32>
    %cst_30 = arith.constant dense<0xFF800000> : vector<8xf32>
    %77 = vector.multi_reduction <maximumf>, %76, %cst_30 [1] : vector<8x8xf32> to vector<8xf32>
    %78 = vector.shape_cast %77 : vector<8xf32> to vector<8x1xf32>
    %79 = vector.broadcast %78 : vector<8x1xf32> to vector<8x8xf32>
    %80 = arith.subf %76, %79 : vector<8x8xf32>
    %81 = math.exp %80 : vector<8x8xf32>
    %cst_31 = arith.constant dense<0.000000e+00> : vector<8xf32>
    %82 = vector.multi_reduction <add>, %81, %cst_31 [1] : vector<8x8xf32> to vector<8xf32>
    %83 = vector.shape_cast %82 : vector<8xf32> to vector<8x1xf32>
    %84 = tpu.reciprocal %83 {approx = true} : vector<8x1xf32> -> vector<8x1xf32>
    %85 = vector.broadcast %84 : vector<8x1xf32> to vector<8x8xf32>
    %86 = arith.mulf %81, %85 : vector<8x8xf32>
    %cst_32 = arith.constant dense<0.000000e+00> : vector<8x64xf32>
    %87 = tpu.matmul %86, %73, %cst_32 {dimension_numbers = #tpu.dot_dimension_numbers<[1], [0], [0], [1], [0, 0, 1, 1], [], []>} : vector<8x8xf32>, vector<8x64xf32>, vector<8x64xf32> -> vector<8x64xf32>
    %88 = vector.extract_strided_slice %9 {offsets = [192, 0], sizes = [64, 256], strides = [1, 1]} : vector<256x256xf32> to vector<64x256xf32>
    %cst_33 = arith.constant dense<0.000000e+00> : vector<8x256xf32>
    %89 = tpu.matmul %87, %88, %cst_33 {dimension_numbers = #tpu.dot_dimension_numbers<[1], [0], [0], [1], [0, 0, 1, 1], [], []>} : vector<8x64xf32>, vector<64x256xf32>, vector<8x256xf32> -> vector<8x256xf32>
    %90 = arith.addf %70, %89 : vector<8x256xf32>
    %c0_34 = arith.constant 0 : index
    %c0_35 = arith.constant 0 : index
    %91 = vector.load %arg10[%c0_34, %c0_35] : memref<1x256xf32, #tpu.memory_space<vmem>>, vector<1x256xf32>
    %c0_36 = arith.constant 0 : index
    %c0_37 = arith.constant 0 : index
    %92 = vector.load %arg11[%c0_36, %c0_37] : memref<1x256xf32, #tpu.memory_space<vmem>>, vector<1x256xf32>
    %cst_38 = arith.constant dense<0.000000e+00> : vector<8xf32>
    %93 = vector.multi_reduction <add>, %90, %cst_38 [1] : vector<8x256xf32> to vector<8xf32>
    %94 = vector.shape_cast %93 : vector<8xf32> to vector<8x1xf32>
    %cst_39 = arith.constant 2.560000e+02 : f32
    %95 = vector.broadcast %cst_39 : f32 to vector<8x1xf32>
    %96 = arith.divf %94, %95 : vector<8x1xf32>
    %97 = vector.broadcast %96 : vector<8x1xf32> to vector<8x256xf32>
    %98 = arith.subf %90, %97 : vector<8x256xf32>
    %99 = arith.mulf %98, %98 : vector<8x256xf32>
    %cst_40 = arith.constant dense<0.000000e+00> : vector<8xf32>
    %100 = vector.multi_reduction <add>, %99, %cst_40 [1] : vector<8x256xf32> to vector<8xf32>
    %101 = vector.shape_cast %100 : vector<8xf32> to vector<8x1xf32>
    %cst_41 = arith.constant 2.560000e+02 : f32
    %102 = vector.broadcast %cst_41 : f32 to vector<8x1xf32>
    %103 = arith.divf %101, %102 : vector<8x1xf32>
    %104 = vector.broadcast %96 : vector<8x1xf32> to vector<8x256xf32>
    %105 = arith.subf %90, %104 : vector<8x256xf32>
    %cst_42 = arith.constant 9.99999974E-6 : f32
    %106 = vector.broadcast %cst_42 : f32 to vector<8x1xf32>
    %107 = arith.addf %103, %106 : vector<8x1xf32>
    %108 = math.rsqrt %107 : vector<8x1xf32>
    %109 = vector.broadcast %108 : vector<8x1xf32> to vector<8x256xf32>
    %110 = arith.mulf %105, %109 : vector<8x256xf32>
    %111 = vector.broadcast %91 : vector<1x256xf32> to vector<8x256xf32>
    %112 = arith.mulf %110, %111 : vector<8x256xf32>
    %113 = vector.broadcast %92 : vector<1x256xf32> to vector<8x256xf32>
    %114 = arith.addf %112, %113 : vector<8x256xf32>
    %115 = arith.addf %1, %114 : vector<8x256xf32>
    %c0_43 = arith.constant 0 : index
    %c0_44 = arith.constant 0 : index
    %116 = vector.load %arg5[%c0_43, %c0_44] : memref<256x256xf32, #tpu.memory_space<vmem>>, vector<256x256xf32>
    %cst_45 = arith.constant dense<0.000000e+00> : vector<8x256xf32>
    %117 = tpu.matmul %115, %116, %cst_45 {dimension_numbers = #tpu.dot_dimension_numbers<[1], [0], [0], [1], [0, 0, 1, 1], [], []>} : vector<8x256xf32>, vector<256x256xf32>, vector<8x256xf32> -> vector<8x256xf32>
    %c0_46 = arith.constant 0 : index
    %c0_47 = arith.constant 0 : index
    %118 = vector.load %arg6[%c0_46, %c0_47] : memref<256x512xf32, #tpu.memory_space<vmem>>, vector<256x512xf32>
    %cst_48 = arith.constant dense<0.000000e+00> : vector<8x512xf32>
    %119 = tpu.matmul %3, %118, %cst_48 {dimension_numbers = #tpu.dot_dimension_numbers<[1], [0], [0], [1], [0, 0, 1, 1], [], []>} : vector<8x256xf32>, vector<256x512xf32>, vector<8x512xf32> -> vector<8x512xf32>
    %120 = vector.extract_strided_slice %119 {offsets = [0, 0], sizes = [8, 256], strides = [1, 1]} : vector<8x512xf32> to vector<8x256xf32>
    %121 = vector.extract_strided_slice %119 {offsets = [0, 256], sizes = [8, 256], strides = [1, 1]} : vector<8x512xf32> to vector<8x256xf32>
    %c0_49 = arith.constant 0 : index
    %c0_50 = arith.constant 0 : index
    %122 = vector.load %arg7[%c0_49, %c0_50] : memref<256x256xf32, #tpu.memory_space<vmem>>, vector<256x256xf32>
    %cst_51 = arith.constant 0.000000e+00 : f32
    %123 = vector.broadcast %cst_51 : f32 to vector<8x256xf32>
    %124 = vector.extract_strided_slice %117 {offsets = [0, 0], sizes = [8, 64], strides = [1, 1]} : vector<8x256xf32> to vector<8x64xf32>
    %125 = vector.extract_strided_slice %120 {offsets = [0, 0], sizes = [8, 64], strides = [1, 1]} : vector<8x256xf32> to vector<8x64xf32>
    %126 = vector.extract_strided_slice %121 {offsets = [0, 0], sizes = [8, 64], strides = [1, 1]} : vector<8x256xf32> to vector<8x64xf32>
    %cst_52 = arith.constant dense<0.000000e+00> : vector<8x8xf32>
    %127 = tpu.matmul %124, %125, %cst_52 {dimension_numbers = #tpu.dot_dimension_numbers<[1], [1], [0], [0], [0, 0, 1, 0], [], []>} : vector<8x64xf32>, vector<8x64xf32>, vector<8x8xf32> -> vector<8x8xf32>
    %cst_53 = arith.constant 1.250000e-01 : f32
    %128 = vector.broadcast %cst_53 : f32 to vector<8x8xf32>
    %129 = arith.mulf %127, %128 : vector<8x8xf32>
    %cst_54 = arith.constant dense<0xFF800000> : vector<8xf32>
    %130 = vector.multi_reduction <maximumf>, %129, %cst_54 [1] : vector<8x8xf32> to vector<8xf32>
    %131 = vector.shape_cast %130 : vector<8xf32> to vector<8x1xf32>
    %132 = vector.broadcast %131 : vector<8x1xf32> to vector<8x8xf32>
    %133 = arith.subf %129, %132 : vector<8x8xf32>
    %134 = math.exp %133 : vector<8x8xf32>
    %cst_55 = arith.constant dense<0.000000e+00> : vector<8xf32>
    %135 = vector.multi_reduction <add>, %134, %cst_55 [1] : vector<8x8xf32> to vector<8xf32>
    %136 = vector.shape_cast %135 : vector<8xf32> to vector<8x1xf32>
    %137 = tpu.reciprocal %136 {approx = true} : vector<8x1xf32> -> vector<8x1xf32>
    %138 = vector.broadcast %137 : vector<8x1xf32> to vector<8x8xf32>
    %139 = arith.mulf %134, %138 : vector<8x8xf32>
    %cst_56 = arith.constant dense<0.000000e+00> : vector<8x64xf32>
    %140 = tpu.matmul %139, %126, %cst_56 {dimension_numbers = #tpu.dot_dimension_numbers<[1], [0], [0], [1], [0, 0, 1, 1], [], []>} : vector<8x8xf32>, vector<8x64xf32>, vector<8x64xf32> -> vector<8x64xf32>
    %141 = vector.extract_strided_slice %122 {offsets = [0, 0], sizes = [64, 256], strides = [1, 1]} : vector<256x256xf32> to vector<64x256xf32>
    %cst_57 = arith.constant dense<0.000000e+00> : vector<8x256xf32>
    %142 = tpu.matmul %140, %141, %cst_57 {dimension_numbers = #tpu.dot_dimension_numbers<[1], [0], [0], [1], [0, 0, 1, 1], [], []>} : vector<8x64xf32>, vector<64x256xf32>, vector<8x256xf32> -> vector<8x256xf32>
    %143 = arith.addf %123, %142 : vector<8x256xf32>
    %144 = vector.extract_strided_slice %117 {offsets = [0, 64], sizes = [8, 64], strides = [1, 1]} : vector<8x256xf32> to vector<8x64xf32>
    %145 = vector.extract_strided_slice %120 {offsets = [0, 64], sizes = [8, 64], strides = [1, 1]} : vector<8x256xf32> to vector<8x64xf32>
    %146 = vector.extract_strided_slice %121 {offsets = [0, 64], sizes = [8, 64], strides = [1, 1]} : vector<8x256xf32> to vector<8x64xf32>
    %cst_58 = arith.constant dense<0.000000e+00> : vector<8x8xf32>
    %147 = tpu.matmul %144, %145, %cst_58 {dimension_numbers = #tpu.dot_dimension_numbers<[1], [1], [0], [0], [0, 0, 1, 0], [], []>} : vector<8x64xf32>, vector<8x64xf32>, vector<8x8xf32> -> vector<8x8xf32>
    %cst_59 = arith.constant 1.250000e-01 : f32
    %148 = vector.broadcast %cst_59 : f32 to vector<8x8xf32>
    %149 = arith.mulf %147, %148 : vector<8x8xf32>
    %cst_60 = arith.constant dense<0xFF800000> : vector<8xf32>
    %150 = vector.multi_reduction <maximumf>, %149, %cst_60 [1] : vector<8x8xf32> to vector<8xf32>
    %151 = vector.shape_cast %150 : vector<8xf32> to vector<8x1xf32>
    %152 = vector.broadcast %151 : vector<8x1xf32> to vector<8x8xf32>
    %153 = arith.subf %149, %152 : vector<8x8xf32>
    %154 = math.exp %153 : vector<8x8xf32>
    %cst_61 = arith.constant dense<0.000000e+00> : vector<8xf32>
    %155 = vector.multi_reduction <add>, %154, %cst_61 [1] : vector<8x8xf32> to vector<8xf32>
    %156 = vector.shape_cast %155 : vector<8xf32> to vector<8x1xf32>
    %157 = tpu.reciprocal %156 {approx = true} : vector<8x1xf32> -> vector<8x1xf32>
    %158 = vector.broadcast %157 : vector<8x1xf32> to vector<8x8xf32>
    %159 = arith.mulf %154, %158 : vector<8x8xf32>
    %cst_62 = arith.constant dense<0.000000e+00> : vector<8x64xf32>
    %160 = tpu.matmul %159, %146, %cst_62 {dimension_numbers = #tpu.dot_dimension_numbers<[1], [0], [0], [1], [0, 0, 1, 1], [], []>} : vector<8x8xf32>, vector<8x64xf32>, vector<8x64xf32> -> vector<8x64xf32>
    %161 = vector.extract_strided_slice %122 {offsets = [64, 0], sizes = [64, 256], strides = [1, 1]} : vector<256x256xf32> to vector<64x256xf32>
    %cst_63 = arith.constant dense<0.000000e+00> : vector<8x256xf32>
    %162 = tpu.matmul %160, %161, %cst_63 {dimension_numbers = #tpu.dot_dimension_numbers<[1], [0], [0], [1], [0, 0, 1, 1], [], []>} : vector<8x64xf32>, vector<64x256xf32>, vector<8x256xf32> -> vector<8x256xf32>
    %163 = arith.addf %143, %162 : vector<8x256xf32>
    %164 = vector.extract_strided_slice %117 {offsets = [0, 128], sizes = [8, 64], strides = [1, 1]} : vector<8x256xf32> to vector<8x64xf32>
    %165 = vector.extract_strided_slice %120 {offsets = [0, 128], sizes = [8, 64], strides = [1, 1]} : vector<8x256xf32> to vector<8x64xf32>
    %166 = vector.extract_strided_slice %121 {offsets = [0, 128], sizes = [8, 64], strides = [1, 1]} : vector<8x256xf32> to vector<8x64xf32>
    %cst_64 = arith.constant dense<0.000000e+00> : vector<8x8xf32>
    %167 = tpu.matmul %164, %165, %cst_64 {dimension_numbers = #tpu.dot_dimension_numbers<[1], [1], [0], [0], [0, 0, 1, 0], [], []>} : vector<8x64xf32>, vector<8x64xf32>, vector<8x8xf32> -> vector<8x8xf32>
    %cst_65 = arith.constant 1.250000e-01 : f32
    %168 = vector.broadcast %cst_65 : f32 to vector<8x8xf32>
    %169 = arith.mulf %167, %168 : vector<8x8xf32>
    %cst_66 = arith.constant dense<0xFF800000> : vector<8xf32>
    %170 = vector.multi_reduction <maximumf>, %169, %cst_66 [1] : vector<8x8xf32> to vector<8xf32>
    %171 = vector.shape_cast %170 : vector<8xf32> to vector<8x1xf32>
    %172 = vector.broadcast %171 : vector<8x1xf32> to vector<8x8xf32>
    %173 = arith.subf %169, %172 : vector<8x8xf32>
    %174 = math.exp %173 : vector<8x8xf32>
    %cst_67 = arith.constant dense<0.000000e+00> : vector<8xf32>
    %175 = vector.multi_reduction <add>, %174, %cst_67 [1] : vector<8x8xf32> to vector<8xf32>
    %176 = vector.shape_cast %175 : vector<8xf32> to vector<8x1xf32>
    %177 = tpu.reciprocal %176 {approx = true} : vector<8x1xf32> -> vector<8x1xf32>
    %178 = vector.broadcast %177 : vector<8x1xf32> to vector<8x8xf32>
    %179 = arith.mulf %174, %178 : vector<8x8xf32>
    %cst_68 = arith.constant dense<0.000000e+00> : vector<8x64xf32>
    %180 = tpu.matmul %179, %166, %cst_68 {dimension_numbers = #tpu.dot_dimension_numbers<[1], [0], [0], [1], [0, 0, 1, 1], [], []>} : vector<8x8xf32>, vector<8x64xf32>, vector<8x64xf32> -> vector<8x64xf32>
    %181 = vector.extract_strided_slice %122 {offsets = [128, 0], sizes = [64, 256], strides = [1, 1]} : vector<256x256xf32> to vector<64x256xf32>
    %cst_69 = arith.constant dense<0.000000e+00> : vector<8x256xf32>
    %182 = tpu.matmul %180, %181, %cst_69 {dimension_numbers = #tpu.dot_dimension_numbers<[1], [0], [0], [1], [0, 0, 1, 1], [], []>} : vector<8x64xf32>, vector<64x256xf32>, vector<8x256xf32> -> vector<8x256xf32>
    %183 = arith.addf %163, %182 : vector<8x256xf32>
    %184 = vector.extract_strided_slice %117 {offsets = [0, 192], sizes = [8, 64], strides = [1, 1]} : vector<8x256xf32> to vector<8x64xf32>
    %185 = vector.extract_strided_slice %120 {offsets = [0, 192], sizes = [8, 64], strides = [1, 1]} : vector<8x256xf32> to vector<8x64xf32>
    %186 = vector.extract_strided_slice %121 {offsets = [0, 192], sizes = [8, 64], strides = [1, 1]} : vector<8x256xf32> to vector<8x64xf32>
    %cst_70 = arith.constant dense<0.000000e+00> : vector<8x8xf32>
    %187 = tpu.matmul %184, %185, %cst_70 {dimension_numbers = #tpu.dot_dimension_numbers<[1], [1], [0], [0], [0, 0, 1, 0], [], []>} : vector<8x64xf32>, vector<8x64xf32>, vector<8x8xf32> -> vector<8x8xf32>
    %cst_71 = arith.constant 1.250000e-01 : f32
    %188 = vector.broadcast %cst_71 : f32 to vector<8x8xf32>
    %189 = arith.mulf %187, %188 : vector<8x8xf32>
    %cst_72 = arith.constant dense<0xFF800000> : vector<8xf32>
    %190 = vector.multi_reduction <maximumf>, %189, %cst_72 [1] : vector<8x8xf32> to vector<8xf32>
    %191 = vector.shape_cast %190 : vector<8xf32> to vector<8x1xf32>
    %192 = vector.broadcast %191 : vector<8x1xf32> to vector<8x8xf32>
    %193 = arith.subf %189, %192 : vector<8x8xf32>
    %194 = math.exp %193 : vector<8x8xf32>
    %cst_73 = arith.constant dense<0.000000e+00> : vector<8xf32>
    %195 = vector.multi_reduction <add>, %194, %cst_73 [1] : vector<8x8xf32> to vector<8xf32>
    %196 = vector.shape_cast %195 : vector<8xf32> to vector<8x1xf32>
    %197 = tpu.reciprocal %196 {approx = true} : vector<8x1xf32> -> vector<8x1xf32>
    %198 = vector.broadcast %197 : vector<8x1xf32> to vector<8x8xf32>
    %199 = arith.mulf %194, %198 : vector<8x8xf32>
    %cst_74 = arith.constant dense<0.000000e+00> : vector<8x64xf32>
    %200 = tpu.matmul %199, %186, %cst_74 {dimension_numbers = #tpu.dot_dimension_numbers<[1], [0], [0], [1], [0, 0, 1, 1], [], []>} : vector<8x8xf32>, vector<8x64xf32>, vector<8x64xf32> -> vector<8x64xf32>
    %201 = vector.extract_strided_slice %122 {offsets = [192, 0], sizes = [64, 256], strides = [1, 1]} : vector<256x256xf32> to vector<64x256xf32>
    %cst_75 = arith.constant dense<0.000000e+00> : vector<8x256xf32>
    %202 = tpu.matmul %200, %201, %cst_75 {dimension_numbers = #tpu.dot_dimension_numbers<[1], [0], [0], [1], [0, 0, 1, 1], [], []>} : vector<8x64xf32>, vector<64x256xf32>, vector<8x256xf32> -> vector<8x256xf32>
    %203 = arith.addf %183, %202 : vector<8x256xf32>
    %c0_76 = arith.constant 0 : index
    %c0_77 = arith.constant 0 : index
    %204 = vector.load %arg12[%c0_76, %c0_77] : memref<1x256xf32, #tpu.memory_space<vmem>>, vector<1x256xf32>
    %c0_78 = arith.constant 0 : index
    %c0_79 = arith.constant 0 : index
    %205 = vector.load %arg13[%c0_78, %c0_79] : memref<1x256xf32, #tpu.memory_space<vmem>>, vector<1x256xf32>
    %cst_80 = arith.constant dense<0.000000e+00> : vector<8xf32>
    %206 = vector.multi_reduction <add>, %203, %cst_80 [1] : vector<8x256xf32> to vector<8xf32>
    %207 = vector.shape_cast %206 : vector<8xf32> to vector<8x1xf32>
    %cst_81 = arith.constant 2.560000e+02 : f32
    %208 = vector.broadcast %cst_81 : f32 to vector<8x1xf32>
    %209 = arith.divf %207, %208 : vector<8x1xf32>
    %210 = vector.broadcast %209 : vector<8x1xf32> to vector<8x256xf32>
    %211 = arith.subf %203, %210 : vector<8x256xf32>
    %212 = arith.mulf %211, %211 : vector<8x256xf32>
    %cst_82 = arith.constant dense<0.000000e+00> : vector<8xf32>
    %213 = vector.multi_reduction <add>, %212, %cst_82 [1] : vector<8x256xf32> to vector<8xf32>
    %214 = vector.shape_cast %213 : vector<8xf32> to vector<8x1xf32>
    %cst_83 = arith.constant 2.560000e+02 : f32
    %215 = vector.broadcast %cst_83 : f32 to vector<8x1xf32>
    %216 = arith.divf %214, %215 : vector<8x1xf32>
    %217 = vector.broadcast %209 : vector<8x1xf32> to vector<8x256xf32>
    %218 = arith.subf %203, %217 : vector<8x256xf32>
    %cst_84 = arith.constant 9.99999974E-6 : f32
    %219 = vector.broadcast %cst_84 : f32 to vector<8x1xf32>
    %220 = arith.addf %216, %219 : vector<8x1xf32>
    %221 = math.rsqrt %220 : vector<8x1xf32>
    %222 = vector.broadcast %221 : vector<8x1xf32> to vector<8x256xf32>
    %223 = arith.mulf %218, %222 : vector<8x256xf32>
    %224 = vector.broadcast %204 : vector<1x256xf32> to vector<8x256xf32>
    %225 = arith.mulf %223, %224 : vector<8x256xf32>
    %226 = vector.broadcast %205 : vector<1x256xf32> to vector<8x256xf32>
    %227 = arith.addf %225, %226 : vector<8x256xf32>
    %228 = arith.addf %115, %227 : vector<8x256xf32>
    %c0_85 = arith.constant 0 : index
    %c0_86 = arith.constant 0 : index
    %229 = vector.load %arg8[%c0_85, %c0_86] : memref<256x1024xf32, #tpu.memory_space<vmem>>, vector<256x1024xf32>
    %cst_87 = arith.constant dense<0.000000e+00> : vector<8x1024xf32>
    %230 = tpu.matmul %228, %229, %cst_87 {dimension_numbers = #tpu.dot_dimension_numbers<[1], [0], [0], [1], [0, 0, 1, 1], [], []>} : vector<8x256xf32>, vector<256x1024xf32>, vector<8x1024xf32> -> vector<8x1024xf32>
    %cst_88 = arith.constant 0.000000e+00 : f32
    %231 = vector.broadcast %cst_88 : f32 to vector<8x1024xf32>
    %232 = arith.maximumf %230, %231 : vector<8x1024xf32>
    %c0_89 = arith.constant 0 : index
    %c0_90 = arith.constant 0 : index
    %233 = vector.load %arg9[%c0_89, %c0_90] : memref<1024x256xf32, #tpu.memory_space<vmem>>, vector<1024x256xf32>
    %cst_91 = arith.constant dense<0.000000e+00> : vector<8x256xf32>
    %234 = tpu.matmul %232, %233, %cst_91 {dimension_numbers = #tpu.dot_dimension_numbers<[1], [0], [0], [1], [0, 0, 1, 1], [], []>} : vector<8x1024xf32>, vector<1024x256xf32>, vector<8x256xf32> -> vector<8x256xf32>
    %cst_92 = arith.constant 0.000000e+00 : f32
    %235 = vector.broadcast %cst_92 : f32 to vector<8x256xf32>
    %236 = arith.maximumf %234, %235 : vector<8x256xf32>
    %c0_93 = arith.constant 0 : index
    %c0_94 = arith.constant 0 : index
    %237 = vector.load %arg14[%c0_93, %c0_94] : memref<1x256xf32, #tpu.memory_space<vmem>>, vector<1x256xf32>
    %c0_95 = arith.constant 0 : index
    %c0_96 = arith.constant 0 : index
    %238 = vector.load %arg15[%c0_95, %c0_96] : memref<1x256xf32, #tpu.memory_space<vmem>>, vector<1x256xf32>
    %cst_97 = arith.constant dense<0.000000e+00> : vector<8xf32>
    %239 = vector.multi_reduction <add>, %236, %cst_97 [1] : vector<8x256xf32> to vector<8xf32>
    %240 = vector.shape_cast %239 : vector<8xf32> to vector<8x1xf32>
    %cst_98 = arith.constant 2.560000e+02 : f32
    %241 = vector.broadcast %cst_98 : f32 to vector<8x1xf32>
    %242 = arith.divf %240, %241 : vector<8x1xf32>
    %243 = vector.broadcast %242 : vector<8x1xf32> to vector<8x256xf32>
    %244 = arith.subf %236, %243 : vector<8x256xf32>
    %245 = arith.mulf %244, %244 : vector<8x256xf32>
    %cst_99 = arith.constant dense<0.000000e+00> : vector<8xf32>
    %246 = vector.multi_reduction <add>, %245, %cst_99 [1] : vector<8x256xf32> to vector<8xf32>
    %247 = vector.shape_cast %246 : vector<8xf32> to vector<8x1xf32>
    %cst_100 = arith.constant 2.560000e+02 : f32
    %248 = vector.broadcast %cst_100 : f32 to vector<8x1xf32>
    %249 = arith.divf %247, %248 : vector<8x1xf32>
    %250 = vector.broadcast %242 : vector<8x1xf32> to vector<8x256xf32>
    %251 = arith.subf %236, %250 : vector<8x256xf32>
    %cst_101 = arith.constant 9.99999974E-6 : f32
    %252 = vector.broadcast %cst_101 : f32 to vector<8x1xf32>
    %253 = arith.addf %249, %252 : vector<8x1xf32>
    %254 = math.rsqrt %253 : vector<8x1xf32>
    %255 = vector.broadcast %254 : vector<8x1xf32> to vector<8x256xf32>
    %256 = arith.mulf %251, %255 : vector<8x256xf32>
    %257 = vector.broadcast %237 : vector<1x256xf32> to vector<8x256xf32>
    %258 = arith.mulf %256, %257 : vector<8x256xf32>
    %259 = vector.broadcast %238 : vector<1x256xf32> to vector<8x256xf32>
    %260 = arith.addf %258, %259 : vector<8x256xf32>
    %261 = arith.addf %228, %260 : vector<8x256xf32>
    %c0_102 = arith.constant 0 : index
    %c0_103 = arith.constant 0 : index
    %c0_104 = arith.constant 0 : index
    %262 = vector.load %arg16[%c0_102, %c0_103, %c0_104] : memref<1x8x256xf32, #tpu.memory_space<vmem>>, vector<1x8x256xf32>
    %263 = vector.shape_cast %262 : vector<1x8x256xf32> to vector<8x256xf32>
    %264 = vector.shape_cast %261 : vector<8x256xf32> to vector<1x8x256xf32>
    tpu.vector_store %arg16[%c0_102, %c0_103, %c0_104], %264 {strides = array<i32>} : memref<1x8x256xf32, #tpu.memory_space<vmem>>, vector<1x8x256xf32>,
    return
  }
  func.func @transform_0(%arg0: i32) -> (i32, i32, i32) {
    %c0_i32 = arith.constant 0 : i32
    %c0_i32_0 = arith.constant 0 : i32
    %c0_i32_1 = arith.constant 0 : i32
    return %arg0, %c0_i32, %c0_i32_0 : i32, i32, i32
  }
  func.func @transform_1(%arg0: i32) -> (i32, i32, i32) {
    %c0_i32 = arith.constant 0 : i32
    %c0_i32_0 = arith.constant 0 : i32
    %c0_i32_1 = arith.constant 0 : i32
    return %arg0, %c0_i32, %c0_i32_0 : i32, i32, i32
  }
  func.func @transform_2(%arg0: i32) -> (i32, i32) {
    %c0_i32 = arith.constant 0 : i32
    %c0_i32_0 = arith.constant 0 : i32
    %c0_i32_1 = arith.constant 0 : i32
    return %c0_i32, %c0_i32_0 : i32, i32
  }
  func.func @transform_3(%arg0: i32) -> (i32, i32) {
    %c0_i32 = arith.constant 0 : i32
    %c0_i32_0 = arith.constant 0 : i32
    %c0_i32_1 = arith.constant 0 : i32
    return %c0_i32, %c0_i32_0 : i32, i32
  }
  func.func @transform_4(%arg0: i32) -> (i32, i32) {
    %c0_i32 = arith.constant 0 : i32
    %c0_i32_0 = arith.constant 0 : i32
    %c0_i32_1 = arith.constant 0 : i32
    return %c0_i32, %c0_i32_0 : i32, i32
  }
  func.func @transform_5(%arg0: i32) -> (i32, i32) {
    %c0_i32 = arith.constant 0 : i32
    %c0_i32_0 = arith.constant 0 : i32
    %c0_i32_1 = arith.constant 0 : i32
    return %c0_i32, %c0_i32_0 : i32, i32
  }
  func.func @transform_6(%arg0: i32) -> (i32, i32) {
    %c0_i32 = arith.constant 0 : i32
    %c0_i32_0 = arith.constant 0 : i32
    %c0_i32_1 = arith.constant 0 : i32
    return %c0_i32, %c0_i32_0 : i32, i32
  }
  func.func @transform_7(%arg0: i32) -> (i32, i32) {
    %c0_i32 = arith.constant 0 : i32
    %c0_i32_0 = arith.constant 0 : i32
    %c0_i32_1 = arith.constant 0 : i32
    return %c0_i32, %c0_i32_0 : i32, i32
  }
  func.func @transform_8(%arg0: i32) -> (i32, i32) {
    %c0_i32 = arith.constant 0 : i32
    %c0_i32_0 = arith.constant 0 : i32
    %c0_i32_1 = arith.constant 0 : i32
    return %c0_i32, %c0_i32_0 : i32, i32
  }
  func.func @transform_9(%arg0: i32) -> (i32, i32) {
    %c0_i32 = arith.constant 0 : i32
    %c0_i32_0 = arith.constant 0 : i32
    %c0_i32_1 = arith.constant 0 : i32
    return %c0_i32, %c0_i32_0 : i32, i32
  }
  func.func @transform_10(%arg0: i32) -> (i32, i32) {
    %c0_i32 = arith.constant 0 : i32
    %c0_i32_0 = arith.constant 0 : i32
    %c0_i32_1 = arith.constant 0 : i32
    return %c0_i32, %c0_i32_0 : i32, i32
  }
  func.func @transform_11(%arg0: i32) -> (i32, i32) {
    %c0_i32 = arith.constant 0 : i32
    %c0_i32_0 = arith.constant 0 : i32
    %c0_i32_1 = arith.constant 0 : i32
    return %c0_i32, %c0_i32_0 : i32, i32
  }
  func.func @transform_12(%arg0: i32) -> (i32, i32) {
    %c0_i32 = arith.constant 0 : i32
    %c0_i32_0 = arith.constant 0 : i32
    %c0_i32_1 = arith.constant 0 : i32
    return %c0_i32, %c0_i32_0 : i32, i32
  }
  func.func @transform_13(%arg0: i32) -> (i32, i32) {
    %c0_i32 = arith.constant 0 : i32
    %c0_i32_0 = arith.constant 0 : i32
    %c0_i32_1 = arith.constant 0 : i32
    return %c0_i32, %c0_i32_0 : i32, i32
  }
  func.func @transform_14(%arg0: i32) -> (i32, i32) {
    %c0_i32 = arith.constant 0 : i32
    %c0_i32_0 = arith.constant 0 : i32
    %c0_i32_1 = arith.constant 0 : i32
    return %c0_i32, %c0_i32_0 : i32, i32
  }
  func.func @transform_15(%arg0: i32) -> (i32, i32, i32) {
    %c0_i32 = arith.constant 0 : i32
    %c0_i32_0 = arith.constant 0 : i32
    %c0_i32_1 = arith.constant 0 : i32
    return %arg0, %c0_i32, %c0_i32_0 : i32, i32, i32
  }
}

</mosaic_0001>

<bundles_post_ra>
// kernel: decoder_blk.1
= control target key start
LH: loop header
LB: loop body
LE: loop exit
PB: predicated region body
PF: predicated region fallthrough
CT: control target
= control target key end

     0   :  { %s5381_s0 = inlined_call_operand.hbm [shape: f32[2,8,256], index: 0, kind: input, shape index: {}]   ;;  %s5382_s1 = inlined_call_operand.hbm [shape: f32[2,8,256], index: 1, kind: input, shape index: {}]   ;;  %s5383_s2 = inlined_call_operand.hbm [shape: f32[256,768], index: 2, kind: input, shape index: {}]   ;;  %s5384_s3 = inlined_call_operand.hbm [shape: f32[256,256], index: 3, kind: input, shape index: {}]   ;;  %s5385_s4 = inlined_call_operand.hbm [shape: f32[256,256], index: 4, kind: input, shape index: {}]   ;;  %s5386_s5 = inlined_call_operand.hbm [shape: f32[256,512], index: 5, kind: input, shape index: {}]   ;;  %s5387_s6 = inlined_call_operand.hbm [shape: f32[256,256], index: 6, kind: input, shape index: {}]   ;;  %s5388_s7 = inlined_call_operand.hbm [shape: f32[256,1024], index: 7, kind: input, shape index: {}]   ;;  %s5389_s8 = inlined_call_operand.hbm [shape: f32[1024,256], index: 8, kind: input, shape index: {}]   ;;  %s5390_s9 = inlined_call_operand.vmem [shape: f32[1,256], index: 9, kind: input, shape index: {}]   ;;  %s5391_s10 = inlined_call_operand.vmem [shape: f32[1,256], index: 10, kind: input, shape index: {}]   ;;  %s5392_s11 = inlined_call_operand.vmem [shape: f32[1,256], index: 11, kind: input, shape index: {}]   ;;  %s5393_s12 = inlined_call_operand.hbm [shape: f32[1,256], index: 12, kind: input, shape index: {}]   ;;  %s5394_s13 = inlined_call_operand.vmem [shape: f32[1,256], index: 13, kind: input, shape index: {}]   ;;  %s5395_s14 = inlined_call_operand.hbm [shape: f32[1,256], index: 14, kind: input, shape index: {}]   ;;  %s5396_s15 = inlined_call_operand.hbm [shape: f32[2,8,256], index: 15, kind: output, shape index: {}]  }
   0x1   :  { %5402 = sst [smem:[#allocation29_spill]] %s5383_s2 }
   0x2   :  { %5403 = sst [smem:[#allocation30_spill]] %s5384_s3 }
   0x3   :  { %5404 = sst [smem:[#allocation31_spill]] %s5385_s4 }
   0x4   :  { %5405 = sst [smem:[#allocation32_spill]] %s5386_s5 }
   0x5   :  { %5406 = sst [smem:[#allocation33_spill]] %s5387_s6 }
   0x6   :  { %5407 = sst [smem:[#allocation34_spill]] %s5388_s7 }
   0x7   :  { %5408 = sst [smem:[#allocation35_spill]] %s5389_s8 }
   0x8   :  { %5409 = sst [smem:[#allocation36_spill]] %s5390_s9 }
   0x9   :  { %5410 = sst [smem:[#allocation37_spill]] %s5391_s10 }
   0xa   :  { %5411 = sst [smem:[#allocation38_spill]] %s5392_s11 }
   0xb   :  { %5412 = sst [smem:[#allocation39_spill]] %s5393_s12 }
   0xc   :  { %5413 = sst [smem:[#allocation40_spill]] %s5394_s13 }
   0xd   :  { %5414 = sst [smem:[#allocation41_spill]] %s5395_s14 }
   0xe   :  { %5415 = sst [smem:[#allocation42_spill]] %s5396_s15 }
   0xf   :  { %20 = vsyncpa [#allocation3], 0 }
  0x10   :  { %22 = vsyncpa [#allocation3 + $0x1], 0 }
  0x11   :  { %23 = vsyncpa [#allocation6], 0 }
  0x12   :  { %25 = vsyncpa [#allocation6 + $0x1], 0 }
  0x13   :  { %26 = vsyncpa [#allocation9], 0 }
  0x14   :  { %27 = vsyncpa [#allocation12], 0 }
  0x15   :  { %28 = vsyncpa [#allocation15], 0 }
  0x16   :  { %29 = vsyncpa [#allocation18], 0 }
  0x17   :  { %30 = vsyncpa [#allocation4], 0 }
  0x18   :  { %32 = vsyncpa [#allocation4 + $0x1], 0  ;;  %s4848_s18 = smov 0   ;;  %s4850_s19 = smov 0  }
  0x19   :  { %s4852_s20 = smov 0   ;;  %s4854_s21 = smov 0  }
  0x1a LB: > { %s5416_s2 = sld [smem:[#allocation29_spill]]  ;;  %s4872_s25 = sadd.s32 4294967295, %s4747_s21   ;;  %s4747_s21 = sphi %s4854_s21, %s5443_s21   ;;  %s4743_s20 = sphi %s4852_s20, %s5442_s20   ;;  %s4739_s19 = sphi %s4850_s19, %s5441_s19   ;;  %s4735_s18 = sphi %s4848_s18, %s5440_s18  }
  0x1b   : > { %p4055_p0 = scmp.ge.s32.totalorder %s4747_s21, 1  ;;  %p59_p1 = scmp.eq.s32.totalorder %s4872_s25, 0 }
  0x1c   : > { %p394_p2 = scmp.lt.s32.totalorder %s4747_s21, 3  ;;  %s4749_s27 = smov [#allocation7]  }
  0x1d   : > { %s407_s28 = sshll.u32 %s4749_s27, 4  ;;  %s5418_s3 = sld [smem:[#allocation30_spill]]  ;;  %s408_s28 = int_to_ptr.vmem [resolvable:$true] %s407_s28 }
  0x1e   : > { %p4877_p3 = pnand %p4055_p0, %p394_p2  ;;  %s4750_s22 = smov [#allocation8]  }
  0x1f   : > { %s421_s23 = sshll.u32 %s4750_s22, 4  ;;  %s4751_s27 = smov 768   ;;  %s422_s23 = int_to_ptr.vmem [resolvable:$true] %s421_s23 }
  0x20   : > { %s405_s24 = sshll.u32 %s5416_s2, 4  ;;  %p4175_p4 = pneg %p4877_p3  ;;  %s406_s24 = int_to_ptr.hbm [resolvable:$true] %s405_s24 }
  0x21   : > { %s4752_s2 = smov 48   ;;  %s5398_s15 = smov 256  }
  0x22   : > { %p4889_p6 = pnand %p4175_p4, %p59_p1  ;;  %s5400_s13 = smov 16  }
  0x23   : > { %s419_s16 = sshll.u32 %s5418_s3, 4  ;;  %s5420_s5 = sld [smem:[#allocation32_spill]]  ;;  %s420_s16 = int_to_ptr.hbm [resolvable:$true] %s419_s16 }
  0x24   : > { %4178 = dma.hbm_to_vmem [thread:$0]  (!%p4889_p6), %s406_s24, 24576, %s408_s28, [#allocation6], %s4751_s27, %s4751_s27, %s4752_s2  }
  0x25   : > { %4181 = dma.hbm_to_vmem [thread:$0]  (!%p4889_p6), %s420_s16, 8192, %s422_s23, [#allocation9], %s5398_s15, %s5398_s15, %s5400_s13  }
  0x26   : > { %s4755_s22 = smov [#allocation11]   ;;  %s5421_s7 = sld [smem:[#allocation34_spill]] }
  0x27   : > { %s449_s11 = sshll.u32 %s4755_s22, 4  ;;  %s4756_s24 = smov 512   ;;  %s450_s11 = int_to_ptr.vmem [resolvable:$true] %s449_s11 }
  0x28   : > { %s4757_s28 = smov 32   ;;  %s4758_s16 = smov [#allocation14]  }
  0x29   : > { %s447_s3 = sshll.u32 %s5420_s5, 4  ;;  %s477_s23 = sshll.u32 %s4758_s16, 4  ;;  %s448_s3 = int_to_ptr.hbm [resolvable:$true] %s447_s3  ;;  %s478_s23 = int_to_ptr.vmem [resolvable:$true] %s477_s23 }
  0x2a   : > { %4187 = dma.hbm_to_vmem [thread:$0]  (!%p4889_p6), %s448_s3, 16384, %s450_s11, [#allocation12], %s4756_s24, %s4756_s24, %s4757_s28  }
  0x2b   : > { %s4759_s27 = smov 1024   ;;  %s4760_s29 = smov 64  }
  0x2c   : > { %s475_s2 = sshll.u32 %s5421_s7, 4  ;;  %s5422_s12 = sld [smem:[#allocation39_spill]]  ;;  %s476_s2 = int_to_ptr.hbm [resolvable:$true] %s475_s2 }
  0x2d   : > { %4193 = dma.hbm_to_vmem [thread:$0]  (!%p4889_p6), %s476_s2, 32768, %s478_s23, [#allocation15], %s4759_s27, %s4759_s27, %s4760_s29  }
  0x2e   : > { %s4761_s9 = smov [#allocation17]   ;;  %s5423_s4 = sld [smem:[#allocation31_spill]] }
  0x2f   : > { %s515_s10 = sshll.u32 %s4761_s9, 4  ;;  %s4762_s24 = smov [#allocation10]   ;;  %s516_s10 = int_to_ptr.vmem [resolvable:$true] %s515_s10 }
  0x30   : > { %s435_s28 = sshll.u32 %s4762_s24, 4  ;;  %s5424_s6 = sld [smem:[#allocation33_spill]]  ;;  %s436_s28 = int_to_ptr.vmem [resolvable:$true] %s435_s28 }
  0x31   : > { %s5425_s27 = smov 16   ;;  %s5426_s29 = smov 256  }
  0x32   : > { %s513_s15 = sshll.u32 %s5422_s12, 4  ;;  %s5427_s8 = sld [smem:[#allocation35_spill]]  ;;  %s514_s15 = int_to_ptr.hbm [resolvable:$true] %s513_s15 }
  0x33   : > { %4199 = dma.hbm_to_vmem [thread:$0]  (!%p4889_p6), %s514_s15, 32, %s516_s10, [#allocation18]  }
  0x34   : > { %s433_s11 = sshll.u32 %s5423_s4, 4  ;;  %s4763_s22 = smov [#allocation13]   ;;  %s434_s11 = int_to_ptr.hbm [resolvable:$true] %s433_s11 }
  0x35   : > { %4184 = dma.hbm_to_vmem [thread:$0]  (!%p4889_p6), %s434_s11, 8192, %s436_s28, [#allocation9], %s5426_s29, %s5426_s29, %s5425_s27  }
  0x36   : > { %s461_s23 = sshll.u32 %s5424_s6, 4  ;;  %s463_s9 = sshll.u32 %s4763_s22, 4  ;;  %s462_s23 = int_to_ptr.hbm [resolvable:$true] %s461_s23  ;;  %s464_s9 = int_to_ptr.vmem [resolvable:$true] %s463_s9 }
  0x37   : > { %4190 = dma.hbm_to_vmem [thread:$0]  (!%p4889_p6), %s462_s23, 8192, %s464_s9, [#allocation12], %s5426_s29, %s5426_s29, %s5425_s27  }
  0x38   : > { %s489_s15 = sshll.u32 %s5427_s8, 4  ;;  %s4764_s10 = smov [#allocation16]   ;;  %s490_s15 = int_to_ptr.hbm [resolvable:$true] %s489_s15 }
  0x39   : > { %s491_s3 = sshll.u32 %s4764_s10, 4  ;;  %s5428_s14 = sld [smem:[#allocation41_spill]]  ;;  %s492_s3 = int_to_ptr.vmem [resolvable:$true] %s491_s3 }
  0x3a   : > { %4196 = dma.hbm_to_vmem [thread:$0]  (!%p4889_p6), %s490_s15, 32768, %s492_s3, [#allocation15], %s5426_s29, %s5426_s29, %s5425_s27  }
  0x3b   : > { %s4765_s16 = smov [#allocation19]   ;;  %s4054_s23 = sadd.s32 4294967294, %s4747_s21  }
  0x3c   : > { %s530_s2 = sshll.u32 %s4765_s16, 4  ;;  %s4946_s30 = sadd.s32 1, %s4747_s21   ;;  %s531_s2 = int_to_ptr.vmem [resolvable:$true] %s530_s2 }
  0x3d   : > { %s45_s13 = sadd.s32 1, %s4743_s20  ;;  %s42_s22 = ssub.s32 %s4747_s21, %s4946_s30 }
  0x3e   : > { %p52_p7 = scmp.ne.s32.totalorder %s4743_s20, %s4739_s19  ;;  %p43_p8 = scmp.eq.s32.totalorder %s42_s22, 0 }
  0x3f   : > { %s528_s28 = sshll.u32 %s5428_s14, 4  ;;  %p53_p9 = scmp.eq.s32.totalorder %s4747_s21, 0  ;;  %s529_s28 = int_to_ptr.hbm [resolvable:$true] %s528_s28 }
  0x40   : > { %4202 = dma.hbm_to_vmem [thread:$0]  (!%p4889_p6), %s529_s28, 32, %s531_s2, [#allocation18]  }
  0x41   : > { %p58_p10 = scmp.ne.s32.totalorder %s4739_s19, %s4735_s18  ;;  %p381_p11 = scmp.eq.s32.totalorder %s4872_s25, 1 }
  0x42   : > { %s4958_s27 = scalar_select %p43_p8, %s4743_s20, %s45_s13  }
  0x43   : > { %p4960_p12 = por %p53_p9, %p52_p7  ;;  %p4966_p13 = por %p59_p1, %p58_p10 }
  0x44   : > { %p4970_p0 = por %p381_p11, %p52_p7  ;;  %p387_p2 = scmp.eq.s32.totalorder %s4054_s23, 1 }
  0x45   : > { %p4223_p4 = scmp.lt.s32.totalorder %s4747_s21, 2  ;;  %s541_s9 = sand.u32 1, %s4743_s20  }
  0x46   : > { %p4976_p6 = por %p387_p2, %p58_p10  ;;  %s4066_s3 = sshll.u32 %s541_s9, 4 }
  0x47   : > { %s4130_s11 = sshll.u32 %s4747_s21, 4  ;;  %s545_s13 = scalar_lea.vmem [#allocation2], %s4066_s3 }
  0x48   : > { %s550_s16 = scalar_lea.hbm %s5381_s0, %s4130_s11  ;;  %s554_s22 = sshll.u32 %s545_s13, 4  ;;  %s555_s22 = int_to_ptr.vmem [resolvable:$true] %s554_s22 }
  0x49   : > { %s552_s2 = sshll.u32 %s550_s16, 4  ;;  %p4986_p7 = pnand %p4223_p4, %p4960_p12  ;;  %s553_s2 = int_to_ptr.hbm [resolvable:$true] %s552_s2 }
  0x4a   : > { %s570_s6 = scalar_lea.hbm %s5382_s1, %s4130_s11  ;;  %s561_s7 = sand.u32 1, %s4747_s21  }
  0x4b   : > { %s542_s8 = scalar_lea.sflag [#allocation3], %s541_s9  ;;  %s4597_s24 = sshra.s32 %s553_s2, 4  ;;  %s4598_s24 = int_to_ptr.hbm [resolvable:$true] %s4597_s24 }
  0x4c   : > { %s4599_s28 = scalar_lea.hbm %s4598_s24, 16  ;;  %p4601_p9 = pneg %p4986_p7 }
  0x4d   : > { %p4600_p8 = scmp.ne.s32.totalorder %s4598_s24, %s4599_s28  ;;  %s4604_s13 = scalar_lea.hbm %s5381_s0, 32 }
  0x4e   : > { %p4605_p12 = scmp.lt.s32.totalorder %s4598_s24, %s5381_s0  ;;  %p4606_p2 = scmp.lt.s32.totalorder %s4604_s13, %s4599_s28 }
  0x4f   : > { %p4602_p10 = pnand %p4601_p9, %p4600_p8 }
  0x50   : > { %p4607_p4 = por %p4606_p2, %p4605_p12 }
  0x51   : > { %p4603_p11 = pneg %p4602_p10 }
  0x53   : > { %p4608_p5 = pnand %p4607_p4, %p4603_p11 }
  0x55   : > { %4611 = shalt.err (!%p4608_p5)
}
  0x56   : > { %4206 = dma.hbm_to_vmem [thread:$0]  (!%p4986_p7), %s553_s2, 256, %s555_s22, %s542_s8  }
  0x57   : > { %s572_s9 = sshll.u32 %s570_s6, 4  ;;  %s565_s11 = scalar_lea.vmem [#allocation5], %s4066_s3  ;;  %s573_s9 = int_to_ptr.hbm [resolvable:$true] %s572_s9 }
  0x58   : > { %s574_s12 = sshll.u32 %s565_s11, 4  ;;  %s562_s14 = scalar_lea.sflag [#allocation6], %s561_s7  ;;  %s575_s12 = int_to_ptr.vmem [resolvable:$true] %s574_s12 }
  0x59   : > { %s4627_s29 = sshra.s32 %s573_s9, 4  ;;  %s4634_s13 = scalar_lea.hbm %s5382_s1, 32  ;;  %s4628_s29 = int_to_ptr.hbm [resolvable:$true] %s4627_s29 }
  0x5a   : > { %s4629_s16 = scalar_lea.hbm %s4628_s29, 16  ;;  %p4635_p5 = scmp.lt.s32.totalorder %s4628_s29, %s5382_s1 }
  0x5b   : > { %p4630_p8 = scmp.ne.s32.totalorder %s4628_s29, %s4629_s16  ;;  %p4636_p11 = scmp.lt.s32.totalorder %s4634_s13, %s4629_s16 }
  0x5d   : > { %p4632_p10 = pnand %p4630_p8, %p4601_p9  ;;  %p4637_p2 = por %p4636_p11, %p4635_p5 }
  0x5f   : > { %p4633_p12 = pneg %p4632_p10 }
  0x61   : > { %p4638_p4 = pnand %p4637_p2, %p4633_p12 }
  0x63   : > { %4641 = shalt.err (!%p4638_p4)
}
  0x64   : > { %4209 = dma.hbm_to_vmem [thread:$0]  (!%p4986_p7), %s573_s9, 256, %s575_s12, %s562_s14  }
  0x65   : > { %583 = sbr.rel (%p4877_p3) target bundleno = 4252 (0x109c), region = 80  ;;  %s5021_s6 = sand.u32 (!%p4877_p3), 1, %s4739_s19  }
  0x66   : > { %s5024_s7 = sshll.u32 (!%p4877_p3), %s5021_s6, 4  ;;  %s586_s3 = scalar_lea.sflag (!%p4877_p3), [#allocation3], %s5021_s6 }
  0x67   : > { %s5028_s2 = scalar_lea.vmem (!%p4877_p3), [#allocation2], %s5024_s7 }
  0x6a   : > { %4702 = dma.done.wait (%p4966_p13), %s586_s3, 256  }
  0x6b   : > { %4704 = vsyncadd (%p4966_p13), %s586_s3, 4294967040  ;;  %s595_s12 = sand.u32 1, %s4872_s25   ;;  %s599_s26 = scalar_lea.vmem [#allocation5], %s5024_s7 }
  0x6c   : > { %s596_s14 = scalar_lea.sflag [#allocation6], %s595_s12 }
  0x6d   : > { %4706 = dma.done.wait (%p4966_p13), %s596_s14, 256  }
  0x6e   : > { %4708 = vsyncadd (%p4966_p13), %s596_s14, 4294967040 }
  0x6f   : > { %4710 = dma.done.wait (%p59_p1), [#allocation6], 24576  }
  0x70   : > { %4712 = vsyncadd (%p59_p1), [#allocation6], 4294942720 }
  0x71   : > { %4714 = dma.done.wait (%p59_p1), [#allocation9], 16384  }
  0x72   : > { %4716 = vsyncadd (%p59_p1), [#allocation9], 4294950912 }
  0x73   : > { %4718 = dma.done.wait (%p59_p1), [#allocation12], 24576  }
  0x74   : > { %4720 = vsyncadd (%p59_p1), [#allocation12], 4294942720 }
  0x75   : > { %4722 = dma.done.wait (%p59_p1), [#allocation15], 65536  }
  0x76   : > { %4724 = vsyncadd (%p59_p1), [#allocation15], 4294901760 }
  0x77   : > { %4726 = dma.done.wait (%p59_p1), [#allocation18], 64  }
  0x78   : > { %4728 = vsyncadd (%p59_p1), [#allocation18], 4294967232  ;;  %v791_v0 = vld [vmem:[#allocation7 + $0x2d0] sm:$0xff]  ;;  %v785_v2 = vld [vmem:[#allocation7 + $0x2a0] sm:$0xff]  ;;  %vm1197_vm0 = vcmask 523264   ;;  %s4766_s17 = smov 64  }
  0x79   : > { %v887_v1 = vld [vmem:[#allocation7 + $0x5d0] sm:$0xff]  ;;  %893 = vmatpush.msra.mxu0 %v791_v0  ;;  %v881_v3 = vld [vmem:[#allocation7 + $0x5a0] sm:$0xff]  ;;  %v5064_v35 = vld [vmem:[%s5028_s2 + $0x8] sm:$0xff]  ;;  %vm1225_vm1 = vcmask 64512   ;;  %s5434_s5 = sld [smem:[#allocation36_spill]]  ;;  %s4132_s3 = sshll.u32 %s4872_s25, 4 }
  0x7a   : > { %913 = vmatpush.msra.mxu1 %v887_v1  ;;  %v779_v4 = vld [vmem:[#allocation7 + $0x270] sm:$0xff]  ;;  %v773_v6 = vld [vmem:[#allocation7 + $0x240] sm:$0xff]  ;;  %v792_v38 = vld [vmem:[#allocation7 + $0x2d8] sm:$0xff]  ;;  %s5435_s29 = sld [smem:[#allocation37_spill]]  ;;  %s3860_s25 = scalar_lea.sflag [#allocation4], %s5021_s6 }
  0x7b   : > { %v875_v5 = vld [vmem:[#allocation7 + $0x570] sm:$0xff]  ;;  %894 = vmatpush.msra.mxu0 %v785_v2  ;;  %v869_v7 = vld [vmem:[#allocation7 + $0x540] sm:$0xff]  ;;  %v786_v41 = vld [vmem:[#allocation7 + $0x2a8] sm:$0xff]  ;;  %933 = vmatpush.msra.mxu2 %v792_v38  ;;  %s5436_s28 = sld [smem:[#allocation38_spill]] }
  0x7c   : > { %914 = vmatpush.msra.mxu1 %v881_v3  ;;  %v767_v8 = vld [vmem:[#allocation7 + $0x210] sm:$0xff]  ;;  %v761_v10 = vld [vmem:[#allocation7 + $0x1e0] sm:$0xff]  ;;  %v780_v44 = vld [vmem:[#allocation7 + $0x278] sm:$0xff]  ;;  %s5437_s8 = sld [smem:[#allocation40_spill]] }
  0x7d   : > { %895 = vmatpush.msra.mxu0 %v779_v4  ;;  %v863_v9 = vld [vmem:[#allocation7 + $0x510] sm:$0xff]  ;;  %v857_v11 = vld [vmem:[#allocation7 + $0x4e0] sm:$0xff]  ;;  %934 = vmatpush.msra.mxu2 %v786_v41  ;;  %v774_v47 = vld [vmem:[#allocation7 + $0x248] sm:$0xff]  ;;  %s5438_s14 = sld [smem:[#allocation42_spill]] }
  0x7e   : > { %915 = vmatpush.msra.mxu1 %v875_v5  ;;  %v755_v12 = vld [vmem:[#allocation7 + $0x1b0] sm:$0xff]  ;;  %v749_v14 = vld [vmem:[#allocation7 + $0x180] sm:$0xff]  ;;  %v768_v50 = vld [vmem:[#allocation7 + $0x218] sm:$0xff] }
  0x7f   : > { %896 = vmatpush.msra.mxu0 %v773_v6  ;;  %v851_v13 = vld [vmem:[#allocation7 + $0x4b0] sm:$0xff]  ;;  %v845_v15 = vld [vmem:[#allocation7 + $0x480] sm:$0xff]  ;;  %935 = vmatpush.msra.mxu2 %v780_v44  ;;  %v762_v53 = vld [vmem:[#allocation7 + $0x1e8] sm:$0xff] }
  0x80   : > { %916 = vmatpush.msra.mxu1 %v869_v7  ;;  %v743_v16 = vld [vmem:[#allocation7 + $0x150] sm:$0xff]  ;;  %v737_v18 = vld [vmem:[#allocation7 + $0x120] sm:$0xff]  ;;  %v756_v56 = vld [vmem:[#allocation7 + $0x1b8] sm:$0xff] }
  0x81   : > { %897 = vmatpush.msra.mxu0 %v767_v8  ;;  %v839_v17 = vld [vmem:[#allocation7 + $0x450] sm:$0xff]  ;;  %v833_v19 = vld [vmem:[#allocation7 + $0x420] sm:$0xff]  ;;  %936 = vmatpush.msra.mxu2 %v774_v47  ;;  %v750_v59 = vld [vmem:[#allocation7 + $0x188] sm:$0xff] }
  0x82   : > { %917 = vmatpush.msra.mxu1 %v863_v9  ;;  %v731_v20 = vld [vmem:[#allocation7 + $0xf0] sm:$0xff]  ;;  %v725_v22 = vld [vmem:[#allocation7 + $0xc0] sm:$0xff]  ;;  %v744_v62 = vld [vmem:[#allocation7 + $0x158] sm:$0xff] }
  0x83   : > { %898 = vmatpush.msra.mxu0 %v761_v10  ;;  %v827_v21 = vld [vmem:[#allocation7 + $0x3f0] sm:$0xff]  ;;  %v821_v23 = vld [vmem:[#allocation7 + $0x3c0] sm:$0xff]  ;;  %937 = vmatpush.msra.mxu2 %v768_v50  ;;  %v738_v1 = vld [vmem:[#allocation7 + $0x128] sm:$0xff] }
  0x84   : > { %918 = vmatpush.msra.mxu1 %v857_v11  ;;  %v719_v24 = vld [vmem:[#allocation7 + $0x90] sm:$0xff]  ;;  %v713_v26 = vld [vmem:[#allocation7 + $0x60] sm:$0xff]  ;;  %v732_v4 = vld [vmem:[#allocation7 + $0xf8] sm:$0xff] }
  0x85   : > { %899 = vmatpush.msra.mxu0 %v755_v12  ;;  %v815_v25 = vld [vmem:[#allocation7 + $0x390] sm:$0xff]  ;;  %v809_v27 = vld [vmem:[#allocation7 + $0x360] sm:$0xff]  ;;  %938 = vmatpush.msra.mxu2 %v762_v53  ;;  %v726_v7 = vld [vmem:[#allocation7 + $0xc8] sm:$0xff] }
  0x86   : > { %919 = vmatpush.msra.mxu1 %v851_v13  ;;  %v707_v28 = vld [vmem:[#allocation7 + $0x30] sm:$0xff]  ;;  %v701_v30 = vld [vmem:[#allocation7] sm:$0xff]  ;;  %v720_v10 = vld [vmem:[#allocation7 + $0x98] sm:$0xff] }
  0x87   : > { %900 = vmatpush.msra.mxu0 %v749_v14  ;;  %v803_v29 = vld [vmem:[#allocation7 + $0x330] sm:$0xff]  ;;  %v797_v31 = vld [vmem:[#allocation7 + $0x300] sm:$0xff]  ;;  %939 = vmatpush.msra.mxu2 %v756_v56  ;;  %v714_v13 = vld [vmem:[#allocation7 + $0x68] sm:$0xff] }
  0x88   : > { %920 = vmatpush.msra.mxu1 %v845_v15  ;;  %v793_v32 = vld [vmem:[#allocation7 + $0x2e0] sm:$0xff]  ;;  %v787_v36 = vld [vmem:[#allocation7 + $0x2b0] sm:$0xff]  ;;  %v784_v38 = vld [vmem:[#allocation7 + $0x298] sm:$0xff] }
  0x89   : > { %901 = vmatpush.msra.mxu0 %v743_v16  ;;  %v889_v33 = vld [vmem:[#allocation7 + $0x5e0] sm:$0xff]  ;;  %v883_v37 = vld [vmem:[#allocation7 + $0x5b0] sm:$0xff]  ;;  %940 = vmatpush.msra.mxu2 %v750_v59  ;;  %v708_v16 = vld [vmem:[#allocation7 + $0x38] sm:$0xff] }
  0x8a   : > { %921 = vmatpush.msra.mxu1 %v839_v17  ;;  %v5061_v34 = vld [vmem:[%s5028_s2] sm:$0xff]  ;;  %v702_v17 = vld [vmem:[#allocation7 + $0x8] sm:$0xff]  ;;  %v748_v44 = vld [vmem:[#allocation7 + $0x178] sm:$0xff] }
  0x8b   : > { %902 = vmatpush.msra.mxu0 %v737_v18  ;;  %v781_v39 = vld [vmem:[#allocation7 + $0x280] sm:$0xff]  ;;  %v775_v42 = vld [vmem:[#allocation7 + $0x250] sm:$0xff]  ;;  %941 = vmatpush.msra.mxu2 %v744_v62  ;;  %v794_v18 = vld [vmem:[#allocation7 + $0x2e8] sm:$0xff] }
  0x8c   : > { %922 = vmatpush.msra.mxu1 %v833_v19  ;;  %v877_v40 = vld [vmem:[#allocation7 + $0x580] sm:$0xff]  ;;  %v871_v43 = vld [vmem:[#allocation7 + $0x550] sm:$0xff]  ;;  %v788_v19 = vld [vmem:[#allocation7 + $0x2b8] sm:$0xff] }
  0x8d   : > { %903 = vmatpush.msra.mxu0 %v731_v20  ;;  %v769_v45 = vld [vmem:[#allocation7 + $0x220] sm:$0xff]  ;;  %v763_v48 = vld [vmem:[#allocation7 + $0x1f0] sm:$0xff]  ;;  %942 = vmatpush.msra.mxu2 %v738_v1  ;;  %v782_v20 = vld [vmem:[#allocation7 + $0x288] sm:$0xff] }
  0x8e   : > { %923 = vmatpush.msra.mxu1 %v827_v21  ;;  %v865_v46 = vld [vmem:[#allocation7 + $0x520] sm:$0xff]  ;;  %v859_v49 = vld [vmem:[#allocation7 + $0x4f0] sm:$0xff]  ;;  %v776_v21 = vld [vmem:[#allocation7 + $0x258] sm:$0xff] }
  0x8f   : > { %904 = vmatpush.msra.mxu0 %v725_v22  ;;  %v757_v51 = vld [vmem:[#allocation7 + $0x1c0] sm:$0xff]  ;;  %v751_v54 = vld [vmem:[#allocation7 + $0x190] sm:$0xff]  ;;  %943 = vmatpush.msra.mxu2 %v732_v4  ;;  %v770_v22 = vld [vmem:[#allocation7 + $0x228] sm:$0xff] }
  0x90   : > { %924 = vmatpush.msra.mxu1 %v821_v23  ;;  %v853_v52 = vld [vmem:[#allocation7 + $0x4c0] sm:$0xff]  ;;  %v847_v55 = vld [vmem:[#allocation7 + $0x490] sm:$0xff]  ;;  %v764_v23 = vld [vmem:[#allocation7 + $0x1f8] sm:$0xff] }
  0x91   : > { %905 = vmatpush.msra.mxu0 %v719_v24  ;;  %v745_v57 = vld [vmem:[#allocation7 + $0x160] sm:$0xff]  ;;  %v739_v60 = vld [vmem:[#allocation7 + $0x130] sm:$0xff]  ;;  %944 = vmatpush.msra.mxu2 %v726_v7  ;;  %v758_v24 = vld [vmem:[#allocation7 + $0x1c8] sm:$0xff] }
  0x92   : > { %925 = vmatpush.msra.mxu1 %v815_v25  ;;  %v841_v58 = vld [vmem:[#allocation7 + $0x460] sm:$0xff]  ;;  %v835_v61 = vld [vmem:[#allocation7 + $0x430] sm:$0xff]  ;;  %v752_v25 = vld [vmem:[#allocation7 + $0x198] sm:$0xff] }
  0x93   : > { %906 = vmatpush.msra.mxu0 %v713_v26  ;;  %v733_v63 = vld [vmem:[#allocation7 + $0x100] sm:$0xff]  ;;  %v727_v2 = vld [vmem:[#allocation7 + $0xd0] sm:$0xff]  ;;  %945 = vmatpush.msra.mxu2 %v720_v10  ;;  %v746_v26 = vld [vmem:[#allocation7 + $0x168] sm:$0xff] }
  0x94   : > { %926 = vmatpush.msra.mxu1 %v809_v27  ;;  %v829_v0 = vld [vmem:[#allocation7 + $0x400] sm:$0xff]  ;;  %v823_v3 = vld [vmem:[#allocation7 + $0x3d0] sm:$0xff]  ;;  %v740_v27 = vld [vmem:[#allocation7 + $0x138] sm:$0xff] }
  0x95   : > { %907 = vmatpush.msra.mxu0 %v707_v28  ;;  %v721_v5 = vld [vmem:[#allocation7 + $0xa0] sm:$0xff]  ;;  %v715_v8 = vld [vmem:[#allocation7 + $0x70] sm:$0xff]  ;;  %946 = vmatpush.msra.mxu2 %v714_v13  ;;  %v734_v28 = vld [vmem:[#allocation7 + $0x108] sm:$0xff] }
  0x96   : > { %927 = vmatpush.msra.mxu1 %v803_v29  ;;  %v817_v6 = vld [vmem:[#allocation7 + $0x3a0] sm:$0xff]  ;;  %v811_v9 = vld [vmem:[#allocation7 + $0x370] sm:$0xff]  ;;  %v728_v29 = vld [vmem:[#allocation7 + $0xd8] sm:$0xff] }
  0x97   : > { %908 = vmatpush.msra.mxu0 %v701_v30  ;;  %v709_v11 = vld [vmem:[#allocation7 + $0x40] sm:$0xff]  ;;  %v703_v14 = vld [vmem:[#allocation7 + $0x10] sm:$0xff]  ;;  %947 = vmatpush.msra.mxu2 %v708_v16  ;;  %v722_v30 = vld [vmem:[#allocation7 + $0xa8] sm:$0xff] }
  0x98   : > { %928 = vmatpush.msra.mxu1 %v797_v31  ;;  %909 = vmatmul.f32.vlgmr.msra.gmra.mxu0 %v5061_v34  ;;  %v805_v12 = vld [vmem:[#allocation7 + $0x340] sm:$0xff]  ;;  %v799_v15 = vld [vmem:[#allocation7 + $0x310] sm:$0xff]  ;;  %v716_v31 = vld [vmem:[#allocation7 + $0x78] sm:$0xff] }
  0x99   : > { %973 = vmatpush.msrb.mxu0 %v793_v32  ;;  %929 = vmatmul.f32.vlgmr.msra.gmra.mxu1 %v5064_v35  ;;  %v710_v32 = vld [vmem:[#allocation7 + $0x48] sm:$0xff]  ;;  %v712_v50 = vld [vmem:[#allocation7 + $0x58] sm:$0xff] }
  0x9a   : > { %993 = vmatpush.msrb.mxu1 %v889_v33  ;;  %948 = vmatpush.msra.mxu2 %v702_v17  ;;  %v704_v33 = vld [vmem:[#allocation7 + $0x18] sm:$0xff]  ;;  %v766_v41 = vld [vmem:[#allocation7 + $0x208] sm:$0xff] }
  0x9b   : > { %974 = vmatpush.msrb.mxu0 %v787_v36  ;;  %949 = vmatmul.f32.vlgmr.msra.gmra.mxu2 %v5061_v34  ;;  %v796_v36 = vld [vmem:[#allocation7 + $0x2f8] sm:$0xff]  ;;  %v730_v47 = vld [vmem:[#allocation7 + $0xe8] sm:$0xff] }
  0x9c   : > { %994 = vmatpush.msrb.mxu1 %v883_v37  ;;  %1013 = vmatpush.msrb.mxu2 %v794_v18  ;;  %v790_v37 = vld [vmem:[#allocation7 + $0x2c8] sm:$0xff]  ;;  %v864_v56 = vld [vmem:[#allocation7 + $0x518] sm:$0xff] }
  0x9d   : > { %975 = vmatpush.msrb.mxu0 %v781_v39  ;;  %v778_v39 = vld [vmem:[#allocation7 + $0x268] sm:$0xff]  ;;  %v840_v62 = vld [vmem:[#allocation7 + $0x458] sm:$0xff] }
  0x9e   : > { %995 = vmatpush.msrb.mxu1 %v877_v40  ;;  %1014 = vmatpush.msrb.mxu2 %v788_v19  ;;  %v772_v40 = vld [vmem:[#allocation7 + $0x238] sm:$0xff]  ;;  %v882_v53 = vld [vmem:[#allocation7 + $0x5a8] sm:$0xff] }
  0x9f   : > { %976 = vmatpush.msrb.mxu0 %v775_v42  ;;  %v760_v42 = vld [vmem:[#allocation7 + $0x1d8] sm:$0xff]  ;;  %v822_v1 = vld [vmem:[#allocation7 + $0x3c8] sm:$0xff] }
  0xa0   : > { %996 = vmatpush.msrb.mxu1 %v871_v43  ;;  %1015 = vmatpush.msrb.mxu2 %v782_v20  ;;  %v754_v43 = vld [vmem:[#allocation7 + $0x1a8] sm:$0xff]  ;;  %v872_v13 = vld [vmem:[#allocation7 + $0x558] sm:$0xff] }
  0xa1   : > { %977 = vmatpush.msrb.mxu0 %v769_v45  ;;  %v742_v45 = vld [vmem:[#allocation7 + $0x148] sm:$0xff]  ;;  %v848_v17 = vld [vmem:[#allocation7 + $0x498] sm:$0xff] }
  0xa2   : > { %997 = vmatpush.msrb.mxu1 %v865_v46  ;;  %1016 = vmatpush.msrb.mxu2 %v776_v21  ;;  %v736_v46 = vld [vmem:[#allocation7 + $0x118] sm:$0xff]  ;;  %v890_v10 = vld [vmem:[#allocation7 + $0x5e8] sm:$0xff] }
  0xa3   : > { %978 = vmatpush.msrb.mxu0 %v763_v48  ;;  %v724_v48 = vld [vmem:[#allocation7 + $0xb8] sm:$0xff]  ;;  %v854_v16 = vld [vmem:[#allocation7 + $0x4c8] sm:$0xff] }
  0xa4   : > { %998 = vmatpush.msrb.mxu1 %v859_v49  ;;  %1017 = vmatpush.msrb.mxu2 %v770_v22  ;;  %v718_v49 = vld [vmem:[#allocation7 + $0x88] sm:$0xff]  ;;  %v836_v19 = vld [vmem:[#allocation7 + $0x438] sm:$0xff] }
  0xa5   : > { %979 = vmatpush.msrb.mxu0 %v757_v51  ;;  %v706_v51 = vld [vmem:[#allocation7 + $0x28] sm:$0xff]  ;;  %v824_v21 = vld [vmem:[#allocation7 + $0x3d8] sm:$0xff] }
  0xa6   : > { %999 = vmatpush.msrb.mxu1 %v853_v52  ;;  %1018 = vmatpush.msrb.mxu2 %v764_v23  ;;  %v888_v52 = vld [vmem:[#allocation7 + $0x5d8] sm:$0xff]  ;;  %v842_v18 = vld [vmem:[#allocation7 + $0x468] sm:$0xff] }
  0xa7   : > { %980 = vmatpush.msrb.mxu0 %v751_v54  ;;  %953 = vmatpush.msra.mxu3 %v888_v52  ;;  %v876_v54 = vld [vmem:[#allocation7 + $0x578] sm:$0xff]  ;;  %v830_v20 = vld [vmem:[#allocation7 + $0x408] sm:$0xff]  ;;  %v873_v52 = vld [vmem:[#allocation7 + $0x560] sm:$0xff] }
  0xa8   : > { %1000 = vmatpush.msrb.mxu1 %v847_v55  ;;  %1019 = vmatpush.msrb.mxu2 %v758_v24  ;;  %v870_v55 = vld [vmem:[#allocation7 + $0x548] sm:$0xff]  ;;  %v812_v23 = vld [vmem:[#allocation7 + $0x378] sm:$0xff] }
  0xa9   : > { %981 = vmatpush.msrb.mxu0 %v745_v57  ;;  %954 = vmatpush.msra.mxu3 %v882_v53  ;;  %v858_v57 = vld [vmem:[#allocation7 + $0x4e8] sm:$0xff]  ;;  %v771_v53 = vld [vmem:[#allocation7 + $0x230] sm:$0xff] }
  0xaa   : > { %1001 = vmatpush.msrb.mxu1 %v841_v58  ;;  %1020 = vmatpush.msrb.mxu2 %v752_v25  ;;  %v852_v58 = vld [vmem:[#allocation7 + $0x4b8] sm:$0xff]  ;;  %v818_v22 = vld [vmem:[#allocation7 + $0x3a8] sm:$0xff] }
  0xab   : > { %982 = vmatpush.msrb.mxu0 %v739_v60  ;;  %955 = vmatpush.msra.mxu3 %v876_v54  ;;  %v806_v24 = vld [vmem:[#allocation7 + $0x348] sm:$0xff]  ;;  %v800_v25 = vld [vmem:[#allocation7 + $0x318] sm:$0xff]  ;;  %v867_v54 = vld [vmem:[#allocation7 + $0x530] sm:$0xff] }
  0xac   : > { %1002 = vmatpush.msrb.mxu1 %v835_v61  ;;  %1021 = vmatpush.msrb.mxu2 %v746_v26  ;;  %v846_v61 = vld [vmem:[#allocation7 + $0x488] sm:$0xff]  ;;  %v892_v26 = vld [vmem:[#allocation7 + $0x5f8] sm:$0xff] }
  0xad   : > { %983 = vmatpush.msrb.mxu0 %v733_v63  ;;  %956 = vmatpush.msra.mxu3 %v870_v55  ;;  %v834_v63 = vld [vmem:[#allocation7 + $0x428] sm:$0xff] }
  0xae   : > { %1003 = vmatpush.msrb.mxu1 %v829_v0  ;;  %1022 = vmatpush.msrb.mxu2 %v740_v27  ;;  %v828_v0 = vld [vmem:[#allocation7 + $0x3f8] sm:$0xff]  ;;  %v886_v27 = vld [vmem:[#allocation7 + $0x5c8] sm:$0xff] }
  0xaf   : > { %984 = vmatpush.msrb.mxu0 %v727_v2  ;;  %957 = vmatpush.msra.mxu3 %v864_v56 }
  0xb0   : > { %1004 = vmatpush.msrb.mxu1 %v823_v3  ;;  %1023 = vmatpush.msrb.mxu2 %v734_v28  ;;  %v880_v28 = vld [vmem:[#allocation7 + $0x598] sm:$0xff] }
  0xb1   : > { %985 = vmatpush.msrb.mxu0 %v721_v5  ;;  %958 = vmatpush.msra.mxu3 %v858_v57  ;;  %v816_v5 = vld [vmem:[#allocation7 + $0x398] sm:$0xff]  ;;  %v765_v57 = vld [vmem:[#allocation7 + $0x200] sm:$0xff] }
  0xb2   : > { %1005 = vmatpush.msrb.mxu1 %v817_v6  ;;  %1024 = vmatpush.msrb.mxu2 %v728_v29  ;;  %v810_v6 = vld [vmem:[#allocation7 + $0x368] sm:$0xff] }
  0xb3   : > { %986 = vmatpush.msrb.mxu0 %v715_v8  ;;  %959 = vmatpush.msra.mxu3 %v852_v58  ;;  %v804_v8 = vld [vmem:[#allocation7 + $0x338] sm:$0xff]  ;;  %v874_v29 = vld [vmem:[#allocation7 + $0x568] sm:$0xff]  ;;  %v861_v58 = vld [vmem:[#allocation7 + $0x500] sm:$0xff] }
  0xb4   : > { %1006 = vmatpush.msrb.mxu1 %v811_v9  ;;  %1025 = vmatpush.msrb.mxu2 %v722_v30  ;;  %v798_v9 = vld [vmem:[#allocation7 + $0x308] sm:$0xff]  ;;  %v868_v30 = vld [vmem:[#allocation7 + $0x538] sm:$0xff] }
  0xb5   : > { %987 = vmatpush.msrb.mxu0 %v709_v11  ;;  %960 = vmatpush.msra.mxu3 %v846_v61  ;;  %v884_v11 = vld [vmem:[#allocation7 + $0x5b8] sm:$0xff]  ;;  %v753_v61 = vld [vmem:[#allocation7 + $0x1a0] sm:$0xff] }
  0xb6   : > { %1007 = vmatpush.msrb.mxu1 %v805_v12  ;;  %1026 = vmatpush.msrb.mxu2 %v716_v31  ;;  %v878_v12 = vld [vmem:[#allocation7 + $0x588] sm:$0xff] }
  0xb7   : > { %988 = vmatpush.msrb.mxu0 %v703_v14  ;;  %961 = vmatpush.msra.mxu3 %v840_v62  ;;  %v866_v14 = vld [vmem:[#allocation7 + $0x528] sm:$0xff]  ;;  %v849_v62 = vld [vmem:[#allocation7 + $0x4a0] sm:$0xff] }
  0xb8   : > { %1008 = vmatpush.msrb.mxu1 %v799_v15  ;;  %989 = vmatmul.f32.vlgmr.msrb.gmra.mxu0 %v5061_v34  ;;  %v860_v15 = vld [vmem:[#allocation7 + $0x4f8] sm:$0xff]  ;;  %v862_v31 = vld [vmem:[#allocation7 + $0x508] sm:$0xff] }
  0xb9   : > { %1009 = vmatmul.f32.vlgmr.msrb.gmra.mxu1 %v5064_v35  ;;  %1027 = vmatpush.msrb.mxu2 %v710_v32  ;;  %v856_v32 = vld [vmem:[#allocation7 + $0x4d8] sm:$0xff] }
  0xba   : > { %962 = vmatpush.msra.mxu3 %v834_v63  ;;  %v747_v63 = vld [vmem:[#allocation7 + $0x170] sm:$0xff] }
  0xbb   : > { %1028 = vmatpush.msrb.mxu2 %v704_v33  ;;  %v850_v33 = vld [vmem:[#allocation7 + $0x4a8] sm:$0xff] }
  0xbc   : > { %1029 = vmatmul.f32.vlgmr.msrb.gmra.mxu2 %v5061_v34  ;;  %963 = vmatpush.msra.mxu3 %v828_v0  ;;  %v843_v0 = vld [vmem:[#allocation7 + $0x470] sm:$0xff] }
  0xbd   : > { %1093 = vmatpush.msra.mxu2 %v796_v36  ;;  %v844_v36 = vld [vmem:[#allocation7 + $0x478] sm:$0xff] }
  0xbe   : > { %964 = vmatpush.msra.mxu3 %v822_v1 }
  0xbf   : > { %1094 = vmatpush.msra.mxu2 %v790_v37  ;;  %v838_v37 = vld [vmem:[#allocation7 + $0x448] sm:$0xff] }
  0xc0   : > { %965 = vmatpush.msra.mxu3 %v816_v5  ;;  %v735_v5 = vld [vmem:[#allocation7 + $0x110] sm:$0xff] }
  0xc1   : > { %1095 = vmatpush.msra.mxu2 %v784_v38  ;;  %v832_v38 = vld [vmem:[#allocation7 + $0x418] sm:$0xff] }
  0xc2   : > { %966 = vmatpush.msra.mxu3 %v810_v6  ;;  %v831_v6 = vld [vmem:[#allocation7 + $0x410] sm:$0xff] }
  0xc3   : > { %1096 = vmatpush.msra.mxu2 %v778_v39  ;;  %v826_v39 = vld [vmem:[#allocation7 + $0x3e8] sm:$0xff] }
  0xc4   : > { %967 = vmatpush.msra.mxu3 %v804_v8  ;;  %v825_v8 = vld [vmem:[#allocation7 + $0x3e0] sm:$0xff] }
  0xc5   : > { %1097 = vmatpush.msra.mxu2 %v772_v40  ;;  %v820_v40 = vld [vmem:[#allocation7 + $0x3b8] sm:$0xff] }
  0xc6   : > { %968 = vmatpush.msra.mxu3 %v798_v9  ;;  %v723_v9 = vld [vmem:[#allocation7 + $0xb0] sm:$0xff] }
  0xc7   : > { %1098 = vmatpush.msra.mxu2 %v766_v41  ;;  %969 = vmatmul.f32.vlgmr.msra.gmra.mxu3 %v5064_v35  ;;  %v814_v41 = vld [vmem:[#allocation7 + $0x388] sm:$0xff] }
  0xc8   : > { %1033 = vmatpush.msrb.mxu3 %v890_v10  ;;  %v819_v10 = vld [vmem:[#allocation7 + $0x3b0] sm:$0xff] }
  0xc9   : > { %1099 = vmatpush.msra.mxu2 %v760_v42  ;;  %v808_v42 = vld [vmem:[#allocation7 + $0x358] sm:$0xff] }
  0xca   : > { %1034 = vmatpush.msrb.mxu3 %v884_v11  ;;  %v717_v11 = vld [vmem:[#allocation7 + $0x80] sm:$0xff] }
  0xcb   : > { %1100 = vmatpush.msra.mxu2 %v754_v43  ;;  %v802_v43 = vld [vmem:[#allocation7 + $0x328] sm:$0xff] }
  0xcc   : > { %1035 = vmatpush.msrb.mxu3 %v878_v12  ;;  %v813_v12 = vld [vmem:[#allocation7 + $0x380] sm:$0xff] }
  0xcd   : > { %1101 = vmatpush.msra.mxu2 %v748_v44 }
  0xce   : > { %1036 = vmatpush.msrb.mxu3 %v872_v13  ;;  %v711_v13 = vld [vmem:[#allocation7 + $0x50] sm:$0xff] }
  0xcf   : > { %1102 = vmatpush.msra.mxu2 %v742_v45  ;;  %v795_v45 = vld [vmem:[#allocation7 + $0x2f0] sm:$0xff] }
  0xd0   : > { %1037 = vmatpush.msrb.mxu3 %v866_v14  ;;  %1053 = vmatpush.msra.mxu0 %v795_v45  ;;  %v807_v14 = vld [vmem:[#allocation7 + $0x350] sm:$0xff] }
  0xd1   : > { %1103 = vmatpush.msra.mxu2 %v736_v46  ;;  %v789_v46 = vld [vmem:[#allocation7 + $0x2c0] sm:$0xff] }
  0xd2   : > { %1038 = vmatpush.msrb.mxu3 %v860_v15  ;;  %1054 = vmatpush.msra.mxu0 %v789_v46 }
  0xd3   : > { %1104 = vmatpush.msra.mxu2 %v730_v47  ;;  %v891_v47 = vld [vmem:[#allocation7 + $0x5f0] sm:$0xff] }
  0xd4   : > { %1039 = vmatpush.msrb.mxu3 %v854_v16  ;;  %1073 = vmatpush.msra.mxu1 %v891_v47  ;;  %v705_v16 = vld [vmem:[#allocation7 + $0x20] sm:$0xff] }
  0xd5   : > { %1105 = vmatpush.msra.mxu2 %v724_v48  ;;  %v783_v48 = vld [vmem:[#allocation7 + $0x290] sm:$0xff] }
  0xd6   : > { %1040 = vmatpush.msrb.mxu3 %v848_v17  ;;  %1055 = vmatpush.msra.mxu0 %v783_v48 }
  0xd7   : > { %1106 = vmatpush.msra.mxu2 %v718_v49  ;;  %v885_v49 = vld [vmem:[#allocation7 + $0x5c0] sm:$0xff] }
  0xd8   : > { %1041 = vmatpush.msrb.mxu3 %v842_v18  ;;  %1074 = vmatpush.msra.mxu1 %v885_v49  ;;  %v1163_v18 = vld [vmem:[#allocation8 + $0xf0] sm:$0xff] }
  0xd9   : > { %1107 = vmatpush.msra.mxu2 %v712_v50  ;;  %v879_v50 = vld [vmem:[#allocation7 + $0x590] sm:$0xff] }
  0xda   : > { %1042 = vmatpush.msrb.mxu3 %v836_v19  ;;  %1075 = vmatpush.msra.mxu1 %v879_v50  ;;  %v801_v19 = vld [vmem:[#allocation7 + $0x320] sm:$0xff] }
  0xdb   : > { %1108 = vmatpush.msra.mxu2 %v706_v51  ;;  %v777_v51 = vld [vmem:[#allocation7 + $0x260] sm:$0xff] }
  0xdc   : > { %1109 = vmatmul.f32.vlgmr.msra.gmra.mxu2 %v5061_v34  ;;  %1043 = vmatpush.msrb.mxu3 %v830_v20 }
  0xdd   : > { %1056 = vmatpush.msra.mxu0 %v777_v51  ;;  %1076 = vmatpush.msra.mxu1 %v873_v52 }
  0xde   : > { %1044 = vmatpush.msrb.mxu3 %v824_v21  ;;  %v1161_v21 = vld [vmem:[#allocation8 + $0xe0] sm:$0xff] }
  0xdf   : > { %1057 = vmatpush.msra.mxu0 %v771_v53  ;;  %1077 = vmatpush.msra.mxu1 %v867_v54 }
  0xe0   : > { %1045 = vmatpush.msrb.mxu3 %v818_v22  ;;  %v1164_v22 = vld [vmem:[#allocation8 + $0xf8] sm:$0xff] }
  0xe1   : > { %1058 = vmatpush.msra.mxu0 %v765_v57  ;;  %1078 = vmatpush.msra.mxu1 %v861_v58 }
  0xe2   : > { %1046 = vmatpush.msrb.mxu3 %v812_v23  ;;  %v1159_v23 = vld [vmem:[#allocation8 + $0xd0] sm:$0xff] }
  0xe4   : > { %1047 = vmatpush.msrb.mxu3 %v806_v24  ;;  %v1162_v24 = vld [vmem:[#allocation8 + $0xe8] sm:$0xff] }
  0xe6   : > { %1048 = vmatpush.msrb.mxu3 %v800_v25 }
  0xe7   : > { %1049 = vmatmul.f32.vlgmr.msrb.gmra.mxu3 %v5064_v35 }
  0xe8   : > { %1113 = vmatpush.msra.mxu3 %v892_v26 }
  0xea   : > { %1114 = vmatpush.msra.mxu3 %v886_v27  ;;  %v1157_v27 = vld [vmem:[#allocation8 + $0xc0] sm:$0xff] }
  0xec   : > { %1115 = vmatpush.msra.mxu3 %v880_v28  ;;  %v1160_v28 = vld [vmem:[#allocation8 + $0xd8] sm:$0xff] }
  0xee   : > { %1116 = vmatpush.msra.mxu3 %v874_v29  ;;  %v1155_v29 = vld [vmem:[#allocation8 + $0xb0] sm:$0xff] }
  0xf0   : > { %1117 = vmatpush.msra.mxu3 %v868_v30  ;;  %v1158_v30 = vld [vmem:[#allocation8 + $0xc8] sm:$0xff] }
  0xf2   : > { %1118 = vmatpush.msra.mxu3 %v862_v31  ;;  %v1153_v31 = vld [vmem:[#allocation8 + $0xa0] sm:$0xff] }
  0xf4   : > { %1119 = vmatpush.msra.mxu3 %v856_v32  ;;  %v1156_v32 = vld [vmem:[#allocation8 + $0xb8] sm:$0xff] }
  0xf6   : > { %1120 = vmatpush.msra.mxu3 %v850_v33  ;;  %v1154_v33 = vld [vmem:[#allocation8 + $0xa8] sm:$0xff] }
  0xf8   : > { %1121 = vmatpush.msra.mxu3 %v844_v36  ;;  %v1149_v36 = vld [vmem:[#allocation8 + $0x80] sm:$0xff] }
  0xfa   : > { %1122 = vmatpush.msra.mxu3 %v838_v37  ;;  %v1152_v37 = vld [vmem:[#allocation8 + $0x98] sm:$0xff] }
  0xfc   : > { %1123 = vmatpush.msra.mxu3 %v832_v38 }
  0xfe   : > { %1124 = vmatpush.msra.mxu3 %v826_v39 }
 0x100   : > { %1125 = vmatpush.msra.mxu3 %v820_v40 }
 0x102   : > { %1126 = vmatpush.msra.mxu3 %v814_v41 }
 0x104   : > { %1127 = vmatpush.msra.mxu3 %v808_v42 }
 0x106   : > { %1128 = vmatpush.msra.mxu3 %v802_v43 }
 0x107   : > { %1129 = vmatmul.f32.vlgmr.msra.gmra.mxu3 %v5064_v35 }
 0x115   : > { %v910_v59 = vpop.f32.mrf.mxu0 }
 0x116   : > { %v930_v60 = vpop.f32.mrf.mxu1 }
 0x117   : > { %v931_v7 = vadd.f32 %v930_v60, %v910_v59  ;;  %v759_v59 = vld [vmem:[#allocation7 + $0x1d0] sm:$0xff] }
 0x118   : > { %v855_v60 = vld [vmem:[#allocation7 + $0x4d0] sm:$0xff]  ;;  %1059 = vmatpush.msra.mxu0 %v759_v59 }
 0x119   : > { %1079 = vmatpush.msra.mxu1 %v855_v60 }
 0x11a   : > { %1060 = vmatpush.msra.mxu0 %v753_v61 }
 0x11b   : > { %1080 = vmatpush.msra.mxu1 %v849_v62  ;;  %v1147_v62 = vld [vmem:[#allocation8 + $0x70] sm:$0xff] }
 0x11c   : > { %1061 = vmatpush.msra.mxu0 %v747_v63  ;;  %v1148_v63 = vld [vmem:[#allocation8 + $0x78] sm:$0xff] }
 0x11d   : > { %1081 = vmatpush.msra.mxu1 %v843_v0  ;;  %v1145_v0 = vld [vmem:[#allocation8 + $0x60] sm:$0xff] }
 0x11e   : > { %v5080_v44 = vpop.f32.mrf.mxu2 }
 0x135   : > { %v990_v2 = vpop.f32.mrf.mxu0 }
 0x136   : > { %v1010_v3 = vpop.f32.mrf.mxu1 }
 0x137   : > { %v1011_v4 = vadd.f32 %v1010_v3, %v990_v2  ;;  %v741_v2 = vld [vmem:[#allocation7 + $0x140] sm:$0xff] }
 0x138   : > { %v837_v3 = vld [vmem:[#allocation7 + $0x440] sm:$0xff]  ;;  %1062 = vmatpush.msra.mxu0 %v741_v2  ;;  %v1143_v2 = vld [vmem:[#allocation8 + $0x50] sm:$0xff] }
 0x139   : > { %1262 = vrot.lane.b32.xlu0 %v1011_v4, %s4766_s17  ;;  %4085 = vmatpush.xpose.msk.msrb.mxu2 %vm1197_vm0, %v1011_v4 }
 0x13a   : > { %1082 = vmatpush.msra.mxu1 %v837_v3  ;;  %1063 = vmatpush.msra.mxu0 %v735_v5  ;;  %v1144_v3 = vld [vmem:[#allocation8 + $0x58] sm:$0xff]  ;;  %v1142_v5 = vld [vmem:[#allocation8 + $0x48] sm:$0xff] }
 0x13c   : > { %4086 = vmatmul.msk.f32.vlgmr.msrb.gmra.mxu2 %vm1197_vm0, %v931_v7  ;;  %1083 = vmatpush.msra.mxu1 %v831_v6  ;;  %v1139_v6 = vld [vmem:[#allocation8 + $0x30] sm:$0xff] }
 0x13e   : > { %1084 = vmatpush.msra.mxu1 %v825_v8  ;;  %v1137_v8 = vld [vmem:[#allocation8 + $0x20] sm:$0xff] }
 0x13f   : > { %v5082_v56 = vpop.f32.mrf.mxu2 }
 0x140   : > { %1085 = vmatpush.msra.mxu1 %v819_v10  ;;  %v1135_v10 = vld [vmem:[#allocation8 + $0x10] sm:$0xff] }
 0x141   : > { %1260 = vrot.lane.b32.xlu0 %v931_v7, %s4766_s17  ;;  %v729_v7 = vld [vmem:[#allocation7 + $0xe0] sm:$0xff] }
 0x142   : > { %1064 = vmatpush.msra.mxu0 %v729_v7  ;;  %1086 = vmatpush.msra.mxu1 %v813_v12  ;;  %v1140_v7 = vld [vmem:[#allocation8 + $0x38] sm:$0xff]  ;;  %v1133_v12 = vld [vmem:[#allocation8] sm:$0xff] }
 0x144   : > { %1065 = vmatpush.msra.mxu0 %v723_v9  ;;  %1087 = vmatpush.msra.mxu1 %v807_v14  ;;  %v1138_v9 = vld [vmem:[#allocation8 + $0x28] sm:$0xff] }
 0x146   : > { %1066 = vmatpush.msra.mxu0 %v717_v11  ;;  %1088 = vmatpush.msra.mxu1 %v801_v19  ;;  %v1136_v11 = vld [vmem:[#allocation8 + $0x18] sm:$0xff] }
 0x147   : > { %1089 = vmatmul.f32.vlgmr.msra.gmra.mxu1 %v5064_v35  ;;  %v1150_v35 = vld [vmem:[#allocation8 + $0x88] sm:$0xff] }
 0x148   : > { %1067 = vmatpush.msra.mxu0 %v711_v13  ;;  %1358 = vmatpush.msrb.mxu1 %v1164_v22  ;;  %v1134_v13 = vld [vmem:[#allocation8 + $0x8] sm:$0xff] }
 0x14a   : > { %1068 = vmatpush.msra.mxu0 %v705_v16  ;;  %v970_v25 = vpop.f32.mrf.mxu3  ;;  %1359 = vmatpush.msrb.mxu1 %v1162_v24 }
 0x14b   : > { %1069 = vmatmul.f32.vlgmr.msra.gmra.mxu0 %v5061_v34  ;;  %v5091_v26 = vadd.f32 %v970_v25, %v5080_v44  ;;  %v1151_v34 = vld [vmem:[#allocation8 + $0x90] sm:$0xff] }
 0x14c   : > { %1338 = vmatpush.msrb.mxu0 %v1163_v18  ;;  %1360 = vmatpush.msrb.mxu1 %v1160_v28 }
 0x14e   : > { %1339 = vmatpush.msrb.mxu0 %v1161_v21  ;;  %1361 = vmatpush.msrb.mxu1 %v1158_v30 }
 0x150   : > { %1340 = vmatpush.msrb.mxu0 %v1159_v23  ;;  %1362 = vmatpush.msrb.mxu1 %v1156_v32 }
 0x152   : > { %1341 = vmatpush.msrb.mxu0 %v1157_v27  ;;  %1363 = vmatpush.msrb.mxu1 %v1154_v33 }
 0x154   : > { %1342 = vmatpush.msrb.mxu0 %v1155_v29  ;;  %1364 = vmatpush.msrb.mxu1 %v1152_v37 }
 0x156   : > { %1343 = vmatpush.msrb.mxu0 %v1153_v31  ;;  %1365 = vmatpush.msrb.mxu1 %v1150_v35 }
 0x158   : > { %1344 = vmatpush.msrb.mxu0 %v1151_v34 }
 0x15a   : > { %1345 = vmatpush.msrb.mxu0 %v1149_v36 }
 0x15f   : > { %v5086_v4 = vpop.f32.mrf.mxu2 }
 0x16a   : > { %v1050_v38 = vpop.f32.mrf.mxu3 }
 0x16b   : > { %v1051_v39 = vadd.f32 %v1050_v38, %v5082_v56  ;;  %v1179_v38 = vld [vmem:[#allocation8 + $0x170] sm:$0xff] }
 0x16d   : > { %4095 = vmatpush.xpose.msk.msra.mxu0 %vm1197_vm0, %v1051_v39 }
 0x18a   : > { %v1130_v40 = vpop.f32.mrf.mxu3 }
 0x18b   : > { %v5097_v41 = vadd.f32 %v1130_v40, %v5086_v4  ;;  %v1141_v4 = vld [vmem:[#allocation8 + $0x40] sm:$0xff] }
 0x18c   : > { %v1177_v40 = vld [vmem:[#allocation8 + $0x160] sm:$0xff] }
 0x18d   : > { %1469 = vmatpush.msra.mxu1 %v5097_v41 }
 0x1ab   : > { %v1263_v55 = vpop.permute.xlu0 %1262 }
 0x1ac   : > { %4088 = vmatpush.xpose.msk.msra.mxu2 %vm1197_vm0, %v1263_v55 }
 0x1b0   : > { %1381 = vmatpush.msrb.mxu2 %v1147_v62  ;;  %v1196_v62 = vld [vmem:[#allocation8 + $0x1f8] sm:$0xff] }
 0x1b2   : > { %1382 = vmatpush.msrb.mxu2 %v1145_v0  ;;  %v1194_v0 = vld [vmem:[#allocation8 + $0x1e8] sm:$0xff] }
 0x1b3   : > { %v1261_v1 = vpop.permute.xlu0 %1260 }
 0x1b4   : > { %4089 = vmatmul.msk.f32.vlgmr.msra.gmra.mxu2 %vm1197_vm0, %v1261_v1  ;;  %v1146_v1 = vld [vmem:[#allocation8 + $0x68] sm:$0xff] }
 0x1b5   : > { %1383 = vmatpush.msrb.mxu2 %v1143_v2  ;;  %v1192_v2 = vld [vmem:[#allocation8 + $0x1d8] sm:$0xff] }
 0x1b7   : > { %1384 = vmatpush.msrb.mxu2 %v1141_v4  ;;  %v1190_v4 = vld [vmem:[#allocation8 + $0x1c8] sm:$0xff] }
 0x1b9   : > { %1385 = vmatpush.msrb.mxu2 %v1139_v6  ;;  %v1188_v6 = vld [vmem:[#allocation8 + $0x1b8] sm:$0xff] }
 0x1bb   : > { %1386 = vmatpush.msrb.mxu2 %v1137_v8  ;;  %v1186_v8 = vld [vmem:[#allocation8 + $0x1a8] sm:$0xff] }
 0x1bd   : > { %1387 = vmatpush.msrb.mxu2 %v1135_v10  ;;  %v1184_v10 = vld [vmem:[#allocation8 + $0x198] sm:$0xff] }
 0x1bf   : > { %v1221_v15 = vpop.f32.mrf.mxu2  ;;  %1388 = vmatpush.msrb.mxu2 %v1133_v12  ;;  %v1182_v12 = vld [vmem:[#allocation8 + $0x188] sm:$0xff] }
 0x1c0   : > { %v1224_v17 = vmul.f32 0.125, %v1221_v15 }
 0x1c1   : > { %1485 = vmatpush.msra.mxu2 %v1179_v38  ;;  %v1737_v38 = vld [vmem:[#allocation10 + $0x1c0] sm:$0xff] }
 0x1c2   : > { %v1226_v20 = vsel %vm1225_vm1, %v1224_v17, -inf }
 0x1c3   : > { %1227 = vmax.xlane.f32.xlu1 %v1226_v20  ;;  %1486 = vmatpush.msra.mxu2 %v1177_v40  ;;  %v1703_v40 = vld [vmem:[#allocation10 + $0xb0] sm:$0xff] }
 0x1c4   : > { %v1090_v51 = vpop.f32.mrf.mxu1 }
 0x1c8   : > { %v1070_v50 = vpop.f32.mrf.mxu0 }
 0x1c9   : > { %v1091_v52 = vadd.f32 %v1090_v51, %v1070_v50  ;;  %v1170_v50 = vld [vmem:[#allocation8 + $0x128] sm:$0xff] }
 0x1cb   : > { %1255 = vmatpush.msrb.mxu3 %v1091_v52  ;;  %1301 = vrot.lane.b32.xlu0 %v1091_v52, %s4766_s17  ;;  %v1167_v52 = vld [vmem:[#allocation8 + $0x110] sm:$0xff] }
 0x236   : > { %v1228_v42 = vpop.xlane.xlu1 %1227 }
 0x237   : > { %v1229_v43 = vsub.f32 %v1224_v17, %v1228_v42  ;;  %v1285_v44 = vpop.f32.mrf.mxu2  ;;  %v1178_v42 = vld [vmem:[#allocation8 + $0x168] sm:$0xff] }
 0x238   : > { %v1288_v45 = vmul.f32 0.125, %v1285_v44  ;;  %v1176_v44 = vld [vmem:[#allocation8 + $0x158] sm:$0xff] }
 0x239   : > { %v1230_v46 = vmul.f32 1.442695, %v1229_v43  ;;  %v1175_v43 = vld [vmem:[#allocation8 + $0x150] sm:$0xff] }
 0x23a   : > { %v1289_v47 = vsel %vm1225_vm1, %v1288_v45, -inf  ;;  %1487 = vmatpush.msra.mxu2 %v1175_v43  ;;  %v1701_v43 = vld [vmem:[#allocation10 + $0xa0] sm:$0xff] }
 0x23b   : > { %4285 = vpow2.f32 %v1230_v46  ;;  %1290 = vmax.xlane.f32.xlu1 %v1289_v47  ;;  %v1173_v46 = vld [vmem:[#allocation8 + $0x140] sm:$0xff]  ;;  %v1174_v47 = vld [vmem:[#allocation8 + $0x148] sm:$0xff] }
 0x23c   : > { %1488 = vmatpush.msra.mxu2 %v1173_v46  ;;  %v1744_v46 = vld [vmem:[#allocation10 + $0x1f8] sm:$0xff] }
 0x23d   : > { %v1302_v61 = vpop.permute.xlu0 %1301 }
 0x23e   : > { %1322 = vmatpush.msra.mxu3 %v1302_v61  ;;  %v1195_v61 = vld [vmem:[#allocation8 + $0x1f0] sm:$0xff] }
 0x241   : > { %v4286_v48 = vpop.eup %4285 }
 0x242   : > { %v1232_v49 = vsel %vm1225_vm1, %v4286_v48, 0.0 }
 0x243   : > { %1233 = vadd.xlane.f32.xlu2 %v1232_v49  ;;  %v1172_v49 = vld [vmem:[#allocation8 + $0x138] sm:$0xff] }
 0x254   : > { %1521 = vrot.lane.b32.xlu1 %v1051_v39, %s4766_s17  ;;  %v1180_v39 = vld [vmem:[#allocation8 + $0x178] sm:$0xff] }
 0x2ae   : > { %v1291_v53 = vpop.xlane.xlu1 %1290 }
 0x2af   : > { %v1292_v54 = vsub.f32 %v1288_v45, %v1291_v53 }
 0x2b1   : > { %v1293_v55 = vmul.f32 1.442695, %v1292_v54  ;;  %v1168_v54 = vld [vmem:[#allocation8 + $0x118] sm:$0xff] }
 0x2b3   : > { %4287 = vpow2.f32 %v1293_v55 }
 0x2b6   : > { %v1234_v56 = vpop.xlane.xlu2 %1233 }
 0x2b7   : > { %4289 = vrcp.f32 %v1234_v56 }
 0x2b9   : > { %v4288_v57 = vpop.eup %4287 }
 0x2ba   : > { %v1295_v58 = vsel %vm1225_vm1, %v4288_v57, 0.0 }
 0x2bb   : > { %1296 = vadd.xlane.f32.xlu2 %v1295_v58 }
 0x2bd   : > { %v4290_v59 = vpop.eup %4289 }
 0x2be   : > { %v1236_v60 = vmul.f32 %v4290_v59, %v4286_v48  ;;  %v1171_v48 = vld [vmem:[#allocation8 + $0x130] sm:$0xff]  ;;  %v1165_v59 = vld [vmem:[#allocation8 + $0x100] sm:$0xff] }
 0x2bf   : > { %1489 = vmatpush.msra.mxu2 %v1171_v48  ;;  %v1699_v48 = vld [vmem:[#allocation10 + $0x90] sm:$0xff] }
 0x2c0   : > { %4087 = vmatmul.msk.f32.vlgmr.msrb.gmra.mxu3 %vm1225_vm1, %v1236_v60  ;;  %v1166_v60 = vld [vmem:[#allocation8 + $0x108] sm:$0xff] }
 0x2c1   : > { %1401 = vmatpush.msrb.mxu3 %v1148_v63  ;;  %v1193_v63 = vld [vmem:[#allocation8 + $0x1e0] sm:$0xff] }
 0x2c3   : > { %1402 = vmatpush.msrb.mxu3 %v1146_v1  ;;  %v1191_v1 = vld [vmem:[#allocation8 + $0x1d0] sm:$0xff] }
 0x2c5   : > { %1403 = vmatpush.msrb.mxu3 %v1144_v3  ;;  %v1189_v3 = vld [vmem:[#allocation8 + $0x1c0] sm:$0xff] }
 0x2c6   : > { %v1522_v19 = vpop.permute.xlu1 %1521 }
 0x2c7   : > { %1404 = vmatpush.msrb.mxu3 %v1142_v5  ;;  %v1187_v5 = vld [vmem:[#allocation8 + $0x1b0] sm:$0xff] }
 0x2c9   : > { %1405 = vmatpush.msrb.mxu3 %v1140_v7  ;;  %v1185_v7 = vld [vmem:[#allocation8 + $0x1a0] sm:$0xff] }
 0x2cb   : > { %1406 = vmatpush.msrb.mxu3 %v1138_v9  ;;  %v1183_v9 = vld [vmem:[#allocation8 + $0x190] sm:$0xff] }
 0x2cd   : > { %1407 = vmatpush.msrb.mxu3 %v1136_v11  ;;  %v1181_v11 = vld [vmem:[#allocation8 + $0x180] sm:$0xff] }
 0x2cf   : > { %1408 = vmatpush.msrb.mxu3 %v1134_v13 }
 0x2d3   : > { %1519 = vrot.lane.b32.xlu2 %v5091_v26, %s4766_s17 }
 0x32e   : > { %v1297_v14 = vpop.xlane.xlu2 %1296 }
 0x32f   : > { %4291 = vrcp.f32 %v1297_v14 }
 0x335   : > { %v4292_v15 = vpop.eup %4291 }
 0x336   : > { %v1299_v16 = vmul.f32 %v4292_v15, %v4288_v57  ;;  %v1520_v20 = vpop.permute.xlu2 %1519 }
 0x338   : > { %4090 = vmatmul.msk.f32.vlgmr.msra.gmra.mxu3 %vm1225_vm1, %v1299_v16 }
 0x339   : > { %1505 = vmatpush.msra.mxu3 %v1180_v39 }
 0x33b   : > { %1506 = vmatpush.msra.mxu3 %v1178_v42  ;;  %v1735_v42 = vld [vmem:[#allocation10 + $0x1b0] sm:$0xff] }
 0x33d   : > { %1507 = vmatpush.msra.mxu3 %v1176_v44  ;;  %v1733_v44 = vld [vmem:[#allocation10 + $0x1a0] sm:$0xff] }
 0x33f   : > { %1508 = vmatpush.msra.mxu3 %v1174_v47 }
 0x341   : > { %1509 = vmatpush.msra.mxu3 %v1172_v49  ;;  %v1731_v49 = vld [vmem:[#allocation10 + $0x190] sm:$0xff] }
 0x343   : > { %v1257_v17 = vpop.f32.mrf.mxu3  ;;  %1510 = vmatpush.msra.mxu3 %v1170_v50  ;;  %v1729_v50 = vld [vmem:[#allocation10 + $0x180] sm:$0xff] }
 0x344   : > { %4093 = vmatmul.msk.f32.vlgmr.msrb.gmra.mxu2 %vm1197_vm0, %v1257_v17  ;;  %4094 = vmatmul.msk.f32.vlgmr.msrb.gmra.mxu3 %vm1197_vm0, %v1257_v17 }
 0x345   : > { %1511 = vmatpush.msra.mxu3 %v1168_v54  ;;  %v1693_v54 = vld [vmem:[#allocation10 + $0x60] sm:$0xff] }
 0x347   : > { %1512 = vmatpush.msra.mxu3 %v1166_v60  ;;  %v1721_v60 = vld [vmem:[#allocation10 + $0x140] sm:$0xff] }
 0x3bb   : > { %v1324_v18 = vpop.f32.mrf.mxu3 }
 0x3bc   : > { %4091 = vmatmul.msk.f32.vlgmr.msrb.gmra.mxu0 %vm1197_vm0, %v1324_v18  ;;  %4092 = vmatmul.msk.f32.vlgmr.msrb.gmra.mxu1 %vm1197_vm0, %v1324_v18 }
 0x3bd   : > { %4100 = vmatpush.xpose.msk.msrb.mxu0 %vm1197_vm0, %v1522_v19 }
 0x3c4   : > { %4096 = vmatmul.msk.f32.vlgmr.msra.gmra.mxu0 %vm1197_vm0, %v5091_v26 }
 0x3c5   : > { %1597 = vmatpush.msra.mxu0 %v1195_v61 }
 0x3c7   : > { %1598 = vmatpush.msra.mxu0 %v1193_v63  ;;  %v1390_v16 = vpop.f32.mrf.mxu2  ;;  %v1410_v17 = vpop.f32.mrf.mxu3 }
 0x3c9   : > { %1599 = vmatpush.msra.mxu0 %v1191_v1 }
 0x3cb   : > { %1600 = vmatpush.msra.mxu0 %v1189_v3 }
 0x3cc   : > { %4101 = vmatmul.msk.f32.vlgmr.msrb.gmra.mxu0 %vm1197_vm0, %v1520_v20 }
 0x3cd   : > { %1601 = vmatpush.msra.mxu0 %v1187_v5  ;;  %v1687_v5 = vld [vmem:[#allocation10 + $0x30] sm:$0xff] }
 0x3cf   : > { %1602 = vmatpush.msra.mxu0 %v1185_v7  ;;  %v1710_v7 = vld [vmem:[#allocation10 + $0xe8] sm:$0xff] }
 0x3d1   : > { %1603 = vmatpush.msra.mxu0 %v1183_v9  ;;  %v1685_v9 = vld [vmem:[#allocation10 + $0x20] sm:$0xff] }
 0x3d3   : > { %1604 = vmatpush.msra.mxu0 %v1181_v11  ;;  %v1708_v11 = vld [vmem:[#allocation10 + $0xd8] sm:$0xff] }
 0x439   : > { %v5117_v21 = vpop.f32.mrf.mxu0  ;;  %v1367_v13 = vpop.f32.mrf.mxu1 }
 0x43a   : > { %v1391_v20 = vadd.f32 %v1390_v16, %v5117_v21  ;;  %v1741_v21 = vld [vmem:[#allocation10 + $0x1e0] sm:$0xff]  ;;  %v1738_v16 = vld [vmem:[#allocation10 + $0x1c8] sm:$0xff] }
 0x441   : > { %v1436_v22 = vpop.f32.mrf.mxu0 }
 0x442   : > { %v1439_v23 = vmul.f32 0.125, %v1436_v22  ;;  %v1411_v22 = vadd.f32 %v1410_v17, %v1367_v13  ;;  %v1683_v13 = vld [vmem:[#allocation10 + $0x10] sm:$0xff]  ;;  %v1681_v17 = vld [vmem:[#allocation10] sm:$0xff] }
 0x444   : > { %v1440_v24 = vsel %vm1225_vm1, %v1439_v23, -inf }
 0x445   : > { %1441 = vmax.xlane.f32.xlu0 %v1440_v24 }
 0x449   : > { %v1544_v25 = vpop.f32.mrf.mxu0 }
 0x44a   : > { %v1547_v27 = vmul.f32 0.125, %v1544_v25 }
 0x44c   : > { %v1548_v28 = vsel %vm1225_vm1, %v1547_v27, -inf }
 0x44d   : > { %1549 = vmax.xlane.f32.xlu2 %v1548_v28 }
 0x4b8   : > { %v1442_v29 = vpop.xlane.xlu0 %1441 }
 0x4b9   : > { %v1443_v30 = vsub.f32 %v1439_v23, %v1442_v29 }
 0x4bb   : > { %v1444_v31 = vmul.f32 1.442695, %v1443_v30 }
 0x4bd   : > { %4293 = vpow2.f32 %v1444_v31  ;;  %v4767_v31 = vmov 256.0  }
 0x4c0   : > { %v1550_v26 = vpop.xlane.xlu2 %1549 }
 0x4c1   : > { %v1551_v32 = vsub.f32 %v1547_v27, %v1550_v26  ;;  %v1711_v26 = vld [vmem:[#allocation10 + $0xf0] sm:$0xff] }
 0x4c3   : > { %v4294_v34 = vpop.eup %4293  ;;  %v1552_v33 = vmul.f32 1.442695, %v1551_v32  ;;  %v1743_v32 = vld [vmem:[#allocation10 + $0x1f0] sm:$0xff] }
 0x4c4   : > { %v1446_v36 = vsel %vm1225_vm1, %v4294_v34, 0.0  ;;  %1765 = vmatpush.msrb.mxu3 %v1743_v32  ;;  %v1698_v32 = vld [vmem:[#allocation10 + $0x88] sm:$0xff] }
 0x4c5   : > { %4295 = vpow2.f32 %v1552_v33  ;;  %1447 = vadd.xlane.f32.xlu1 %v1446_v36  ;;  %v1707_v36 = vld [vmem:[#allocation10 + $0xd0] sm:$0xff] }
 0x4c6   : > { %1766 = vmatpush.msrb.mxu3 %v1741_v21  ;;  %v1873_v21 = vld [vmem:[#allocation11 + $0x180] sm:$0xff] }
 0x4cb   : > { %v4296_v37 = vpop.eup %4295 }
 0x4cc   : > { %v1554_v35 = vsel %vm1225_vm1, %v4296_v37, 0.0 }
 0x4cd   : > { %1555 = vadd.xlane.f32.xlu0 %v1554_v35  ;;  %v1705_v35 = vld [vmem:[#allocation10 + $0xc0] sm:$0xff] }
 0x4e1   : > { %1560 = vrot.lane.b32.xlu0 %v5097_v41, %s4766_s17  ;;  %v1169_v41 = vld [vmem:[#allocation8 + $0x120] sm:$0xff] }
 0x4e2   : > { %1490 = vmatpush.msra.mxu2 %v1169_v41  ;;  %v1697_v41 = vld [vmem:[#allocation10 + $0x80] sm:$0xff] }
 0x4e4   : > { %1491 = vmatpush.msra.mxu2 %v1167_v52  ;;  %v1695_v52 = vld [vmem:[#allocation10 + $0x70] sm:$0xff] }
 0x4e6   : > { %1492 = vmatpush.msra.mxu2 %v1165_v59  ;;  %v1689_v59 = vld [vmem:[#allocation10 + $0x40] sm:$0xff] }
 0x4e8   : > { %1745 = vmatpush.msrb.mxu2 %v1711_v26  ;;  %v1941_v26 = vld [vmem:[#allocation11 + $0x3a0] sm:$0xff] }
 0x538   : > { %v1448_v45 = vpop.xlane.xlu1 %1447 }
 0x539   : > { %4297 = vrcp.f32 %v1448_v45  ;;  %v1712_v45 = vld [vmem:[#allocation10 + $0xf8] sm:$0xff] }
 0x53a   : > { %1785 = vmatpush.msrb.mxu0 %v1712_v45  ;;  %v1724_v45 = vld [vmem:[#allocation10 + $0x158] sm:$0xff] }
 0x53c   : > { %1786 = vmatpush.msrb.mxu0 %v1710_v7  ;;  %v1837_v7 = vld [vmem:[#allocation11 + $0x60] sm:$0xff] }
 0x53e   : > { %1787 = vmatpush.msrb.mxu0 %v1708_v11  ;;  %v1897_v11 = vld [vmem:[#allocation11 + $0x240] sm:$0xff] }
 0x53f   : > { %v4298_v51 = vpop.eup %4297 }
 0x540   : > { %v1450_v53 = vmul.f32 %v4298_v51, %v4294_v34  ;;  %v1556_v55 = vpop.xlane.xlu0 %1555  ;;  %v1709_v34 = vld [vmem:[#allocation10 + $0xe0] sm:$0xff] }
 0x541   : > { %4299 = vrcp.f32 %v1556_v55  ;;  %1746 = vmatpush.msrb.mxu2 %v1709_v34  ;;  %v1725_v55 = vld [vmem:[#allocation10 + $0x160] sm:$0xff]  ;;  %v1730_v34 = vld [vmem:[#allocation10 + $0x188] sm:$0xff] }
 0x542   : > { %4097 = vmatmul.msk.f32.vlgmr.msra.gmra.mxu1 %vm1225_vm1, %v1450_v53  ;;  %4301 = vrcp.f32 %v4767_v31  ;;  %v1727_v53 = vld [vmem:[#allocation10 + $0x170] sm:$0xff]  ;;  %v1877_v31 = vld [vmem:[#allocation11 + $0x1a0] sm:$0xff] }
 0x543   : > { %1747 = vmatpush.msrb.mxu2 %v1707_v36  ;;  %v1696_v36 = vld [vmem:[#allocation10 + $0x78] sm:$0xff] }
 0x545   : > { %1748 = vmatpush.msrb.mxu2 %v1705_v35  ;;  %v1869_v35 = vld [vmem:[#allocation11 + $0x160] sm:$0xff] }
 0x547   : > { %v4300_v56 = vpop.eup %4299  ;;  %1749 = vmatpush.msrb.mxu2 %v1703_v40  ;;  %v1726_v40 = vld [vmem:[#allocation10 + $0x168] sm:$0xff] }
 0x548   : > { %v1558_v57 = vmul.f32 %v4300_v56, %v4296_v37  ;;  %v4302_v33 = vpop.eup %4301  ;;  %v1739_v37 = vld [vmem:[#allocation10 + $0x1d0] sm:$0xff] }
 0x549   : > { %v1637_v39 = vmul.f32 256.0, %v4302_v33  ;;  %1767 = vmatpush.msrb.mxu3 %v1739_v37  ;;  %1750 = vmatpush.msrb.mxu2 %v1701_v43  ;;  %vm1641_vm2 = vweird.f32 %v4302_v33  ;;  %v1728_v37 = vld [vmem:[#allocation10 + $0x178] sm:$0xff]  ;;  %v1929_v43 = vld [vmem:[#allocation11 + $0x340] sm:$0xff] }
 0x54b   : > { %1768 = vmatpush.msrb.mxu3 %v1737_v38  ;;  %v1638_v47 = vsub.f32 1.0, %v1637_v39  ;;  %1751 = vmatpush.msrb.mxu2 %v1699_v48  ;;  %v1933_v38 = vld [vmem:[#allocation11 + $0x360] sm:$0xff]  ;;  %v1694_v39 = vld [vmem:[#allocation10 + $0x68] sm:$0xff] }
 0x54c   : > { %v1690_v48 = vld [vmem:[#allocation10 + $0x48] sm:$0xff] }
 0x54d   : > { %1769 = vmatpush.msrb.mxu3 %v1735_v42  ;;  %v1639_v51 = vmul.f32 %v4302_v33, %v1638_v47  ;;  %1752 = vmatpush.msrb.mxu2 %v1697_v41  ;;  %v1865_v42 = vld [vmem:[#allocation11 + $0x140] sm:$0xff] }
 0x54e   : > { %v1925_v47 = vld [vmem:[#allocation11 + $0x320] sm:$0xff] }
 0x54f   : > { %1770 = vmatpush.msrb.mxu3 %v1733_v44  ;;  %v1640_v56 = vadd.f32 %v4302_v33, %v1639_v51  ;;  %1753 = vmatpush.msrb.mxu2 %v1695_v52  ;;  %v1692_v44 = vld [vmem:[#allocation10 + $0x58] sm:$0xff]  ;;  %v1857_v41 = vld [vmem:[#allocation11 + $0x100] sm:$0xff] }
 0x550   : > { %v1688_v51 = vld [vmem:[#allocation10 + $0x38] sm:$0xff] }
 0x551   : > { %1771 = vmatpush.msrb.mxu3 %v1731_v49  ;;  %1754 = vmatpush.msrb.mxu2 %v1693_v54  ;;  %v5138_v61 = vsel %vm1641_vm2, %v4302_v33, %v1640_v56  ;;  %v1937_v33 = vld [vmem:[#allocation11 + $0x380] sm:$0xff]  ;;  %v1722_v49 = vld [vmem:[#allocation10 + $0x148] sm:$0xff]  ;;  %v1720_v52 = vld [vmem:[#allocation10 + $0x138] sm:$0xff] }
 0x552   : > { %v1917_v54 = vld [vmem:[#allocation11 + $0x2e0] sm:$0xff]  ;;  %v1718_v56 = vld [vmem:[#allocation10 + $0x128] sm:$0xff] }
 0x553   : > { %v1561_v58 = vpop.permute.xlu0 %1560  ;;  %1772 = vmatpush.msrb.mxu3 %v1729_v50  ;;  %v1921_v50 = vld [vmem:[#allocation11 + $0x300] sm:$0xff] }
 0x554   : > { %1581 = vmatpush.msrb.mxu1 %v1561_v58  ;;  %v1723_v58 = vld [vmem:[#allocation10 + $0x150] sm:$0xff] }
 0x555   : > { %4102 = vmatmul.msk.f32.vlgmr.msrb.gmra.mxu1 %vm1225_vm1, %v1558_v57  ;;  %1773 = vmatpush.msrb.mxu3 %v1727_v53  ;;  %v1691_v57 = vld [vmem:[#allocation10 + $0x50] sm:$0xff]  ;;  %v1853_v53 = vld [vmem:[#allocation11 + $0xe0] sm:$0xff] }
 0x556   : > { %1617 = vmatpush.msra.mxu1 %v1196_v62  ;;  %1755 = vmatpush.msrb.mxu2 %v1691_v57  ;;  %v1849_v57 = vld [vmem:[#allocation11 + $0xc0] sm:$0xff] }
 0x557   : > { %1774 = vmatpush.msrb.mxu3 %v1725_v55  ;;  %v1686_v55 = vld [vmem:[#allocation10 + $0x28] sm:$0xff] }
 0x558   : > { %1618 = vmatpush.msra.mxu1 %v1194_v0  ;;  %1756 = vmatpush.msrb.mxu2 %v1689_v59  ;;  %v1684_v59 = vld [vmem:[#allocation10 + $0x18] sm:$0xff] }
 0x559   : > { %1775 = vmatpush.msrb.mxu3 %v1723_v58  ;;  %v1913_v58 = vld [vmem:[#allocation11 + $0x2c0] sm:$0xff] }
 0x55a   : > { %1619 = vmatpush.msra.mxu1 %v1192_v2  ;;  %1757 = vmatpush.msrb.mxu2 %v1687_v5  ;;  %v1905_v5 = vld [vmem:[#allocation11 + $0x280] sm:$0xff] }
 0x55b   : > { %1776 = vmatpush.msrb.mxu3 %v1721_v60  ;;  %v1716_v60 = vld [vmem:[#allocation10 + $0x118] sm:$0xff] }
 0x55c   : > { %1620 = vmatpush.msra.mxu1 %v1190_v4  ;;  %1758 = vmatpush.msrb.mxu2 %v1685_v9 }
 0x55e   : > { %1621 = vmatpush.msra.mxu1 %v1188_v6  ;;  %v1719_v6 = vld [vmem:[#allocation10 + $0x130] sm:$0xff]  ;;  %1759 = vmatpush.msrb.mxu2 %v1683_v13  ;;  %v1829_v13 = vld [vmem:[#allocation11 + $0x20] sm:$0xff] }
 0x55f   : > { %1777 = vmatpush.msrb.mxu3 %v1719_v6 }
 0x560   : > { %1622 = vmatpush.msra.mxu1 %v1186_v8  ;;  %v1742_v8 = vld [vmem:[#allocation10 + $0x1e8] sm:$0xff]  ;;  %1760 = vmatpush.msrb.mxu2 %v1681_v17 }
 0x562   : > { %1623 = vmatpush.msra.mxu1 %v1184_v10  ;;  %v1717_v10 = vld [vmem:[#allocation10 + $0x120] sm:$0xff] }
 0x563   : > { %1778 = vmatpush.msrb.mxu3 %v1717_v10  ;;  %v1833_v10 = vld [vmem:[#allocation11 + $0x40] sm:$0xff] }
 0x564   : > { %1624 = vmatpush.msra.mxu1 %v1182_v12  ;;  %v1740_v12 = vld [vmem:[#allocation10 + $0x1d8] sm:$0xff] }
 0x566   : > { %1805 = vmatpush.msrb.mxu1 %v1744_v46  ;;  %v1861_v46 = vld [vmem:[#allocation11 + $0x120] sm:$0xff] }
 0x568   : > { %1806 = vmatpush.msrb.mxu1 %v1742_v8  ;;  %v1901_v8 = vld [vmem:[#allocation11 + $0x260] sm:$0xff] }
 0x56a   : > { %1807 = vmatpush.msrb.mxu1 %v1740_v12 }
 0x56c   : > { %1808 = vmatpush.msrb.mxu1 %v1738_v16  ;;  %v1889_v16 = vld [vmem:[#allocation11 + $0x200] sm:$0xff] }
 0x5bf   : > { %v1471_v14 = vpop.f32.mrf.mxu1 }
 0x5c0   : > { %4098 = vmatmul.msk.f32.vlgmr.msra.gmra.mxu2 %vm1197_vm0, %v1471_v14  ;;  %4099 = vmatmul.msk.f32.vlgmr.msra.gmra.mxu3 %vm1197_vm0, %v1471_v14  ;;  %v1715_v14 = vld [vmem:[#allocation10 + $0x110] sm:$0xff] }
 0x5c1   : > { %1779 = vmatpush.msrb.mxu3 %v1715_v14  ;;  %v1893_v14 = vld [vmem:[#allocation11 + $0x220] sm:$0xff] }
 0x5d2   : > { %v1583_v15 = vpop.f32.mrf.mxu1 }
 0x5d3   : > { %4103 = vmatmul.msk.f32.vlgmr.msra.gmra.mxu0 %vm1197_vm0, %v1583_v15  ;;  %4104 = vmatmul.msk.f32.vlgmr.msra.gmra.mxu1 %vm1197_vm0, %v1583_v15  ;;  %v1706_v15 = vld [vmem:[#allocation10 + $0xc8] sm:$0xff] }
 0x5d4   : > { %1788 = vmatpush.msrb.mxu0 %v1706_v15  ;;  %v1825_v15 = vld [vmem:[#allocation11] sm:$0xff] }
 0x643   : > { %v1494_v18 = vpop.f32.mrf.mxu2  ;;  %v1514_v19 = vpop.f32.mrf.mxu3 }
 0x644   : > { %v1517_v23 = vadd.f32 %v1494_v18, %v1391_v20  ;;  %v1518_v24 = vadd.f32 %v1514_v19, %v1411_v22  ;;  %v1713_v18 = vld [vmem:[#allocation10 + $0x100] sm:$0xff]  ;;  %v1704_v19 = vld [vmem:[#allocation10 + $0xb8] sm:$0xff] }
 0x645   : > { %1780 = vmatpush.msrb.mxu3 %v1713_v18  ;;  %v1736_v20 = vld [vmem:[#allocation10 + $0x1b8] sm:$0xff]  ;;  %v1885_v22 = vld [vmem:[#allocation11 + $0x1e0] sm:$0xff]  ;;  %1789 = vmatpush.msrb.mxu0 %v1704_v19 }
 0x646   : > { %1809 = vmatpush.msrb.mxu1 %v1736_v20  ;;  %1953 = vmatpush.msra.mxu2 %v1885_v22 }
 0x650   : > { %v1606_v25 = vpop.f32.mrf.mxu0  ;;  %v1626_v27 = vpop.f32.mrf.mxu1 }
 0x651   : > { %v5132_v28 = vadd.f32 %v1606_v25, %v1517_v23  ;;  %v5134_v29 = vadd.f32 %v1626_v27, %v1518_v24  ;;  %v1949_v23 = vld [vmem:[#allocation11 + $0x3e0] sm:$0xff]  ;;  %v1702_v24 = vld [vmem:[#allocation10 + $0xa8] sm:$0xff] }
 0x652   : > { %1973 = vmatpush.msra.mxu3 %v1949_v23  ;;  %v1734_v25 = vld [vmem:[#allocation10 + $0x1a8] sm:$0xff]  ;;  %v1881_v27 = vld [vmem:[#allocation11 + $0x1c0] sm:$0xff]  ;;  %1790 = vmatpush.msrb.mxu0 %v1702_v24 }
 0x653   : > { %v1633_v30 = vadd.f32 %v5134_v29, %v5132_v28  ;;  %1810 = vmatpush.msrb.mxu1 %v1734_v25  ;;  %1954 = vmatpush.msra.mxu2 %v1881_v27  ;;  %v1631_v23 = vld [vmem:[%s5434_s5] sm:$0x3] }
 0x654   : > { %v1632_v25 = vld [vmem:[%s5435_s29] sm:$0x3]  ;;  %v1666_v27 = vperm.slane %v1631_v23, 0  ;;  %s4677_s29 = scalar_lea.hbm %s5438_s14, 32 }
 0x655   : > { %1634 = vadd.xlane.f32.xlu2 %v1633_v30  ;;  %v1732_v30 = vld [vmem:[#allocation10 + $0x198] sm:$0xff]  ;;  %1955 = vmatpush.msra.mxu2 %v1877_v31 }
 0x656   : > { %1811 = vmatpush.msrb.mxu1 %v1732_v30 }
 0x657   : > { %1956 = vmatpush.msra.mxu2 %v1873_v21 }
 0x658   : > { %1812 = vmatpush.msrb.mxu1 %v1730_v34 }
 0x659   : > { %1957 = vmatpush.msra.mxu2 %v1869_v35 }
 0x65a   : > { %1813 = vmatpush.msrb.mxu1 %v1728_v37  ;;  %v4325_v37 = vld [vmem:[%s5028_s2] sm:$0xff] }
 0x65b   : > { %1958 = vmatpush.msra.mxu2 %v1865_v42  ;;  %v5172_v42 = vld [vmem:[%s599_s26] sm:$0xff] }
 0x65c   : > { %1814 = vmatpush.msrb.mxu1 %v1726_v40  ;;  %v1887_v40 = vld [vmem:[#allocation11 + $0x1f0] sm:$0xff] }
 0x65d   : > { %1959 = vmatpush.msra.mxu2 %v1861_v46  ;;  %v1867_v46 = vld [vmem:[#allocation11 + $0x150] sm:$0xff] }
 0x65e   : > { %1815 = vmatpush.msrb.mxu1 %v1724_v45  ;;  %v1871_v45 = vld [vmem:[#allocation11 + $0x170] sm:$0xff] }
 0x65f   : > { %1960 = vmatpush.msra.mxu2 %v1857_v41  ;;  %v1851_v41 = vld [vmem:[#allocation11 + $0xd0] sm:$0xff] }
 0x660   : > { %1816 = vmatpush.msrb.mxu1 %v1722_v49  ;;  %v1855_v49 = vld [vmem:[#allocation11 + $0xf0] sm:$0xff] }
 0x661   : > { %1961 = vmatpush.msra.mxu2 %v1853_v53  ;;  %v1835_v53 = vld [vmem:[#allocation11 + $0x50] sm:$0xff] }
 0x662   : > { %1817 = vmatpush.msrb.mxu1 %v1720_v52  ;;  %v1839_v52 = vld [vmem:[#allocation11 + $0x70] sm:$0xff] }
 0x663   : > { %1962 = vmatpush.msra.mxu2 %v1849_v57  ;;  %v1947_v57 = vld [vmem:[#allocation11 + $0x3d0] sm:$0xff] }
 0x664   : > { %1818 = vmatpush.msrb.mxu1 %v1718_v56  ;;  %v1951_v56 = vld [vmem:[#allocation11 + $0x3f0] sm:$0xff] }
 0x666   : > { %1819 = vmatpush.msrb.mxu1 %v1716_v60  ;;  %v1935_v60 = vld [vmem:[#allocation11 + $0x370] sm:$0xff] }
 0x6c8   : > { %v1635_v62 = vpop.xlane.xlu2 %1634 }
 0x6c9   : > { %v1643_v63 = vmul.f32 %v5138_v61, %v1635_v62  ;;  %v1845_v62 = vld [vmem:[#allocation11 + $0xa0] sm:$0xff] }
 0x6ca   : > { %1963 = vmatpush.msra.mxu2 %v1845_v62  ;;  %v1931_v62 = vld [vmem:[#allocation11 + $0x350] sm:$0xff] }
 0x6cb   : > { %v5142_v0 = vsub.f32 %v5132_v28, %v1643_v63  ;;  %v5145_v1 = vsub.f32 %v5134_v29, %v1643_v63  ;;  %v1945_v28 = vld [vmem:[#allocation11 + $0x3c0] sm:$0xff]  ;;  %v1700_v29 = vld [vmem:[#allocation10 + $0x98] sm:$0xff] }
 0x6cc   : > { %1974 = vmatpush.msra.mxu3 %v1945_v28  ;;  %1791 = vmatpush.msrb.mxu0 %v1700_v29  ;;  %v1909_v63 = vld [vmem:[#allocation11 + $0x2a0] sm:$0xff]  ;;  %v1667_v28 = vperm.slane %v1631_v23, 1 }
 0x6cd   : > { %v1646_v2 = vmul.f32 %v5142_v0, %v5142_v0  ;;  %v1647_v3 = vmul.f32 %v5145_v1, %v5145_v1 }
 0x6ce   : > { %1975 = vmatpush.msra.mxu3 %v1941_v26  ;;  %1792 = vmatpush.msrb.mxu0 %v1698_v32  ;;  %v1673_v26 = vperm.slane %v1632_v25, 0  ;;  %v1674_v32 = vperm.slane %v1632_v25, 1 }
 0x6cf   : > { %v1648_v4 = vadd.f32 %v1647_v3, %v1646_v2  ;;  %v1682_v2 = vld [vmem:[#allocation10 + $0x8] sm:$0xff] }
 0x6d0   : > { %1976 = vmatpush.msra.mxu3 %v1937_v33  ;;  %1793 = vmatpush.msrb.mxu0 %v1696_v36  ;;  %v1714_v3 = vld [vmem:[#allocation10 + $0x108] sm:$0xff] }
 0x6d1   : > { %1649 = vadd.xlane.f32.xlu1 %v1648_v4  ;;  %v1841_v4 = vld [vmem:[#allocation11 + $0x80] sm:$0xff]  ;;  %1820 = vmatpush.msrb.mxu1 %v1714_v3  ;;  %v1919_v3 = vld [vmem:[#allocation11 + $0x2f0] sm:$0xff] }
 0x6d2   : > { %1977 = vmatpush.msra.mxu3 %v1933_v38  ;;  %1794 = vmatpush.msrb.mxu0 %v1694_v39  ;;  %v4326_v38 = vld [vmem:[%s5028_s2 + $0x8] sm:$0xff] }
 0x6d3   : > { %1964 = vmatpush.msra.mxu2 %v1841_v4  ;;  %v1915_v4 = vld [vmem:[#allocation11 + $0x2d0] sm:$0xff] }
 0x6d4   : > { %1978 = vmatpush.msra.mxu3 %v1929_v43  ;;  %1795 = vmatpush.msrb.mxu0 %v1692_v44  ;;  %v5176_v43 = vld [vmem:[%s599_s26 + $0x8] sm:$0xff]  ;;  %v1875_v44 = vld [vmem:[#allocation11 + $0x190] sm:$0xff]  ;;  %s3871_s26 = scalar_lea.hbm %s5438_s14, %s4132_s3 }
 0x6d5   : > { %1965 = vmatpush.msra.mxu2 %v1837_v7  ;;  %v1911_v7 = vld [vmem:[#allocation11 + $0x2b0] sm:$0xff]  ;;  %s3875_s23 = sshll.u32 %s3871_s26, 4  ;;  %s3876_s23 = int_to_ptr.hbm [resolvable:$true] %s3875_s23 }
 0x6d6   : > { %1979 = vmatpush.msra.mxu3 %v1925_v47  ;;  %1796 = vmatpush.msrb.mxu0 %v1690_v48  ;;  %v1863_v47 = vld [vmem:[#allocation11 + $0x130] sm:$0xff]  ;;  %s4671_s5 = sshra.s32 %s3876_s23, 4  ;;  %s4672_s5 = int_to_ptr.hbm [resolvable:$true] %s4671_s5 }
 0x6d7   : > { %1966 = vmatpush.msra.mxu2 %v1833_v10  ;;  %v1859_v48 = vld [vmem:[#allocation11 + $0x110] sm:$0xff]  ;;  %s4673_s9 = scalar_lea.hbm %s4672_s5, 16  ;;  %p4678_p7 = scmp.lt.s32.totalorder %s4672_s5, %s5438_s14 }
 0x6d8   : > { %1980 = vmatpush.msra.mxu3 %v1921_v50  ;;  %1797 = vmatpush.msrb.mxu0 %v1688_v51  ;;  %v1847_v50 = vld [vmem:[#allocation11 + $0xb0] sm:$0xff]  ;;  %p4674_p1 = scmp.ne.s32.totalorder %s4672_s5, %s4673_s9  ;;  %p4679_p9 = scmp.lt.s32.totalorder %s4677_s29, %s4673_s9 }
 0x6d9   : > { %1967 = vmatpush.msra.mxu2 %v1829_v13  ;;  %v1843_v51 = vld [vmem:[#allocation11 + $0x90] sm:$0xff] }
 0x6da   : > { %1981 = vmatpush.msra.mxu3 %v1917_v54  ;;  %1798 = vmatpush.msrb.mxu0 %v1686_v55  ;;  %v1831_v54 = vld [vmem:[#allocation11 + $0x30] sm:$0xff]  ;;  %p4675_p3 = pnand %p4674_p1, %p4970_p0  ;;  %p4680_p8 = por %p4679_p9, %p4678_p7 }
 0x6db   : > { %1968 = vmatpush.msra.mxu2 %v1825_v15  ;;  %v1827_v55 = vld [vmem:[#allocation11 + $0x10] sm:$0xff] }
 0x6dc   : > { %1982 = vmatpush.msra.mxu3 %v1913_v58  ;;  %1799 = vmatpush.msrb.mxu0 %v1684_v59  ;;  %v1943_v58 = vld [vmem:[#allocation11 + $0x3b0] sm:$0xff]  ;;  %p4676_p13 = pneg %p4675_p3 }
 0x6dd   : > { %v1939_v59 = vld [vmem:[#allocation11 + $0x390] sm:$0xff] }
 0x6de   : > { %1983 = vmatpush.msra.mxu3 %v1909_v63  ;;  %1800 = vmatpush.msrb.mxu0 %v1682_v2  ;;  %v1927_v63 = vld [vmem:[#allocation11 + $0x330] sm:$0xff]  ;;  %p4681_p10 = pnand %p4680_p8, %p4676_p13 }
 0x6df   : > { %v1923_v2 = vld [vmem:[#allocation11 + $0x310] sm:$0xff] }
 0x6e0   : > { %1984 = vmatpush.msra.mxu3 %v1905_v5  ;;  %v1903_v10 = vld [vmem:[#allocation11 + $0x270] sm:$0xff] }
 0x6e1   : > { %v1895_v15 = vld [vmem:[#allocation11 + $0x230] sm:$0xff] }
 0x6e2   : > { %1985 = vmatpush.msra.mxu3 %v1901_v8 }
 0x6e4   : > { %1986 = vmatpush.msra.mxu3 %v1897_v11  ;;  %v1899_v11 = vld [vmem:[#allocation11 + $0x250] sm:$0xff] }
 0x6e6   : > { %1987 = vmatpush.msra.mxu3 %v1893_v14 }
 0x6e8   : > { %1988 = vmatpush.msra.mxu3 %v1889_v16  ;;  %v1891_v16 = vld [vmem:[#allocation11 + $0x210] sm:$0xff] }
 0x744   : > { %v1650_v6 = vpop.xlane.xlu1 %1649 }
 0x745   : > { %v1651_v9 = vmul.f32 %v1650_v6, %v5138_v61 }
 0x747   : > { %v1652_v12 = vadd.f32 1e-05, %v1651_v9  ;;  %v1907_v9 = vld [vmem:[#allocation11 + $0x290] sm:$0xff] }
 0x749   : > { %4303 = vrsqrt.f32 %v1652_v12  ;;  %vm1659_vm4 = vweird.f32 %v1652_v12 }
 0x74f   : > { %v4304_v17 = vpop.eup %4303 }
 0x750   : > { %v1654_v18 = vmul.f32 %v4304_v17, %v1652_v12  ;;  %vm1660_vm3 = vweird.f32 %v4304_v17 }
 0x751   : > { %vm1661_vm5 = vmor %vm1659_vm4, %vm1660_vm3 }
 0x752   : > { %v1655_v19 = vmul.f32 %v4304_v17, %v1654_v18 }
 0x754   : > { %v1656_v20 = vmul.f32 0.5, %v1655_v19 }
 0x756   : > { %v1657_v22 = vsub.f32 1.5, %v1656_v20 }
 0x758   : > { %v1658_v24 = vmul.f32 %v4304_v17, %v1657_v22 }
 0x75a   : > { %v1662_v29 = vsel %vm1661_vm5, %v4304_v17, %v1658_v24 }
 0x75b   : > { %v1663_v30 = vmul.f32 %v1662_v29, %v5142_v0  ;;  %v1664_v31 = vmul.f32 %v1662_v29, %v5145_v1  ;;  %v1883_v0 = vld [vmem:[#allocation11 + $0x1d0] sm:$0xff] }
 0x75c   : > { %v1879_v1 = vld [vmem:[#allocation11 + $0x1b0] sm:$0xff] }
 0x75d   : > { %v1670_v34 = vmul.f32 %v1666_v27, %v1663_v30  ;;  %v1671_v21 = vmul.f32 %v1667_v28, %v1664_v31 }
 0x75f   : > { %v1677_v33 = vadd.f32 %v1673_v26, %v1670_v34  ;;  %v1678_v36 = vadd.f32 %v1674_v32, %v1671_v21 }
 0x761   : > { %v5161_v35 = vadd.f32 %v4325_v37, %v1677_v33  ;;  %v5164_v39 = vadd.f32 %v4326_v38, %v1678_v36 }
 0x763   : > { %1761 = vmatmul.f32.vlgmr.msrb.gmra.mxu2 %v5161_v35  ;;  %1781 = vmatmul.f32.vlgmr.msrb.gmra.mxu3 %v5164_v39 }
 0x764   : > { %1801 = vmatmul.f32.vlgmr.msrb.gmra.mxu0 %v5161_v35  ;;  %1821 = vmatmul.f32.vlgmr.msrb.gmra.mxu1 %v5164_v39 }
 0x765   : > { %2033 = vmatpush.msrb.mxu2 %v1887_v40  ;;  %2053 = vmatpush.msrb.mxu3 %v1951_v56  ;;  %v1886_v40 = vld [vmem:[#allocation11 + $0x1e8] sm:$0xff] }
 0x766   : > { %1993 = vmatpush.msra.mxu0 %v1886_v40  ;;  %v1926_v56 = vld [vmem:[#allocation11 + $0x328] sm:$0xff]  ;;  %v1948_v40 = vld [vmem:[#allocation11 + $0x3d8] sm:$0xff] }
 0x767   : > { %2034 = vmatpush.msrb.mxu2 %v1883_v0  ;;  %2054 = vmatpush.msrb.mxu3 %v1947_v57  ;;  %v1950_v0 = vld [vmem:[#allocation11 + $0x3e8] sm:$0xff] }
 0x768   : > { %2013 = vmatpush.msra.mxu1 %v1950_v0  ;;  %v1858_v57 = vld [vmem:[#allocation11 + $0x108] sm:$0xff]  ;;  %v1848_v0 = vld [vmem:[#allocation11 + $0xb8] sm:$0xff] }
 0x769   : > { %2035 = vmatpush.msrb.mxu2 %v1879_v1  ;;  %2055 = vmatpush.msrb.mxu3 %v1943_v58  ;;  %v1882_v1 = vld [vmem:[#allocation11 + $0x1c8] sm:$0xff] }
 0x76a   : > { %1994 = vmatpush.msra.mxu0 %v1882_v1  ;;  %v1922_v58 = vld [vmem:[#allocation11 + $0x308] sm:$0xff]  ;;  %v1944_v1 = vld [vmem:[#allocation11 + $0x3b8] sm:$0xff] }
 0x76b   : > { %1969 = vmatmul.f32.vlgmr.msra.gmra.mxu2 %v5172_v42  ;;  %1989 = vmatmul.f32.vlgmr.msra.gmra.mxu3 %v5176_v43 }
 0x76c   : > { %2036 = vmatpush.msrb.mxu2 %v1875_v44  ;;  %2056 = vmatpush.msrb.mxu3 %v1939_v59 }
 0x76e   : > { %2037 = vmatpush.msrb.mxu2 %v1871_v45  ;;  %2057 = vmatpush.msrb.mxu3 %v1935_v60  ;;  %v1946_v45 = vld [vmem:[#allocation11 + $0x3c8] sm:$0xff] }
 0x76f   : > { %2014 = vmatpush.msra.mxu1 %v1946_v45  ;;  %v1854_v60 = vld [vmem:[#allocation11 + $0xe8] sm:$0xff]  ;;  %v1844_v45 = vld [vmem:[#allocation11 + $0x98] sm:$0xff] }
 0x770   : > { %2038 = vmatpush.msrb.mxu2 %v1867_v46  ;;  %2058 = vmatpush.msrb.mxu3 %v1931_v62  ;;  %v1878_v46 = vld [vmem:[#allocation11 + $0x1a8] sm:$0xff] }
 0x771   : > { %1995 = vmatpush.msra.mxu0 %v1878_v46  ;;  %v1918_v62 = vld [vmem:[#allocation11 + $0x2e8] sm:$0xff]  ;;  %v1940_v46 = vld [vmem:[#allocation11 + $0x398] sm:$0xff] }
 0x772   : > { %2039 = vmatpush.msrb.mxu2 %v1863_v47  ;;  %2059 = vmatpush.msrb.mxu3 %v1927_v63  ;;  %v1942_v47 = vld [vmem:[#allocation11 + $0x3a8] sm:$0xff] }
 0x773   : > { %2015 = vmatpush.msra.mxu1 %v1942_v47  ;;  %v1850_v63 = vld [vmem:[#allocation11 + $0xc8] sm:$0xff]  ;;  %v1840_v47 = vld [vmem:[#allocation11 + $0x78] sm:$0xff] }
 0x774   : > { %2040 = vmatpush.msrb.mxu2 %v1859_v48  ;;  %2060 = vmatpush.msrb.mxu3 %v1923_v2  ;;  %v1914_v2 = vld [vmem:[#allocation11 + $0x2c8] sm:$0xff] }
 0x776   : > { %2041 = vmatpush.msrb.mxu2 %v1855_v49  ;;  %2061 = vmatpush.msrb.mxu3 %v1919_v3  ;;  %v1846_v3 = vld [vmem:[#allocation11 + $0xa8] sm:$0xff] }
 0x778   : > { %2042 = vmatpush.msrb.mxu2 %v1851_v41  ;;  %2062 = vmatpush.msrb.mxu3 %v1915_v4  ;;  %v1874_v41 = vld [vmem:[#allocation11 + $0x188] sm:$0xff] }
 0x779   : > { %1996 = vmatpush.msra.mxu0 %v1874_v41  ;;  %v1910_v4 = vld [vmem:[#allocation11 + $0x2a8] sm:$0xff] }
 0x77a   : > { %2043 = vmatpush.msrb.mxu2 %v1847_v50  ;;  %2063 = vmatpush.msrb.mxu3 %v1911_v7  ;;  %v1938_v50 = vld [vmem:[#allocation11 + $0x388] sm:$0xff] }
 0x77b   : > { %2016 = vmatpush.msra.mxu1 %v1938_v50  ;;  %v1906_v7 = vld [vmem:[#allocation11 + $0x288] sm:$0xff]  ;;  %v2128_v50 = vld [vmem:[#allocation13 + $0x78] sm:$0xff] }
 0x77c   : > { %2044 = vmatpush.msrb.mxu2 %v1843_v51  ;;  %2064 = vmatpush.msrb.mxu3 %v1907_v9  ;;  %v1870_v51 = vld [vmem:[#allocation11 + $0x168] sm:$0xff] }
 0x77d   : > { %1997 = vmatpush.msra.mxu0 %v1870_v51  ;;  %v1838_v9 = vld [vmem:[#allocation11 + $0x68] sm:$0xff]  ;;  %v1936_v51 = vld [vmem:[#allocation11 + $0x378] sm:$0xff] }
 0x77e   : > { %2045 = vmatpush.msrb.mxu2 %v1839_v52  ;;  %2065 = vmatpush.msrb.mxu3 %v1903_v10  ;;  %v1934_v52 = vld [vmem:[#allocation11 + $0x368] sm:$0xff] }
 0x77f   : > { %2017 = vmatpush.msra.mxu1 %v1934_v52  ;;  %v1902_v10 = vld [vmem:[#allocation11 + $0x268] sm:$0xff]  ;;  %v1836_v52 = vld [vmem:[#allocation11 + $0x58] sm:$0xff] }
 0x780   : > { %2046 = vmatpush.msrb.mxu2 %v1835_v53  ;;  %2066 = vmatpush.msrb.mxu3 %v1899_v11  ;;  %v1866_v53 = vld [vmem:[#allocation11 + $0x148] sm:$0xff] }
 0x781   : > { %1998 = vmatpush.msra.mxu0 %v1866_v53  ;;  %v1834_v11 = vld [vmem:[#allocation11 + $0x48] sm:$0xff] }
 0x782   : > { %2047 = vmatpush.msrb.mxu2 %v1831_v54  ;;  %2067 = vmatpush.msrb.mxu3 %v1895_v15  ;;  %v1930_v54 = vld [vmem:[#allocation11 + $0x348] sm:$0xff] }
 0x783   : > { %2018 = vmatpush.msra.mxu1 %v1930_v54  ;;  %v1826_v15 = vld [vmem:[#allocation11 + $0x8] sm:$0xff]  ;;  %v1932_v54 = vld [vmem:[#allocation11 + $0x358] sm:$0xff] }
 0x784   : > { %2048 = vmatpush.msrb.mxu2 %v1827_v55  ;;  %2068 = vmatpush.msrb.mxu3 %v1891_v16  ;;  %v1862_v55 = vld [vmem:[#allocation11 + $0x128] sm:$0xff] }
 0x785   : > { %2049 = vmatmul.f32.vlgmr.msrb.gmra.mxu2 %v5172_v42  ;;  %2069 = vmatmul.f32.vlgmr.msrb.gmra.mxu3 %v5176_v43  ;;  %v1890_v16 = vld [vmem:[#allocation11 + $0x208] sm:$0xff] }
 0x786   : > { %1999 = vmatpush.msra.mxu0 %v1862_v55  ;;  %2019 = vmatpush.msra.mxu1 %v1926_v56  ;;  %v2126_v53 = vld [vmem:[#allocation13 + $0x68] sm:$0xff]  ;;  %v1832_v55 = vld [vmem:[#allocation11 + $0x38] sm:$0xff] }
 0x787   : > { %v2124_v56 = vld [vmem:[#allocation13 + $0x58] sm:$0xff] }
 0x788   : > { %2000 = vmatpush.msra.mxu0 %v1858_v57  ;;  %2020 = vmatpush.msra.mxu1 %v1922_v58  ;;  %v1928_v57 = vld [vmem:[#allocation11 + $0x338] sm:$0xff]  ;;  %v2122_v58 = vld [vmem:[#allocation13 + $0x48] sm:$0xff] }
 0x78a   : > { %2001 = vmatpush.msra.mxu0 %v1854_v60  ;;  %2021 = vmatpush.msra.mxu1 %v1918_v62  ;;  %v1924_v60 = vld [vmem:[#allocation11 + $0x318] sm:$0xff] }
 0x78b   : > { %v2120_v62 = vld [vmem:[#allocation13 + $0x38] sm:$0xff] }
 0x78c   : > { %2002 = vmatpush.msra.mxu0 %v1850_v63  ;;  %2022 = vmatpush.msra.mxu1 %v1914_v2  ;;  %v2141_v63 = vld [vmem:[#allocation13 + $0xe0] sm:$0xff]  ;;  %v1920_v2 = vld [vmem:[#allocation11 + $0x2f8] sm:$0xff] }
 0x78e   : > { %2003 = vmatpush.msra.mxu0 %v1846_v3  ;;  %2023 = vmatpush.msra.mxu1 %v1910_v4  ;;  %v2118_v3 = vld [vmem:[#allocation13 + $0x28] sm:$0xff]  ;;  %v2139_v4 = vld [vmem:[#allocation13 + $0xd0] sm:$0xff] }
 0x790   : > { %2024 = vmatpush.msra.mxu1 %v1906_v7  ;;  %v2137_v7 = vld [vmem:[#allocation13 + $0xc0] sm:$0xff] }
 0x792   : > { %2025 = vmatpush.msra.mxu1 %v1902_v10  ;;  %v2135_v10 = vld [vmem:[#allocation13 + $0xb0] sm:$0xff] }
 0x7e1   : > { %v1802_v21 = vpop.f32.mrf.mxu0  ;;  %v1822_v33 = vpop.f32.mrf.mxu1 }
 0x7e2   : > { %v5197_v36 = vadd.f32 %v1822_v33, %v1802_v21  ;;  %v1860_v21 = vld [vmem:[#allocation11 + $0x118] sm:$0xff] }
 0x7e3   : > { %v1856_v33 = vld [vmem:[#allocation11 + $0xf8] sm:$0xff] }
 0x7e6   : > { %v1762_v5 = vpop.f32.mrf.mxu2  ;;  %v1782_v6 = vpop.f32.mrf.mxu3 }
 0x7e7   : > { %v1783_v8 = vadd.f32 %v1782_v6, %v1762_v5  ;;  %v1842_v5 = vld [vmem:[#allocation11 + $0x88] sm:$0xff] }
 0x7e8   : > { %2004 = vmatpush.msra.mxu0 %v1842_v5  ;;  %v1916_v5 = vld [vmem:[#allocation11 + $0x2d8] sm:$0xff] }
 0x7e9   : > { %2238 = vrot.lane.b32.xlu1 %v1783_v8, %s4766_s17 }
 0x7ea   : > { %2005 = vmatpush.msra.mxu0 %v1838_v9  ;;  %v2114_v9 = vld [vmem:[#allocation13 + $0x8] sm:$0xff] }
 0x7ec   : > { %2006 = vmatpush.msra.mxu0 %v1834_v11  ;;  %v1908_v11 = vld [vmem:[#allocation11 + $0x298] sm:$0xff] }
 0x7ee   : > { %v1970_v12 = vpop.f32.mrf.mxu2  ;;  %v1990_v13 = vpop.f32.mrf.mxu3 }
 0x7ef   : > { %v1991_v14 = vadd.f32 %v1990_v13, %v1970_v12  ;;  %v1898_v12 = vld [vmem:[#allocation11 + $0x248] sm:$0xff] }
 0x7f0   : > { %v1830_v13 = vld [vmem:[#allocation11 + $0x28] sm:$0xff]  ;;  %2026 = vmatpush.msra.mxu1 %v1898_v12  ;;  %v1904_v12 = vld [vmem:[#allocation11 + $0x278] sm:$0xff] }
 0x7f1   : > { %4105 = vmatpush.xpose.msk.msra.mxu2 %vm1197_vm0, %v1991_v14  ;;  %2240 = vrot.lane.b32.xlu2 %v1991_v14, %s4766_s17  ;;  %v1894_v14 = vld [vmem:[#allocation11 + $0x228] sm:$0xff] }
 0x7f2   : > { %2007 = vmatpush.msra.mxu0 %v1830_v13  ;;  %2027 = vmatpush.msra.mxu1 %v1894_v14  ;;  %v2131_v14 = vld [vmem:[#allocation13 + $0x90] sm:$0xff] }
 0x7f4   : > { %4106 = vmatmul.msk.f32.vlgmr.msra.gmra.mxu2 %vm1197_vm0, %v1783_v8  ;;  %2008 = vmatpush.msra.mxu0 %v1826_v15  ;;  %v1900_v15 = vld [vmem:[#allocation11 + $0x258] sm:$0xff] }
 0x7f5   : > { %2028 = vmatpush.msra.mxu1 %v1890_v16  ;;  %2009 = vmatmul.f32.vlgmr.msra.gmra.mxu0 %v5172_v42 }
 0x7f6   : > { %2029 = vmatmul.f32.vlgmr.msra.gmra.mxu1 %v5176_v43 }
 0x808   : > { %v2050_v19 = vpop.f32.mrf.mxu2  ;;  %v2070_v23 = vpop.f32.mrf.mxu3 }
 0x809   : > { %v5188_v24 = vadd.f32 %v2070_v23, %v2050_v19  ;;  %v2123_v19 = vld [vmem:[#allocation13 + $0x50] sm:$0xff]  ;;  %v1884_v23 = vld [vmem:[#allocation11 + $0x1d8] sm:$0xff] }
 0x80b   : > { %2233 = vmatpush.msra.mxu3 %v5188_v24 }
 0x84b   : > { %v2241_v17 = vpop.permute.xlu2 %2240 }
 0x84c   : > { %4108 = vmatpush.xpose.msk.msrb.mxu2 %vm1197_vm0, %v2241_v17  ;;  %v2127_v17 = vld [vmem:[#allocation13 + $0x70] sm:$0xff] }
 0x850   : > { %2359 = vmatpush.msra.mxu2 %v2127_v17 }
 0x85b   : > { %v2239_v18 = vpop.permute.xlu1 %2238 }
 0x85c   : > { %4109 = vmatmul.msk.f32.vlgmr.msrb.gmra.mxu2 %vm1197_vm0, %v2239_v18  ;;  %v2125_v18 = vld [vmem:[#allocation13 + $0x60] sm:$0xff] }
 0x85d   : > { %2360 = vmatpush.msra.mxu2 %v2125_v18  ;;  %v2129_v18 = vld [vmem:[#allocation13 + $0x80] sm:$0xff] }
 0x85f   : > { %2361 = vmatpush.msra.mxu2 %v2123_v19 }
 0x872   : > { %v2010_v16 = vpop.f32.mrf.mxu0 }
 0x873   : > { %v2030_v17 = vpop.f32.mrf.mxu1 }
 0x874   : > { %v2031_v19 = vadd.f32 %v2030_v17, %v2010_v16  ;;  %v2176_v16 = vld [vmem:[#allocation13 + $0x1f8] sm:$0xff]  ;;  %v2173_v17 = vld [vmem:[#allocation13 + $0x1e0] sm:$0xff] }
 0x877   : > { %v2200_v20 = vpop.f32.mrf.mxu2 }
 0x878   : > { %v2203_v22 = vmul.f32 0.125, %v2200_v20  ;;  %v1888_v20 = vld [vmem:[#allocation11 + $0x1f8] sm:$0xff] }
 0x879   : > { %2073 = vmatpush.msrb.mxu0 %v1888_v20  ;;  %v1896_v20 = vld [vmem:[#allocation11 + $0x238] sm:$0xff] }
 0x87a   : > { %v2204_v25 = vsel %vm1225_vm1, %v2203_v22, -inf }
 0x87b   : > { %2205 = vmax.xlane.f32.xlu0 %v2204_v25  ;;  %2074 = vmatpush.msrb.mxu0 %v1884_v23  ;;  %v1880_v25 = vld [vmem:[#allocation11 + $0x1b8] sm:$0xff] }
 0x87c   : > { %v2144_v23 = vld [vmem:[#allocation13 + $0xf8] sm:$0xff] }
 0x87d   : > { %2075 = vmatpush.msrb.mxu0 %v1880_v25  ;;  %v2140_v25 = vld [vmem:[#allocation13 + $0xd8] sm:$0xff] }
 0x8df   : > { %v2263_v27 = vpop.f32.mrf.mxu2 }
 0x8e0   : > { %v2266_v28 = vmul.f32 0.125, %v2263_v27  ;;  %v2117_v27 = vld [vmem:[#allocation13 + $0x20] sm:$0xff] }
 0x8e2   : > { %v2267_v29 = vsel %vm1225_vm1, %v2266_v28, -inf }
 0x8e3   : > { %2268 = vmax.xlane.f32.xlu2 %v2267_v29  ;;  %v2115_v29 = vld [vmem:[#allocation13 + $0x10] sm:$0xff] }
 0x8ee   : > { %v2206_v30 = vpop.xlane.xlu0 %2205 }
 0x8ef   : > { %v2207_v31 = vsub.f32 %v2203_v22, %v2206_v30  ;;  %v2121_v22 = vld [vmem:[#allocation13 + $0x40] sm:$0xff]  ;;  %v1872_v30 = vld [vmem:[#allocation11 + $0x178] sm:$0xff] }
 0x8f0   : > { %2362 = vmatpush.msra.mxu2 %v2121_v22  ;;  %v1892_v22 = vld [vmem:[#allocation11 + $0x218] sm:$0xff] }
 0x8f1   : > { %v2208_v26 = vmul.f32 1.442695, %v2207_v31  ;;  %v2113_v31 = vld [vmem:[#allocation13] sm:$0xff] }
 0x8f3   : > { %4305 = vpow2.f32 %v2208_v26  ;;  %v1868_v26 = vld [vmem:[#allocation11 + $0x158] sm:$0xff] }
 0x8f9   : > { %v5193_v32 = vpop.eup %4305 }
 0x8fa   : > { %v2210_v34 = vsel %vm1225_vm1, %v5193_v32, 0.0 }
 0x8fb   : > { %2211 = vadd.xlane.f32.xlu1 %v2210_v34  ;;  %2499 = vrot.lane.b32.xlu2 %v2031_v19, %s4766_s17 }
 0x914   : > { %2497 = vrot.lane.b32.xlu1 %v5197_v36, %s4766_s17 }
 0x956   : > { %v2269_v37 = vpop.xlane.xlu2 %2268 }
 0x957   : > { %v2270_v38 = vsub.f32 %v2266_v28, %v2269_v37  ;;  %v1876_v28 = vld [vmem:[#allocation11 + $0x198] sm:$0xff] }
 0x958   : > { %2076 = vmatpush.msrb.mxu0 %v1876_v28  ;;  %v1852_v37 = vld [vmem:[#allocation11 + $0xd8] sm:$0xff] }
 0x959   : > { %v2271_v44 = vmul.f32 1.442695, %v2270_v38  ;;  %v1952_v38 = vld [vmem:[#allocation11 + $0x3f8] sm:$0xff] }
 0x95a   : > { %2077 = vmatpush.msrb.mxu0 %v1872_v30  ;;  %2093 = vmatpush.msrb.mxu1 %v1952_v38  ;;  %v2136_v28 = vld [vmem:[#allocation13 + $0xb8] sm:$0xff] }
 0x95b   : > { %4307 = vpow2.f32 %v2271_v44  ;;  %v2132_v30 = vld [vmem:[#allocation13 + $0x98] sm:$0xff] }
 0x95c   : > { %2078 = vmatpush.msrb.mxu0 %v1868_v26  ;;  %2094 = vmatpush.msrb.mxu1 %v1948_v40 }
 0x95e   : > { %2095 = vmatpush.msrb.mxu1 %v1944_v1  ;;  %v2500_v26 = vpop.permute.xlu2 %2499 }
 0x960   : > { %2096 = vmatpush.msrb.mxu1 %v1940_v46 }
 0x961   : > { %v5201_v48 = vpop.eup %4307 }
 0x962   : > { %v2273_v49 = vsel %vm1225_vm1, %v5201_v48, 0.0  ;;  %2097 = vmatpush.msrb.mxu1 %v1936_v51 }
 0x963   : > { %2274 = vadd.xlane.f32.xlu0 %v2273_v49 }
 0x964   : > { %2098 = vmatpush.msrb.mxu1 %v1932_v54 }
 0x966   : > { %2099 = vmatpush.msrb.mxu1 %v1928_v57  ;;  %v2157_v57 = vld [vmem:[#allocation13 + $0x160] sm:$0xff] }
 0x968   : > { %2100 = vmatpush.msrb.mxu1 %v1924_v60 }
 0x96a   : > { %2101 = vmatpush.msrb.mxu1 %v1920_v2  ;;  %v2151_v2 = vld [vmem:[#allocation13 + $0x130] sm:$0xff] }
 0x96c   : > { %2102 = vmatpush.msrb.mxu1 %v1916_v5  ;;  %v2150_v5 = vld [vmem:[#allocation13 + $0x128] sm:$0xff] }
 0x96e   : > { %v2212_v59 = vpop.xlane.xlu1 %2211 }
 0x96f   : > { %4309 = vrcp.f32 %v2212_v59  ;;  %v2143_v59 = vld [vmem:[#allocation13 + $0xf0] sm:$0xff] }
 0x975   : > { %v4310_v6 = vpop.eup %4309 }
 0x976   : > { %v2214_v8 = vmul.f32 %v4310_v6, %v5193_v32  ;;  %v1864_v32 = vld [vmem:[#allocation11 + $0x138] sm:$0xff] }
 0x977   : > { %2279 = vrot.lane.b32.xlu0 %v5188_v24, %s4766_s17  ;;  %v2119_v24 = vld [vmem:[#allocation13 + $0x30] sm:$0xff]  ;;  %2079 = vmatpush.msrb.mxu0 %v1864_v32  ;;  %v2116_v6 = vld [vmem:[#allocation13 + $0x18] sm:$0xff] }
 0x978   : > { %4107 = vmatmul.msk.f32.vlgmr.msra.gmra.mxu3 %vm1225_vm1, %v2214_v8  ;;  %2363 = vmatpush.msra.mxu2 %v2119_v24  ;;  %v1912_v8 = vld [vmem:[#allocation11 + $0x2b8] sm:$0xff]  ;;  %v2142_v24 = vld [vmem:[#allocation13 + $0xe8] sm:$0xff] }
 0x979   : > { %2080 = vmatpush.msrb.mxu0 %v1860_v21  ;;  %2103 = vmatpush.msrb.mxu1 %v1912_v8 }
 0x97a   : > { %2364 = vmatpush.msra.mxu2 %v2117_v27  ;;  %v2138_v27 = vld [vmem:[#allocation13 + $0xc8] sm:$0xff] }
 0x97b   : > { %2081 = vmatpush.msrb.mxu0 %v1856_v33  ;;  %2104 = vmatpush.msrb.mxu1 %v1908_v11 }
 0x97c   : > { %2365 = vmatpush.msra.mxu2 %v2115_v29  ;;  %v2134_v29 = vld [vmem:[#allocation13 + $0xa8] sm:$0xff] }
 0x97d   : > { %2082 = vmatpush.msrb.mxu0 %v1852_v37  ;;  %2105 = vmatpush.msrb.mxu1 %v1904_v12 }
 0x97e   : > { %2366 = vmatpush.msra.mxu2 %v2113_v31  ;;  %v2130_v31 = vld [vmem:[#allocation13 + $0x88] sm:$0xff] }
 0x97f   : > { %2083 = vmatpush.msrb.mxu0 %v1848_v0  ;;  %2106 = vmatpush.msrb.mxu1 %v1900_v15  ;;  %v2175_v15 = vld [vmem:[#allocation13 + $0x1f0] sm:$0xff] }
 0x981   : > { %2084 = vmatpush.msrb.mxu0 %v1844_v45  ;;  %2107 = vmatpush.msrb.mxu1 %v1896_v20  ;;  %v2172_v20 = vld [vmem:[#allocation13 + $0x1d8] sm:$0xff] }
 0x983   : > { %2085 = vmatpush.msrb.mxu0 %v1840_v47  ;;  %2108 = vmatpush.msrb.mxu1 %v1892_v22  ;;  %v2169_v22 = vld [vmem:[#allocation13 + $0x1c0] sm:$0xff] }
 0x984   : > { %2109 = vmatmul.f32.vlgmr.msrb.gmra.mxu1 %v5176_v43 }
 0x985   : > { %2086 = vmatpush.msrb.mxu0 %v1836_v52  ;;  %2336 = vmatpush.msra.mxu1 %v2144_v23  ;;  %v2170_v23 = vld [vmem:[#allocation13 + $0x1c8] sm:$0xff] }
 0x986   : > { %v2498_v43 = vpop.permute.xlu1 %2497 }
 0x987   : > { %2087 = vmatpush.msrb.mxu0 %v1832_v55  ;;  %2337 = vmatpush.msra.mxu1 %v2142_v24  ;;  %v2159_v55 = vld [vmem:[#allocation13 + $0x170] sm:$0xff] }
 0x988   : > { %2463 = vmatpush.msrb.mxu2 %v2159_v55  ;;  %v2167_v24 = vld [vmem:[#allocation13 + $0x1b0] sm:$0xff]  ;;  %v2765_v55 = vld [vmem:[#allocation14 + $0x388] sm:$0xff] }
 0x989   : > { %2338 = vmatpush.msra.mxu1 %v2140_v25  ;;  %v2168_v25 = vld [vmem:[#allocation13 + $0x1b8] sm:$0xff] }
 0x98a   : > { %2464 = vmatpush.msrb.mxu2 %v2157_v57  ;;  %v2756_v57 = vld [vmem:[#allocation14 + $0x340] sm:$0xff] }
 0x98b   : > { %2339 = vmatpush.msra.mxu1 %v2138_v27  ;;  %v2165_v27 = vld [vmem:[#allocation13 + $0x1a0] sm:$0xff] }
 0x98d   : > { %2340 = vmatpush.msra.mxu1 %v2136_v28  ;;  %v2166_v28 = vld [vmem:[#allocation13 + $0x1a8] sm:$0xff] }
 0x98f   : > { %2341 = vmatpush.msra.mxu1 %v2134_v29  ;;  %v2163_v29 = vld [vmem:[#allocation13 + $0x190] sm:$0xff] }
 0x991   : > { %2342 = vmatpush.msra.mxu1 %v2132_v30  ;;  %v2164_v30 = vld [vmem:[#allocation13 + $0x198] sm:$0xff] }
 0x993   : > { %2343 = vmatpush.msra.mxu1 %v2130_v31  ;;  %v2161_v31 = vld [vmem:[#allocation13 + $0x180] sm:$0xff] }
 0x9d6   : > { %v2275_v34 = vpop.xlane.xlu0 %2274 }
 0x9d7   : > { %4311 = vrcp.f32 %v2275_v34 }
 0x9dd   : > { %v4312_v44 = vpop.eup %4311 }
 0x9de   : > { %v2277_v49 = vmul.f32 %v4312_v44, %v5201_v48  ;;  %v1828_v48 = vld [vmem:[#allocation11 + $0x18] sm:$0xff] }
 0x9df   : > { %2088 = vmatpush.msrb.mxu0 %v1828_v48  ;;  %v2158_v48 = vld [vmem:[#allocation13 + $0x168] sm:$0xff] }
 0x9e0   : > { %2089 = vmatmul.f32.vlgmr.msrb.gmra.mxu0 %v5172_v42  ;;  %v2133_v42 = vld [vmem:[#allocation13 + $0xa0] sm:$0xff] }
 0x9e1   : > { %2316 = vmatpush.msra.mxu0 %v2143_v59  ;;  %v2156_v59 = vld [vmem:[#allocation13 + $0x158] sm:$0xff] }
 0x9e3   : > { %2317 = vmatpush.msra.mxu0 %v2141_v63  ;;  %v2154_v63 = vld [vmem:[#allocation13 + $0x148] sm:$0xff] }
 0x9e5   : > { %2318 = vmatpush.msra.mxu0 %v2139_v4  ;;  %v2149_v4 = vld [vmem:[#allocation13 + $0x120] sm:$0xff] }
 0x9e7   : > { %2319 = vmatpush.msra.mxu0 %v2137_v7  ;;  %v2147_v7 = vld [vmem:[#allocation13 + $0x110] sm:$0xff] }
 0x9e9   : > { %v2280_v41 = vpop.permute.xlu0 %2279  ;;  %2320 = vmatpush.msra.mxu0 %v2135_v10 }
 0x9ea   : > { %2300 = vmatpush.msrb.mxu3 %v2280_v41 }
 0x9eb   : > { %4110 = vmatmul.msk.f32.vlgmr.msrb.gmra.mxu3 %vm1225_vm1, %v2277_v49  ;;  %2321 = vmatpush.msra.mxu0 %v2133_v42 }
 0x9ec   : > { %2379 = vmatpush.msra.mxu3 %v2128_v50 }
 0x9ed   : > { %2322 = vmatpush.msra.mxu0 %v2131_v14  ;;  %v2146_v14 = vld [vmem:[#allocation13 + $0x108] sm:$0xff] }
 0x9ee   : > { %2380 = vmatpush.msra.mxu3 %v2126_v53 }
 0x9ef   : > { %2323 = vmatpush.msra.mxu0 %v2129_v18  ;;  %v2174_v18 = vld [vmem:[#allocation13 + $0x1e8] sm:$0xff] }
 0x9f0   : > { %2381 = vmatpush.msra.mxu3 %v2124_v56  ;;  %v2160_v56 = vld [vmem:[#allocation13 + $0x178] sm:$0xff] }
 0x9f1   : > { %4115 = vmatpush.xpose.msk.msrb.mxu0 %vm1197_vm0, %v2031_v19  ;;  %v2171_v19 = vld [vmem:[#allocation13 + $0x1d0] sm:$0xff] }
 0x9f2   : > { %2382 = vmatpush.msra.mxu3 %v2122_v58  ;;  %v2155_v58 = vld [vmem:[#allocation13 + $0x150] sm:$0xff] }
 0x9f3   : > { %2465 = vmatpush.msrb.mxu2 %v2155_v58  ;;  %v2757_v58 = vld [vmem:[#allocation14 + $0x348] sm:$0xff] }
 0x9f4   : > { %2383 = vmatpush.msra.mxu3 %v2120_v62  ;;  %v2153_v62 = vld [vmem:[#allocation13 + $0x140] sm:$0xff] }
 0x9f5   : > { %2466 = vmatpush.msrb.mxu2 %v2153_v62  ;;  %v2876_v62 = vld [vmem:[#allocation14 + $0x700] sm:$0xff] }
 0x9f6   : > { %2384 = vmatpush.msra.mxu3 %v2118_v3  ;;  %v2152_v3 = vld [vmem:[#allocation13 + $0x138] sm:$0xff] }
 0x9f7   : > { %2467 = vmatpush.msrb.mxu2 %v2151_v2  ;;  %v2877_v2 = vld [vmem:[#allocation14 + $0x708] sm:$0xff] }
 0x9f8   : > { %2385 = vmatpush.msra.mxu3 %v2116_v6 }
 0x9f9   : > { %2468 = vmatpush.msrb.mxu2 %v2149_v4  ;;  %v2868_v4 = vld [vmem:[#allocation14 + $0x6c0] sm:$0xff] }
 0x9fa   : > { %2386 = vmatpush.msra.mxu3 %v2114_v9  ;;  %v2148_v9 = vld [vmem:[#allocation13 + $0x118] sm:$0xff] }
 0x9fb   : > { %v2235_v13 = vpop.f32.mrf.mxu3  ;;  %2469 = vmatpush.msrb.mxu2 %v2147_v7  ;;  %v2732_v7 = vld [vmem:[#allocation14 + $0x280] sm:$0xff] }
 0x9fc   : > { %4113 = vmatmul.msk.f32.vlgmr.msra.gmra.mxu2 %vm1197_vm0, %v2235_v13  ;;  %4114 = vmatmul.msk.f32.vlgmr.msra.gmra.mxu3 %vm1197_vm0, %v2235_v13  ;;  %v2145_v13 = vld [vmem:[#allocation13 + $0x100] sm:$0xff] }
 0x9fd   : > { %2483 = vmatpush.msrb.mxu3 %v2160_v56  ;;  %2470 = vmatpush.msrb.mxu2 %v2145_v13  ;;  %v2893_v56 = vld [vmem:[#allocation14 + $0x788] sm:$0xff] }
 0x9fe   : > { %v2853_v13 = vld [vmem:[#allocation14 + $0x648] sm:$0xff] }
 0x9ff   : > { %2484 = vmatpush.msrb.mxu3 %v2158_v48  ;;  %v2884_v48 = vld [vmem:[#allocation14 + $0x740] sm:$0xff] }
 0xa01   : > { %v2110_v21 = vpop.f32.mrf.mxu1  ;;  %2485 = vmatpush.msrb.mxu3 %v2156_v59  ;;  %v2885_v59 = vld [vmem:[#allocation14 + $0x748] sm:$0xff] }
 0xa03   : > { %2486 = vmatpush.msrb.mxu3 %v2154_v63  ;;  %v2749_v63 = vld [vmem:[#allocation14 + $0x308] sm:$0xff] }
 0xa05   : > { %2487 = vmatpush.msrb.mxu3 %v2152_v3  ;;  %v2740_v3 = vld [vmem:[#allocation14 + $0x2c0] sm:$0xff] }
 0xa07   : > { %2488 = vmatpush.msrb.mxu3 %v2150_v5  ;;  %v2741_v5 = vld [vmem:[#allocation14 + $0x2c8] sm:$0xff] }
 0xa09   : > { %2489 = vmatpush.msrb.mxu3 %v2148_v9  ;;  %v2733_v9 = vld [vmem:[#allocation14 + $0x288] sm:$0xff] }
 0xa0b   : > { %2490 = vmatpush.msrb.mxu3 %v2146_v14  ;;  %v2716_v14 = vld [vmem:[#allocation14 + $0x200] sm:$0xff] }
 0xa5d   : > { %v2090_v34 = vpop.f32.mrf.mxu0 }
 0xa5e   : > { %v2111_v33 = vadd.f32 %v2110_v21, %v2090_v34 }
 0xa60   : > { %2447 = vmatpush.msrb.mxu1 %v2111_v33 }
 0xa6e   : > { %v2302_v32 = vpop.f32.mrf.mxu3 }
 0xa6f   : > { %4111 = vmatmul.msk.f32.vlgmr.msra.gmra.mxu0 %vm1197_vm0, %v2302_v32  ;;  %4112 = vmatmul.msk.f32.vlgmr.msra.gmra.mxu1 %vm1197_vm0, %v2302_v32 }
 0xa70   : > { %4120 = vmatpush.xpose.msk.msra.mxu0 %vm1197_vm0, %v2500_v26  ;;  %v2162_v26 = vld [vmem:[#allocation13 + $0x188] sm:$0xff] }
 0xa77   : > { %4116 = vmatmul.msk.f32.vlgmr.msrb.gmra.mxu0 %vm1197_vm0, %v5197_v36 }
 0xa78   : > { %2575 = vmatpush.msrb.mxu0 %v2175_v15  ;;  %v2844_v15 = vld [vmem:[#allocation14 + $0x600] sm:$0xff] }
 0xa7a   : > { %2576 = vmatpush.msrb.mxu0 %v2173_v17  ;;  %v2845_v17 = vld [vmem:[#allocation14 + $0x608] sm:$0xff] }
 0xa7c   : > { %2577 = vmatpush.msrb.mxu0 %v2171_v19  ;;  %v2836_v19 = vld [vmem:[#allocation14 + $0x5c0] sm:$0xff] }
 0xa7e   : > { %2578 = vmatpush.msrb.mxu0 %v2169_v22  ;;  %v2837_v22 = vld [vmem:[#allocation14 + $0x5c8] sm:$0xff] }
 0xa7f   : > { %4121 = vmatmul.msk.f32.vlgmr.msra.gmra.mxu0 %vm1197_vm0, %v2498_v43  ;;  %v2368_v21 = vpop.f32.mrf.mxu2 }
 0xa80   : > { %2579 = vmatpush.msrb.mxu0 %v2167_v24  ;;  %v2828_v24 = vld [vmem:[#allocation14 + $0x580] sm:$0xff] }
 0xa82   : > { %2580 = vmatpush.msrb.mxu0 %v2165_v27  ;;  %v2829_v27 = vld [vmem:[#allocation14 + $0x588] sm:$0xff] }
 0xa84   : > { %2581 = vmatpush.msrb.mxu0 %v2163_v29  ;;  %v2820_v29 = vld [vmem:[#allocation14 + $0x540] sm:$0xff] }
 0xa86   : > { %2582 = vmatpush.msrb.mxu0 %v2161_v31  ;;  %v2821_v31 = vld [vmem:[#allocation14 + $0x548] sm:$0xff] }
 0xaec   : > { %v5225_v37 = vpop.f32.mrf.mxu0  ;;  %v2345_v32 = vpop.f32.mrf.mxu1 }
 0xaf4   : > { %v2414_v38 = vpop.f32.mrf.mxu0 }
 0xaf5   : > { %v2417_v40 = vmul.f32 0.125, %v2414_v38 }
 0xaf7   : > { %v2418_v0 = vsel %vm1225_vm1, %v2417_v40, -inf }
 0xaf8   : > { %2419 = vmax.xlane.f32.xlu0 %v2418_v0  ;;  %v2369_v0 = vadd.f32 %v2368_v21, %v5225_v37  ;;  %v2764_v37 = vld [vmem:[#allocation14 + $0x380] sm:$0xff] }
 0xaf9   : > { %v2676_v21 = vld [vmem:[#allocation14 + $0xc0] sm:$0xff] }
 0xafc   : > { %v2522_v1 = vpop.f32.mrf.mxu0 }
 0xafd   : > { %v2525_v44 = vmul.f32 0.125, %v2522_v1 }
 0xaff   : > { %v2526_v45 = vsel %vm1225_vm1, %v2525_v44, -inf }
 0xb00   : > { %2527 = vmax.xlane.f32.xlu2 %v2526_v45 }
 0xb6b   : > { %v2420_v36 = vpop.xlane.xlu0 %2419 }
 0xb6c   : > { %v2421_v46 = vsub.f32 %v2417_v40, %v2420_v36 }
 0xb6e   : > { %v2422_v47 = vmul.f32 1.442695, %v2421_v46 }
 0xb70   : > { %4313 = vpow2.f32 %v2422_v47 }
 0xb73   : > { %v2528_v49 = vpop.xlane.xlu2 %2527 }
 0xb74   : > { %v2529_v41 = vsub.f32 %v2525_v44, %v2528_v49 }
 0xb76   : > { %v4314_v50 = vpop.eup %4313  ;;  %v2530_v51 = vmul.f32 1.442695, %v2529_v41 }
 0xb77   : > { %v2424_v52 = vsel %vm1225_vm1, %v4314_v50, 0.0 }
 0xb78   : > { %4315 = vpow2.f32 %v2530_v51  ;;  %2425 = vadd.xlane.f32.xlu1 %v2424_v52  ;;  %v2900_v51 = vld [vmem:[#allocation14 + $0x7c0] sm:$0xff]  ;;  %v2773_v52 = vld [vmem:[#allocation14 + $0x3c8] sm:$0xff] }
 0xb79   : > { %2928 = vmatpush.msra.mxu3 %v2900_v51  ;;  %2948 = vmatpush.msra.mxu0 %v2773_v52  ;;  %v2660_v51 = vld [vmem:[#allocation14 + $0x40] sm:$0xff] }
 0xb7a   : > { %v2788_v52 = vld [vmem:[#allocation14 + $0x440] sm:$0xff] }
 0xb7b   : > { %2949 = vmatpush.msra.mxu0 %v2765_v55 }
 0xb7d   : > { %2950 = vmatpush.msra.mxu0 %v2757_v58  ;;  %v2774_v58 = vld [vmem:[#allocation14 + $0x3d0] sm:$0xff] }
 0xb7e   : > { %v4316_v53 = vpop.eup %4315 }
 0xb7f   : > { %v2532_v54 = vsel %vm1225_vm1, %v4316_v53, 0.0  ;;  %2951 = vmatpush.msra.mxu0 %v2749_v63  ;;  %v2766_v63 = vld [vmem:[#allocation14 + $0x390] sm:$0xff] }
 0xb80   : > { %2533 = vadd.xlane.f32.xlu0 %v2532_v54  ;;  %v2892_v54 = vld [vmem:[#allocation14 + $0x780] sm:$0xff] }
 0xb81   : > { %2929 = vmatpush.msra.mxu3 %v2892_v54  ;;  %2952 = vmatpush.msra.mxu0 %v2741_v5  ;;  %v2758_v5 = vld [vmem:[#allocation14 + $0x350] sm:$0xff] }
 0xb83   : > { %2930 = vmatpush.msra.mxu3 %v2884_v48  ;;  %2953 = vmatpush.msra.mxu0 %v2733_v9  ;;  %v2781_v48 = vld [vmem:[#allocation14 + $0x408] sm:$0xff]  ;;  %v2750_v9 = vld [vmem:[#allocation14 + $0x310] sm:$0xff] }
 0xb85   : > { %2931 = vmatpush.msra.mxu3 %v2876_v62  ;;  %v2903_v62 = vld [vmem:[#allocation14 + $0x7d8] sm:$0xff] }
 0xb87   : > { %2932 = vmatpush.msra.mxu3 %v2868_v4  ;;  %v2895_v4 = vld [vmem:[#allocation14 + $0x798] sm:$0xff] }
 0xb94   : > { %2538 = vrot.lane.b32.xlu0 %v2111_v33, %s4766_s17  ;;  %v2388_v33 = vpop.f32.mrf.mxu3  ;;  %s696_s17 = scalar_lea.vmem [#allocation20], %s5024_s7 }
 0xb95   : > { %v2389_v1 = vadd.f32 %v2388_v33, %v2345_v32  ;;  %v2812_v32 = vld [vmem:[#allocation14 + $0x500] sm:$0xff]  ;;  %s3873_s22 = sshll.u32 %s696_s17, 4  ;;  %s3874_s22 = int_to_ptr.vmem [resolvable:$true] %s3873_s22 }
 0xb96   : > { %v2804_v33 = vld [vmem:[#allocation14 + $0x4c0] sm:$0xff] }
 0xbeb   : > { %v2426_v60 = vpop.xlane.xlu1 %2425 }
 0xbec   : > { %4317 = vrcp.f32 %v2426_v60  ;;  %v2748_v60 = vld [vmem:[#allocation14 + $0x300] sm:$0xff] }
 0xbf2   : > { %v4318_v6 = vpop.eup %4317 }
 0xbf3   : > { %v2428_v8 = vmul.f32 %v4318_v6, %v4314_v50  ;;  %v2534_v10 = vpop.xlane.xlu0 %2533  ;;  %v2772_v50 = vld [vmem:[#allocation14 + $0x3c0] sm:$0xff]  ;;  %v2869_v6 = vld [vmem:[#allocation14 + $0x6c8] sm:$0xff] }
 0xbf4   : > { %4319 = vrcp.f32 %v2534_v10  ;;  %2908 = vmatpush.msra.mxu2 %v2772_v50  ;;  %v2861_v10 = vld [vmem:[#allocation14 + $0x688] sm:$0xff] }
 0xbf5   : > { %4117 = vmatmul.msk.f32.vlgmr.msrb.gmra.mxu1 %vm1225_vm1, %v2428_v8  ;;  %v2860_v8 = vld [vmem:[#allocation14 + $0x680] sm:$0xff] }
 0xbf6   : > { %2909 = vmatpush.msra.mxu2 %v2764_v37  ;;  %2933 = vmatpush.msra.mxu3 %v2860_v8  ;;  %v2789_v37 = vld [vmem:[#allocation14 + $0x448] sm:$0xff]  ;;  %v2887_v8 = vld [vmem:[#allocation14 + $0x758] sm:$0xff] }
 0xbf8   : > { %2910 = vmatpush.msra.mxu2 %v2756_v57 }
 0xbfa   : > { %v4320_v11 = vpop.eup %4319  ;;  %2911 = vmatpush.msra.mxu2 %v2748_v60  ;;  %v2775_v60 = vld [vmem:[#allocation14 + $0x3d8] sm:$0xff] }
 0xbfb   : > { %v2536_v42 = vmul.f32 %v4320_v11, %v4316_v53  ;;  %v2901_v53 = vld [vmem:[#allocation14 + $0x7c8] sm:$0xff]  ;;  %v2724_v11 = vld [vmem:[#allocation14 + $0x240] sm:$0xff] }
 0xbfc   : > { %2912 = vmatpush.msra.mxu2 %v2740_v3  ;;  %v2767_v3 = vld [vmem:[#allocation14 + $0x398] sm:$0xff] }
 0xbfe   : > { %2913 = vmatpush.msra.mxu2 %v2732_v7  ;;  %v2759_v7 = vld [vmem:[#allocation14 + $0x358] sm:$0xff] }
 0xc00   : > { %2914 = vmatpush.msra.mxu2 %v2724_v11  ;;  %v2751_v11 = vld [vmem:[#allocation14 + $0x318] sm:$0xff] }
 0xc02   : > { %2915 = vmatpush.msra.mxu2 %v2716_v14  ;;  %v2743_v14 = vld [vmem:[#allocation14 + $0x2d8] sm:$0xff] }
 0xc06   : > { %v2539_v12 = vpop.permute.xlu0 %2538 }
 0xc07   : > { %2559 = vmatpush.msra.mxu1 %v2539_v12  ;;  %v2725_v12 = vld [vmem:[#allocation14 + $0x248] sm:$0xff] }
 0xc08   : > { %4122 = vmatmul.msk.f32.vlgmr.msra.gmra.mxu1 %vm1225_vm1, %v2536_v42  ;;  %v2852_v42 = vld [vmem:[#allocation14 + $0x640] sm:$0xff]  ;;  %2954 = vmatpush.msra.mxu0 %v2725_v12  ;;  %v2742_v12 = vld [vmem:[#allocation14 + $0x2d0] sm:$0xff] }
 0xc09   : > { %2595 = vmatpush.msrb.mxu1 %v2176_v16  ;;  %2934 = vmatpush.msra.mxu3 %v2852_v42  ;;  %v2717_v16 = vld [vmem:[#allocation14 + $0x208] sm:$0xff]  ;;  %v2879_v42 = vld [vmem:[#allocation14 + $0x718] sm:$0xff] }
 0xc0a   : > { %2955 = vmatpush.msra.mxu0 %v2717_v16  ;;  %v2734_v16 = vld [vmem:[#allocation14 + $0x290] sm:$0xff] }
 0xc0b   : > { %2596 = vmatpush.msrb.mxu1 %v2174_v18  ;;  %v2708_v18 = vld [vmem:[#allocation14 + $0x1c0] sm:$0xff]  ;;  %2935 = vmatpush.msra.mxu3 %v2844_v15  ;;  %v2871_v15 = vld [vmem:[#allocation14 + $0x6d8] sm:$0xff] }
 0xc0c   : > { %2916 = vmatpush.msra.mxu2 %v2708_v18  ;;  %v2735_v18 = vld [vmem:[#allocation14 + $0x298] sm:$0xff] }
 0xc0d   : > { %2597 = vmatpush.msrb.mxu1 %v2172_v20  ;;  %v2709_v20 = vld [vmem:[#allocation14 + $0x1c8] sm:$0xff]  ;;  %2936 = vmatpush.msra.mxu3 %v2836_v19  ;;  %v2863_v19 = vld [vmem:[#allocation14 + $0x698] sm:$0xff] }
 0xc0e   : > { %2956 = vmatpush.msra.mxu0 %v2709_v20  ;;  %v2726_v20 = vld [vmem:[#allocation14 + $0x250] sm:$0xff] }
 0xc0f   : > { %2598 = vmatpush.msrb.mxu1 %v2170_v23  ;;  %v2700_v23 = vld [vmem:[#allocation14 + $0x180] sm:$0xff]  ;;  %2937 = vmatpush.msra.mxu3 %v2828_v24  ;;  %v2855_v24 = vld [vmem:[#allocation14 + $0x658] sm:$0xff] }
 0xc10   : > { %2917 = vmatpush.msra.mxu2 %v2700_v23  ;;  %v2727_v23 = vld [vmem:[#allocation14 + $0x258] sm:$0xff] }
 0xc11   : > { %2599 = vmatpush.msrb.mxu1 %v2168_v25  ;;  %v2701_v25 = vld [vmem:[#allocation14 + $0x188] sm:$0xff]  ;;  %2938 = vmatpush.msra.mxu3 %v2820_v29  ;;  %v2847_v29 = vld [vmem:[#allocation14 + $0x618] sm:$0xff] }
 0xc12   : > { %2957 = vmatpush.msra.mxu0 %v2701_v25  ;;  %v2718_v25 = vld [vmem:[#allocation14 + $0x210] sm:$0xff] }
 0xc13   : > { %2600 = vmatpush.msrb.mxu1 %v2166_v28  ;;  %v2692_v28 = vld [vmem:[#allocation14 + $0x140] sm:$0xff]  ;;  %2939 = vmatpush.msra.mxu3 %v2812_v32  ;;  %v2839_v32 = vld [vmem:[#allocation14 + $0x5d8] sm:$0xff] }
 0xc14   : > { %2918 = vmatpush.msra.mxu2 %v2692_v28  ;;  %v2719_v28 = vld [vmem:[#allocation14 + $0x218] sm:$0xff] }
 0xc15   : > { %2601 = vmatpush.msrb.mxu1 %v2164_v30  ;;  %v2693_v30 = vld [vmem:[#allocation14 + $0x148] sm:$0xff]  ;;  %2940 = vmatpush.msra.mxu3 %v2804_v33  ;;  %v2831_v33 = vld [vmem:[#allocation14 + $0x598] sm:$0xff] }
 0xc16   : > { %2958 = vmatpush.msra.mxu0 %v2693_v30  ;;  %v2710_v30 = vld [vmem:[#allocation14 + $0x1d0] sm:$0xff] }
 0xc17   : > { %2602 = vmatpush.msrb.mxu1 %v2162_v26  ;;  %v2684_v26 = vld [vmem:[#allocation14 + $0x100] sm:$0xff] }
 0xc18   : > { %2919 = vmatpush.msra.mxu2 %v2684_v26  ;;  %v2711_v26 = vld [vmem:[#allocation14 + $0x1d8] sm:$0xff] }
 0xc19   : > { %2968 = vmatpush.msra.mxu1 %v2901_v53  ;;  %v2661_v53 = vld [vmem:[#allocation14 + $0x48] sm:$0xff] }
 0xc1a   : > { %2920 = vmatpush.msra.mxu2 %v2676_v21  ;;  %v2703_v21 = vld [vmem:[#allocation14 + $0x198] sm:$0xff] }
 0xc1b   : > { %2969 = vmatpush.msra.mxu1 %v2893_v56  ;;  %v2780_v56 = vld [vmem:[#allocation14 + $0x400] sm:$0xff] }
 0xc1d   : > { %2970 = vmatpush.msra.mxu1 %v2885_v59  ;;  %v2902_v59 = vld [vmem:[#allocation14 + $0x7d0] sm:$0xff] }
 0xc1f   : > { %2971 = vmatpush.msra.mxu1 %v2877_v2  ;;  %v2894_v2 = vld [vmem:[#allocation14 + $0x790] sm:$0xff] }
 0xc21   : > { %2972 = vmatpush.msra.mxu1 %v2869_v6  ;;  %v2886_v6 = vld [vmem:[#allocation14 + $0x750] sm:$0xff] }
 0xc23   : > { %2973 = vmatpush.msra.mxu1 %v2861_v10  ;;  %v2878_v10 = vld [vmem:[#allocation14 + $0x710] sm:$0xff] }
 0xc25   : > { %2974 = vmatpush.msra.mxu1 %v2853_v13  ;;  %v2870_v13 = vld [vmem:[#allocation14 + $0x6d0] sm:$0xff] }
 0xc27   : > { %2975 = vmatpush.msra.mxu1 %v2845_v17  ;;  %v2862_v17 = vld [vmem:[#allocation14 + $0x690] sm:$0xff] }
 0xc29   : > { %2976 = vmatpush.msra.mxu1 %v2837_v22  ;;  %v2854_v22 = vld [vmem:[#allocation14 + $0x650] sm:$0xff] }
 0xc2b   : > { %2977 = vmatpush.msra.mxu1 %v2829_v27  ;;  %v2846_v27 = vld [vmem:[#allocation14 + $0x610] sm:$0xff] }
 0xc2d   : > { %2978 = vmatpush.msra.mxu1 %v2821_v31  ;;  %v2838_v31 = vld [vmem:[#allocation14 + $0x5d0] sm:$0xff] }
 0xc72   : > { %v2449_v43 = vpop.f32.mrf.mxu1 }
 0xc73   : > { %4118 = vmatmul.msk.f32.vlgmr.msrb.gmra.mxu2 %vm1197_vm0, %v2449_v43  ;;  %4119 = vmatmul.msk.f32.vlgmr.msrb.gmra.mxu3 %vm1197_vm0, %v2449_v43  ;;  %v2685_v43 = vld [vmem:[#allocation14 + $0x108] sm:$0xff] }
 0xc74   : > { %2959 = vmatpush.msra.mxu0 %v2685_v43  ;;  %v2702_v43 = vld [vmem:[#allocation14 + $0x190] sm:$0xff] }
 0xc85   : > { %v2561_v34 = vpop.f32.mrf.mxu1 }
 0xc86   : > { %4123 = vmatmul.msk.f32.vlgmr.msrb.gmra.mxu0 %vm1197_vm0, %v2561_v34  ;;  %4124 = vmatmul.msk.f32.vlgmr.msrb.gmra.mxu1 %vm1197_vm0, %v2561_v34  ;;  %v2813_v34 = vld [vmem:[#allocation14 + $0x508] sm:$0xff] }
 0xc87   : > { %2979 = vmatpush.msra.mxu1 %v2813_v34  ;;  %v2830_v34 = vld [vmem:[#allocation14 + $0x590] sm:$0xff] }
 0xcf6   : > { %v2472_v38 = vpop.f32.mrf.mxu2  ;;  %v2492_v40 = vpop.f32.mrf.mxu3 }
 0xcf7   : > { %v2495_v44 = vadd.f32 %v2472_v38, %v2369_v0  ;;  %v2496_v45 = vadd.f32 %v2492_v40, %v2389_v1  ;;  %v2677_v40 = vld [vmem:[#allocation14 + $0xc8] sm:$0xff] }
 0xcf8   : > { %v2805_v0 = vld [vmem:[#allocation14 + $0x4c8] sm:$0xff]  ;;  %2960 = vmatpush.msra.mxu0 %v2677_v40  ;;  %v2822_v40 = vld [vmem:[#allocation14 + $0x550] sm:$0xff] }
 0xcf9   : > { %2980 = vmatpush.msra.mxu1 %v2805_v0  ;;  %v2695_v0 = vld [vmem:[#allocation14 + $0x158] sm:$0xff] }
 0xd03   : > { %v2584_v36 = vpop.f32.mrf.mxu0  ;;  %v2604_v46 = vpop.f32.mrf.mxu1 }
 0xd04   : > { %v5239_v47 = vadd.f32 %v2584_v36, %v2495_v44  ;;  %v5241_v49 = vadd.f32 %v2604_v46, %v2496_v45  ;;  %v2668_v44 = vld [vmem:[#allocation14 + $0x80] sm:$0xff]  ;;  %v2669_v36 = vld [vmem:[#allocation14 + $0x88] sm:$0xff] }
 0xd05   : > { %v2796_v45 = vld [vmem:[#allocation14 + $0x480] sm:$0xff]  ;;  %v2797_v46 = vld [vmem:[#allocation14 + $0x488] sm:$0xff]  ;;  %2921 = vmatpush.msra.mxu2 %v2668_v44  ;;  %2961 = vmatpush.msra.mxu0 %v2669_v36  ;;  %v2686_v44 = vld [vmem:[#allocation14 + $0x110] sm:$0xff] }
 0xd06   : > { %v2611_v41 = vadd.f32 %v5241_v49, %v5239_v47  ;;  %2941 = vmatpush.msra.mxu3 %v2796_v45  ;;  %2981 = vmatpush.msra.mxu1 %v2797_v46  ;;  %v2814_v45 = vld [vmem:[#allocation14 + $0x510] sm:$0xff]  ;;  %v2687_v36 = vld [vmem:[#allocation14 + $0x118] sm:$0xff] }
 0xd07   : > { %2922 = vmatpush.msra.mxu2 %v2660_v51  ;;  %2962 = vmatpush.msra.mxu0 %v2661_v53  ;;  %v2815_v46 = vld [vmem:[#allocation14 + $0x518] sm:$0xff]  ;;  %v2678_v51 = vld [vmem:[#allocation14 + $0xd0] sm:$0xff] }
 0xd08   : > { %2612 = vadd.xlane.f32.xlu2 %v2611_v41  ;;  %2942 = vmatpush.msra.mxu3 %v2788_v52  ;;  %v2806_v52 = vld [vmem:[#allocation14 + $0x4d0] sm:$0xff]  ;;  %v2679_v53 = vld [vmem:[#allocation14 + $0xd8] sm:$0xff] }
 0xd09   : > { %2982 = vmatpush.msra.mxu1 %v2789_v37  ;;  %v2807_v37 = vld [vmem:[#allocation14 + $0x4d8] sm:$0xff] }
 0xd0a   : > { %2943 = vmatpush.msra.mxu3 %v2780_v56  ;;  %v2799_v56 = vld [vmem:[#allocation14 + $0x498] sm:$0xff] }
 0xd0b   : > { %2983 = vmatpush.msra.mxu1 %v2781_v48  ;;  %v2663_v48 = vld [vmem:[#allocation14 + $0x58] sm:$0xff] }
 0xd0c   : > { %3008 = vmatpush.msrb.mxu3 %v2902_v59  ;;  %v2654_v59 = vld [vmem:[#allocation14 + $0x10] sm:$0xff] }
 0xd0d   : > { %3048 = vmatpush.msrb.mxu1 %v2903_v62  ;;  %v2655_v62 = vld [vmem:[#allocation14 + $0x18] sm:$0xff] }
 0xd0e   : > { %3009 = vmatpush.msrb.mxu3 %v2894_v2 }
 0xd0f   : > { %3049 = vmatpush.msrb.mxu1 %v2895_v4 }
 0xd10   : > { %3010 = vmatpush.msrb.mxu3 %v2886_v6 }
 0xd11   : > { %3050 = vmatpush.msrb.mxu1 %v2887_v8 }
 0xd12   : > { %3011 = vmatpush.msrb.mxu3 %v2878_v10 }
 0xd13   : > { %3051 = vmatpush.msrb.mxu1 %v2879_v42 }
 0xd14   : > { %3012 = vmatpush.msrb.mxu3 %v2870_v13 }
 0xd15   : > { %3052 = vmatpush.msrb.mxu1 %v2871_v15 }
 0xd16   : > { %3013 = vmatpush.msrb.mxu3 %v2862_v17 }
 0xd17   : > { %3053 = vmatpush.msrb.mxu1 %v2863_v19 }
 0xd18   : > { %3014 = vmatpush.msrb.mxu3 %v2854_v22 }
 0xd19   : > { %3054 = vmatpush.msrb.mxu1 %v2855_v24 }
 0xd1a   : > { %3015 = vmatpush.msrb.mxu3 %v2846_v27  ;;  %v2776_v27 = vld [vmem:[#allocation14 + $0x3e0] sm:$0xff] }
 0xd1b   : > { %3055 = vmatpush.msrb.mxu1 %v2847_v29  ;;  %v2777_v29 = vld [vmem:[#allocation14 + $0x3e8] sm:$0xff] }
 0xd1c   : > { %3016 = vmatpush.msrb.mxu3 %v2838_v31  ;;  %v2897_v31 = vld [vmem:[#allocation14 + $0x7a8] sm:$0xff] }
 0xd1d   : > { %3056 = vmatpush.msrb.mxu1 %v2839_v32  ;;  %v2761_v32 = vld [vmem:[#allocation14 + $0x368] sm:$0xff] }
 0xd1e   : > { %3017 = vmatpush.msrb.mxu3 %v2830_v34  ;;  %v2752_v34 = vld [vmem:[#allocation14 + $0x320] sm:$0xff] }
 0xd1f   : > { %3057 = vmatpush.msrb.mxu1 %v2831_v33  ;;  %v2753_v33 = vld [vmem:[#allocation14 + $0x328] sm:$0xff] }
 0xd20   : > { %3018 = vmatpush.msrb.mxu3 %v2822_v40  ;;  %v2744_v40 = vld [vmem:[#allocation14 + $0x2e0] sm:$0xff] }
 0xd22   : > { %3019 = vmatpush.msrb.mxu3 %v2814_v45  ;;  %v2736_v45 = vld [vmem:[#allocation14 + $0x2a0] sm:$0xff] }
 0xd24   : > { %3020 = vmatpush.msrb.mxu3 %v2806_v52  ;;  %v2728_v52 = vld [vmem:[#allocation14 + $0x260] sm:$0xff] }
 0xd7b   : > { %v2613_v38 = vpop.xlane.xlu2 %2612 }
 0xd7c   : > { %v2614_v1 = vmul.f32 %v2613_v38, %v5138_v61  ;;  %v2694_v38 = vld [vmem:[#allocation14 + $0x150] sm:$0xff] }
 0xd7e   : > { %v5247_v41 = vsub.f32 %v5239_v47, %v2614_v1  ;;  %v5250_v50 = vsub.f32 %v5241_v49, %v2614_v1  ;;  %v2652_v47 = vld [vmem:[#allocation14] sm:$0xff]  ;;  %v2653_v49 = vld [vmem:[#allocation14 + $0x8] sm:$0xff]  ;;  %v2823_v1 = vld [vmem:[#allocation14 + $0x558] sm:$0xff] }
 0xd7f   : > { %2923 = vmatpush.msra.mxu2 %v2652_v47  ;;  %2963 = vmatpush.msra.mxu0 %v2653_v49  ;;  %v2671_v47 = vld [vmem:[#allocation14 + $0x98] sm:$0xff]  ;;  %v2662_v49 = vld [vmem:[#allocation14 + $0x50] sm:$0xff] }
 0xd80   : > { %v2617_v54 = vmul.f32 %v5247_v41, %v5247_v41  ;;  %v2618_v55 = vmul.f32 %v5250_v50, %v5250_v50  ;;  %3058 = vmatpush.msrb.mxu1 %v2823_v1  ;;  %v2745_v1 = vld [vmem:[#allocation14 + $0x2e8] sm:$0xff] }
 0xd81   : > { %2988 = vmatpush.msrb.mxu2 %v2774_v58  ;;  %3028 = vmatpush.msrb.mxu0 %v2775_v60  ;;  %v2791_v58 = vld [vmem:[#allocation14 + $0x458] sm:$0xff]  ;;  %v2782_v60 = vld [vmem:[#allocation14 + $0x410] sm:$0xff] }
 0xd82   : > { %v2619_v57 = vadd.f32 %v2618_v55, %v2617_v54  ;;  %3059 = vmatpush.msrb.mxu1 %v2815_v46  ;;  %v2670_v54 = vld [vmem:[#allocation14 + $0x90] sm:$0xff]  ;;  %v2737_v46 = vld [vmem:[#allocation14 + $0x2a8] sm:$0xff] }
 0xd83   : > { %2989 = vmatpush.msrb.mxu2 %v2766_v63  ;;  %3029 = vmatpush.msrb.mxu0 %v2767_v3  ;;  %v2798_v55 = vld [vmem:[#allocation14 + $0x490] sm:$0xff]  ;;  %v2783_v63 = vld [vmem:[#allocation14 + $0x418] sm:$0xff] }
 0xd84   : > { %2620 = vadd.xlane.f32.xlu1 %v2619_v57  ;;  %3060 = vmatpush.msrb.mxu1 %v2807_v37  ;;  %v2790_v57 = vld [vmem:[#allocation14 + $0x450] sm:$0xff]  ;;  %v2729_v37 = vld [vmem:[#allocation14 + $0x268] sm:$0xff] }
 0xd85   : > { %2990 = vmatpush.msrb.mxu2 %v2758_v5  ;;  %3030 = vmatpush.msrb.mxu0 %v2759_v7 }
 0xd86   : > { %3021 = vmatpush.msrb.mxu3 %v2798_v55  ;;  %3061 = vmatpush.msrb.mxu1 %v2799_v56  ;;  %v2720_v55 = vld [vmem:[#allocation14 + $0x220] sm:$0xff]  ;;  %v2721_v56 = vld [vmem:[#allocation14 + $0x228] sm:$0xff] }
 0xd87   : > { %2991 = vmatpush.msrb.mxu2 %v2750_v9  ;;  %3031 = vmatpush.msrb.mxu0 %v2751_v11  ;;  %v2609_v9 = vld [vmem:[%s5436_s28] sm:$0x3] }
 0xd88   : > { %3022 = vmatpush.msrb.mxu3 %v2790_v57  ;;  %3062 = vmatpush.msrb.mxu1 %v2791_v58  ;;  %v2610_v11 = vld [vmem:[#allocation17] sm:$0x3]  ;;  %v2638_v13 = vperm.slane %v2609_v9, 1  ;;  %v2713_v58 = vld [vmem:[#allocation14 + $0x1e8] sm:$0xff] }
 0xd89   : > { %2992 = vmatpush.msrb.mxu2 %v2742_v12  ;;  %3032 = vmatpush.msrb.mxu0 %v2743_v14  ;;  %v2637_v12 = vperm.slane %v2609_v9, 0  ;;  %v2644_v15 = vperm.slane %v2610_v11, 0  ;;  %v2712_v57 = vld [vmem:[#allocation14 + $0x1e0] sm:$0xff]  ;;  %v2689_v9 = vld [vmem:[#allocation14 + $0x128] sm:$0xff] }
 0xd8a   : > { %3023 = vmatpush.msrb.mxu3 %v2782_v60  ;;  %3063 = vmatpush.msrb.mxu1 %v2783_v63  ;;  %v2704_v60 = vld [vmem:[#allocation14 + $0x1a0] sm:$0xff]  ;;  %v2705_v63 = vld [vmem:[#allocation14 + $0x1a8] sm:$0xff] }
 0xd8b   : > { %2993 = vmatpush.msrb.mxu2 %v2734_v16  ;;  %3033 = vmatpush.msrb.mxu0 %v2735_v18  ;;  %v2645_v16 = vperm.slane %v2610_v11, 1  ;;  %v2680_v11 = vld [vmem:[#allocation14 + $0xe0] sm:$0xff] }
 0xd8d   : > { %2994 = vmatpush.msrb.mxu2 %v2726_v20  ;;  %3034 = vmatpush.msrb.mxu0 %v2727_v23 }
 0xd8f   : > { %2995 = vmatpush.msrb.mxu2 %v2718_v25  ;;  %3035 = vmatpush.msrb.mxu0 %v2719_v28  ;;  %v2904_v28 = vld [vmem:[#allocation14 + $0x7e0] sm:$0xff] }
 0xd91   : > { %2996 = vmatpush.msrb.mxu2 %v2710_v30  ;;  %3036 = vmatpush.msrb.mxu0 %v2711_v26  ;;  %v2896_v30 = vld [vmem:[#allocation14 + $0x7a0] sm:$0xff] }
 0xd92   : > { %v2888_v26 = vld [vmem:[#allocation14 + $0x760] sm:$0xff] }
 0xd93   : > { %2997 = vmatpush.msrb.mxu2 %v2702_v43  ;;  %3037 = vmatpush.msrb.mxu0 %v2703_v21  ;;  %v2889_v43 = vld [vmem:[#allocation14 + $0x768] sm:$0xff]  ;;  %v2880_v21 = vld [vmem:[#allocation14 + $0x720] sm:$0xff] }
 0xd95   : > { %2998 = vmatpush.msrb.mxu2 %v2694_v38  ;;  %3038 = vmatpush.msrb.mxu0 %v2695_v0  ;;  %v2881_v38 = vld [vmem:[#allocation14 + $0x728] sm:$0xff]  ;;  %v2872_v0 = vld [vmem:[#allocation14 + $0x6e0] sm:$0xff] }
 0xd97   : > { %2999 = vmatpush.msrb.mxu2 %v2686_v44  ;;  %3039 = vmatpush.msrb.mxu0 %v2687_v36  ;;  %v2873_v44 = vld [vmem:[#allocation14 + $0x6e8] sm:$0xff]  ;;  %v2864_v36 = vld [vmem:[#allocation14 + $0x6a0] sm:$0xff] }
 0xd99   : > { %3000 = vmatpush.msrb.mxu2 %v2678_v51  ;;  %3040 = vmatpush.msrb.mxu0 %v2679_v53  ;;  %v2865_v51 = vld [vmem:[#allocation14 + $0x6a8] sm:$0xff]  ;;  %v2856_v53 = vld [vmem:[#allocation14 + $0x660] sm:$0xff] }
 0xd9b   : > { %3001 = vmatpush.msrb.mxu2 %v2670_v54  ;;  %3041 = vmatpush.msrb.mxu0 %v2671_v47  ;;  %v2857_v54 = vld [vmem:[#allocation14 + $0x668] sm:$0xff]  ;;  %v2848_v47 = vld [vmem:[#allocation14 + $0x620] sm:$0xff] }
 0xd9d   : > { %3002 = vmatpush.msrb.mxu2 %v2662_v49  ;;  %3042 = vmatpush.msrb.mxu0 %v2663_v48  ;;  %v2849_v49 = vld [vmem:[#allocation14 + $0x628] sm:$0xff]  ;;  %v2840_v48 = vld [vmem:[#allocation14 + $0x5e0] sm:$0xff] }
 0xd9f   : > { %3003 = vmatpush.msrb.mxu2 %v2654_v59  ;;  %3043 = vmatpush.msrb.mxu0 %v2655_v62  ;;  %v2841_v59 = vld [vmem:[#allocation14 + $0x5e8] sm:$0xff]  ;;  %v2832_v62 = vld [vmem:[#allocation14 + $0x5a0] sm:$0xff] }
 0xdf7   : > { %v2621_v2 = vpop.xlane.xlu1 %2620 }
 0xdf8   : > { %v2622_v3 = vmul.f32 %v2621_v2, %v5138_v61  ;;  %v2833_v2 = vld [vmem:[#allocation14 + $0x5a8] sm:$0xff] }
 0xdfa   : > { %v2623_v4 = vadd.f32 1e-05, %v2622_v3  ;;  %v2696_v3 = vld [vmem:[#allocation14 + $0x160] sm:$0xff] }
 0xdfc   : > { %4321 = vrsqrt.f32 %v2623_v4  ;;  %vm2630_vm7 = vweird.f32 %v2623_v4 }
 0xe02   : > { %v4322_v5 = vpop.eup %4321 }
 0xe03   : > { %v2625_v6 = vmul.f32 %v4322_v5, %v2623_v4  ;;  %vm2631_vm6 = vweird.f32 %v4322_v5  ;;  %v2824_v4 = vld [vmem:[#allocation14 + $0x560] sm:$0xff] }
 0xe04   : > { %vm2632_vm8 = vmor %vm2630_vm7, %vm2631_vm6 }
 0xe05   : > { %v2626_v7 = vmul.f32 %v4322_v5, %v2625_v6  ;;  %v2825_v6 = vld [vmem:[#allocation14 + $0x568] sm:$0xff] }
 0xe07   : > { %v2627_v8 = vmul.f32 0.5, %v2626_v7  ;;  %v2688_v7 = vld [vmem:[#allocation14 + $0x120] sm:$0xff] }
 0xe09   : > { %v2628_v10 = vsub.f32 1.5, %v2627_v8  ;;  %v2816_v8 = vld [vmem:[#allocation14 + $0x520] sm:$0xff] }
 0xe0b   : > { %v2629_v42 = vmul.f32 %v4322_v5, %v2628_v10  ;;  %v2817_v10 = vld [vmem:[#allocation14 + $0x528] sm:$0xff] }
 0xe0d   : > { %v2633_v14 = vsel %vm2632_vm8, %v4322_v5, %v2629_v42  ;;  %v2697_v5 = vld [vmem:[#allocation14 + $0x168] sm:$0xff]  ;;  %v2808_v42 = vld [vmem:[#allocation14 + $0x4e0] sm:$0xff] }
 0xe0e   : > { %v2634_v17 = vmul.f32 %v2633_v14, %v5247_v41  ;;  %v2635_v18 = vmul.f32 %v2633_v14, %v5250_v50  ;;  %v2905_v41 = vld [vmem:[#allocation14 + $0x7e8] sm:$0xff]  ;;  %v2768_v50 = vld [vmem:[#allocation14 + $0x3a0] sm:$0xff] }
 0xe0f   : > { %v2672_v14 = vld [vmem:[#allocation14 + $0xa0] sm:$0xff] }
 0xe10   : > { %v2641_v19 = vmul.f32 %v2637_v12, %v2634_v17  ;;  %v2642_v20 = vmul.f32 %v2638_v13, %v2635_v18  ;;  %v2681_v12 = vld [vmem:[#allocation14 + $0xe8] sm:$0xff]  ;;  %v2664_v18 = vld [vmem:[#allocation14 + $0x60] sm:$0xff] }
 0xe11   : > { %v2809_v13 = vld [vmem:[#allocation14 + $0x4e8] sm:$0xff] }
 0xe12   : > { %v2648_v22 = vadd.f32 %v2644_v15, %v2641_v19  ;;  %v2649_v23 = vadd.f32 %v2645_v16, %v2642_v20  ;;  %v2800_v15 = vld [vmem:[#allocation14 + $0x4a0] sm:$0xff]  ;;  %v2673_v16 = vld [vmem:[#allocation14 + $0xa8] sm:$0xff] }
 0xe13   : > { %v2801_v17 = vld [vmem:[#allocation14 + $0x4a8] sm:$0xff]  ;;  %v2792_v19 = vld [vmem:[#allocation14 + $0x460] sm:$0xff] }
 0xe14   : > { %v5263_v24 = vadd.f32 %v2648_v22, %v5161_v35  ;;  %v5266_v25 = vadd.f32 %v2649_v23, %v5164_v39  ;;  %v2769_v35 = vld [vmem:[#allocation14 + $0x3a8] sm:$0xff]  ;;  %v2760_v39 = vld [vmem:[#allocation14 + $0x360] sm:$0xff] }
 0xe15   : > { %v2665_v20 = vld [vmem:[#allocation14 + $0x68] sm:$0xff]  ;;  %v2656_v23 = vld [vmem:[#allocation14 + $0x20] sm:$0xff] }
 0xe16   : > { %2924 = vmatmul.f32.vlgmr.msra.gmra.mxu2 %v5263_v24  ;;  %2944 = vmatmul.f32.vlgmr.msra.gmra.mxu3 %v5266_v25  ;;  %v2793_v22 = vld [vmem:[#allocation14 + $0x468] sm:$0xff] }
 0xe17   : > { %2964 = vmatmul.f32.vlgmr.msra.gmra.mxu0 %v5263_v24  ;;  %2984 = vmatmul.f32.vlgmr.msra.gmra.mxu1 %v5266_v25 }
 0xe18   : > { %3068 = vmatpush.msra.mxu2 %v2776_v27  ;;  %3088 = vmatpush.msra.mxu3 %v2904_v28  ;;  %v2784_v27 = vld [vmem:[#allocation14 + $0x420] sm:$0xff]  ;;  %v2657_v28 = vld [vmem:[#allocation14 + $0x28] sm:$0xff] }
 0xe19   : > { %3108 = vmatpush.msra.mxu0 %v2777_v29  ;;  %3128 = vmatpush.msra.mxu1 %v2905_v41  ;;  %v2785_v29 = vld [vmem:[#allocation14 + $0x428] sm:$0xff]  ;;  %v2778_v41 = vld [vmem:[#allocation14 + $0x3f0] sm:$0xff] }
 0xe1a   : > { %3069 = vmatpush.msra.mxu2 %v2768_v50  ;;  %3089 = vmatpush.msra.mxu3 %v2896_v30  ;;  %v2906_v50 = vld [vmem:[#allocation14 + $0x7f0] sm:$0xff]  ;;  %v2779_v30 = vld [vmem:[#allocation14 + $0x3f8] sm:$0xff] }
 0xe1b   : > { %3109 = vmatpush.msra.mxu0 %v2769_v35  ;;  %3129 = vmatpush.msra.mxu1 %v2897_v31  ;;  %v2907_v35 = vld [vmem:[#allocation14 + $0x7f8] sm:$0xff]  ;;  %v2770_v31 = vld [vmem:[#allocation14 + $0x3b0] sm:$0xff] }
 0xe1c   : > { %3070 = vmatpush.msra.mxu2 %v2760_v39  ;;  %3090 = vmatpush.msra.mxu3 %v2888_v26  ;;  %v2898_v39 = vld [vmem:[#allocation14 + $0x7b0] sm:$0xff]  ;;  %v2771_v26 = vld [vmem:[#allocation14 + $0x3b8] sm:$0xff] }
 0xe1d   : > { %3110 = vmatpush.msra.mxu0 %v2761_v32  ;;  %3130 = vmatpush.msra.mxu1 %v2889_v43  ;;  %v2899_v32 = vld [vmem:[#allocation14 + $0x7b8] sm:$0xff]  ;;  %v2762_v43 = vld [vmem:[#allocation14 + $0x370] sm:$0xff] }
 0xe1e   : > { %3071 = vmatpush.msra.mxu2 %v2752_v34  ;;  %3091 = vmatpush.msra.mxu3 %v2880_v21  ;;  %v2890_v34 = vld [vmem:[#allocation14 + $0x770] sm:$0xff]  ;;  %v2763_v21 = vld [vmem:[#allocation14 + $0x378] sm:$0xff] }
 0xe1f   : > { %3111 = vmatpush.msra.mxu0 %v2753_v33  ;;  %3131 = vmatpush.msra.mxu1 %v2881_v38  ;;  %v2891_v33 = vld [vmem:[#allocation14 + $0x778] sm:$0xff]  ;;  %v2754_v38 = vld [vmem:[#allocation14 + $0x330] sm:$0xff] }
 0xe20   : > { %3004 = vmatmul.f32.vlgmr.msrb.gmra.mxu2 %v5263_v24  ;;  %3024 = vmatmul.f32.vlgmr.msrb.gmra.mxu3 %v5266_v25 }
 0xe21   : > { %3044 = vmatmul.f32.vlgmr.msrb.gmra.mxu0 %v5263_v24  ;;  %3064 = vmatmul.f32.vlgmr.msrb.gmra.mxu1 %v5266_v25 }
 0xe22   : > { %3072 = vmatpush.msra.mxu2 %v2744_v40  ;;  %3092 = vmatpush.msra.mxu3 %v2872_v0  ;;  %v2882_v40 = vld [vmem:[#allocation14 + $0x730] sm:$0xff]  ;;  %v2755_v0 = vld [vmem:[#allocation14 + $0x338] sm:$0xff] }
 0xe23   : > { %3112 = vmatpush.msra.mxu0 %v2745_v1  ;;  %3132 = vmatpush.msra.mxu1 %v2873_v44  ;;  %v2883_v1 = vld [vmem:[#allocation14 + $0x738] sm:$0xff]  ;;  %v2746_v44 = vld [vmem:[#allocation14 + $0x2f0] sm:$0xff] }
 0xe24   : > { %3073 = vmatpush.msra.mxu2 %v2736_v45  ;;  %3093 = vmatpush.msra.mxu3 %v2864_v36  ;;  %v2874_v45 = vld [vmem:[#allocation14 + $0x6f0] sm:$0xff]  ;;  %v2747_v36 = vld [vmem:[#allocation14 + $0x2f8] sm:$0xff] }
 0xe25   : > { %3113 = vmatpush.msra.mxu0 %v2737_v46  ;;  %3133 = vmatpush.msra.mxu1 %v2865_v51  ;;  %v2875_v46 = vld [vmem:[#allocation14 + $0x6f8] sm:$0xff]  ;;  %v2738_v51 = vld [vmem:[#allocation14 + $0x2b0] sm:$0xff] }
 0xe26   : > { %3074 = vmatpush.msra.mxu2 %v2728_v52  ;;  %3094 = vmatpush.msra.mxu3 %v2856_v53  ;;  %v2866_v52 = vld [vmem:[#allocation14 + $0x6b0] sm:$0xff]  ;;  %v2739_v53 = vld [vmem:[#allocation14 + $0x2b8] sm:$0xff] }
 0xe27   : > { %3114 = vmatpush.msra.mxu0 %v2729_v37  ;;  %3134 = vmatpush.msra.mxu1 %v2857_v54  ;;  %v2867_v37 = vld [vmem:[#allocation14 + $0x6b8] sm:$0xff]  ;;  %v2730_v54 = vld [vmem:[#allocation14 + $0x270] sm:$0xff] }
 0xe28   : > { %3075 = vmatpush.msra.mxu2 %v2720_v55  ;;  %3095 = vmatpush.msra.mxu3 %v2848_v47  ;;  %v2858_v55 = vld [vmem:[#allocation14 + $0x670] sm:$0xff]  ;;  %v2731_v47 = vld [vmem:[#allocation14 + $0x278] sm:$0xff] }
 0xe29   : > { %3115 = vmatpush.msra.mxu0 %v2721_v56  ;;  %3135 = vmatpush.msra.mxu1 %v2849_v49  ;;  %v2859_v56 = vld [vmem:[#allocation14 + $0x678] sm:$0xff]  ;;  %v2722_v49 = vld [vmem:[#allocation14 + $0x230] sm:$0xff] }
 0xe2a   : > { %3076 = vmatpush.msra.mxu2 %v2712_v57  ;;  %3096 = vmatpush.msra.mxu3 %v2840_v48  ;;  %v2850_v57 = vld [vmem:[#allocation14 + $0x630] sm:$0xff]  ;;  %v2723_v48 = vld [vmem:[#allocation14 + $0x238] sm:$0xff] }
 0xe2b   : > { %3116 = vmatpush.msra.mxu0 %v2713_v58  ;;  %3136 = vmatpush.msra.mxu1 %v2841_v59  ;;  %v2851_v58 = vld [vmem:[#allocation14 + $0x638] sm:$0xff]  ;;  %v2714_v59 = vld [vmem:[#allocation14 + $0x1f0] sm:$0xff] }
 0xe2c   : > { %3077 = vmatpush.msra.mxu2 %v2704_v60  ;;  %3097 = vmatpush.msra.mxu3 %v2832_v62  ;;  %v2842_v60 = vld [vmem:[#allocation14 + $0x5f0] sm:$0xff]  ;;  %v2715_v62 = vld [vmem:[#allocation14 + $0x1f8] sm:$0xff] }
 0xe2d   : > { %3117 = vmatpush.msra.mxu0 %v2705_v63  ;;  %3137 = vmatpush.msra.mxu1 %v2833_v2  ;;  %v2843_v63 = vld [vmem:[#allocation14 + $0x5f8] sm:$0xff]  ;;  %v2706_v2 = vld [vmem:[#allocation14 + $0x1b0] sm:$0xff] }
 0xe2e   : > { %3078 = vmatpush.msra.mxu2 %v2696_v3  ;;  %3098 = vmatpush.msra.mxu3 %v2824_v4  ;;  %v2834_v3 = vld [vmem:[#allocation14 + $0x5b0] sm:$0xff]  ;;  %v2707_v4 = vld [vmem:[#allocation14 + $0x1b8] sm:$0xff] }
 0xe2f   : > { %3118 = vmatpush.msra.mxu0 %v2697_v5  ;;  %3138 = vmatpush.msra.mxu1 %v2825_v6  ;;  %v2835_v5 = vld [vmem:[#allocation14 + $0x5b8] sm:$0xff]  ;;  %v2698_v6 = vld [vmem:[#allocation14 + $0x170] sm:$0xff] }
 0xe30   : > { %3079 = vmatpush.msra.mxu2 %v2688_v7  ;;  %3099 = vmatpush.msra.mxu3 %v2816_v8  ;;  %v2826_v7 = vld [vmem:[#allocation14 + $0x570] sm:$0xff]  ;;  %v2699_v8 = vld [vmem:[#allocation14 + $0x178] sm:$0xff] }
 0xe31   : > { %3119 = vmatpush.msra.mxu0 %v2689_v9  ;;  %3139 = vmatpush.msra.mxu1 %v2817_v10  ;;  %v2827_v9 = vld [vmem:[#allocation14 + $0x578] sm:$0xff]  ;;  %v2690_v10 = vld [vmem:[#allocation14 + $0x130] sm:$0xff] }
 0xe32   : > { %3080 = vmatpush.msra.mxu2 %v2680_v11  ;;  %3100 = vmatpush.msra.mxu3 %v2808_v42  ;;  %v2818_v11 = vld [vmem:[#allocation14 + $0x530] sm:$0xff]  ;;  %v2691_v42 = vld [vmem:[#allocation14 + $0x138] sm:$0xff] }
 0xe33   : > { %3120 = vmatpush.msra.mxu0 %v2681_v12  ;;  %3140 = vmatpush.msra.mxu1 %v2809_v13  ;;  %v2819_v12 = vld [vmem:[#allocation14 + $0x538] sm:$0xff]  ;;  %v2682_v13 = vld [vmem:[#allocation14 + $0xf0] sm:$0xff] }
 0xe34   : > { %3081 = vmatpush.msra.mxu2 %v2672_v14  ;;  %3101 = vmatpush.msra.mxu3 %v2800_v15  ;;  %v2810_v14 = vld [vmem:[#allocation14 + $0x4f0] sm:$0xff]  ;;  %v2683_v15 = vld [vmem:[#allocation14 + $0xf8] sm:$0xff] }
 0xe35   : > { %3121 = vmatpush.msra.mxu0 %v2673_v16  ;;  %3141 = vmatpush.msra.mxu1 %v2801_v17  ;;  %v2811_v16 = vld [vmem:[#allocation14 + $0x4f8] sm:$0xff]  ;;  %v2674_v17 = vld [vmem:[#allocation14 + $0xb0] sm:$0xff] }
 0xe36   : > { %3082 = vmatpush.msra.mxu2 %v2664_v18  ;;  %3102 = vmatpush.msra.mxu3 %v2792_v19  ;;  %v2802_v18 = vld [vmem:[#allocation14 + $0x4b0] sm:$0xff]  ;;  %v2675_v19 = vld [vmem:[#allocation14 + $0xb8] sm:$0xff] }
 0xe37   : > { %3122 = vmatpush.msra.mxu0 %v2665_v20  ;;  %3142 = vmatpush.msra.mxu1 %v2793_v22  ;;  %v2803_v20 = vld [vmem:[#allocation14 + $0x4b8] sm:$0xff]  ;;  %v2666_v22 = vld [vmem:[#allocation14 + $0x70] sm:$0xff] }
 0xe38   : > { %3083 = vmatpush.msra.mxu2 %v2656_v23  ;;  %3103 = vmatpush.msra.mxu3 %v2784_v27  ;;  %v2794_v23 = vld [vmem:[#allocation14 + $0x470] sm:$0xff]  ;;  %v2667_v27 = vld [vmem:[#allocation14 + $0x78] sm:$0xff] }
 0xe39   : > { %3123 = vmatpush.msra.mxu0 %v2657_v28  ;;  %3143 = vmatpush.msra.mxu1 %v2785_v29  ;;  %v2795_v28 = vld [vmem:[#allocation14 + $0x478] sm:$0xff]  ;;  %v2658_v29 = vld [vmem:[#allocation14 + $0x30] sm:$0xff] }
 0xe3a   : > { %3084 = vmatmul.f32.vlgmr.msra.gmra.mxu2 %v5263_v24  ;;  %3104 = vmatmul.f32.vlgmr.msra.gmra.mxu3 %v5266_v25 }
 0xe3b   : > { %3124 = vmatmul.f32.vlgmr.msra.gmra.mxu0 %v5263_v24  ;;  %3144 = vmatmul.f32.vlgmr.msra.gmra.mxu1 %v5266_v25 }
 0xe3c   : > { %3148 = vmatpush.msrb.mxu2 %v2778_v41  ;;  %3168 = vmatpush.msrb.mxu3 %v2906_v50  ;;  %v2786_v41 = vld [vmem:[#allocation14 + $0x430] sm:$0xff]  ;;  %v2659_v50 = vld [vmem:[#allocation14 + $0x38] sm:$0xff] }
 0xe3d   : > { %3188 = vmatpush.msrb.mxu0 %v2779_v30  ;;  %3208 = vmatpush.msrb.mxu1 %v2907_v35  ;;  %v2787_v30 = vld [vmem:[#allocation14 + $0x438] sm:$0xff]  ;;  %v3298_v35 = vld [vmem:[#allocation16 + $0x1f0] sm:$0xff] }
 0xe3e   : > { %3149 = vmatpush.msrb.mxu2 %v2770_v31  ;;  %3169 = vmatpush.msrb.mxu3 %v2898_v39  ;;  %v3266_v31 = vld [vmem:[#allocation16 + $0xf0] sm:$0xff] }
 0xe3f   : > { %3189 = vmatpush.msrb.mxu0 %v2771_v26  ;;  %3209 = vmatpush.msrb.mxu1 %v2899_v32  ;;  %v3362_v39 = vld [vmem:[#allocation16 + $0x3f0] sm:$0xff]  ;;  %v3296_v26 = vld [vmem:[#allocation16 + $0x1e0] sm:$0xff] }
 0xe40   : > { %3150 = vmatpush.msrb.mxu2 %v2762_v43  ;;  %3170 = vmatpush.msrb.mxu3 %v2890_v34  ;;  %v3264_v32 = vld [vmem:[#allocation16 + $0xe0] sm:$0xff]  ;;  %v3294_v34 = vld [vmem:[#allocation16 + $0x1d0] sm:$0xff] }
 0xe41   : > { %3190 = vmatpush.msrb.mxu0 %v2763_v21  ;;  %3210 = vmatpush.msrb.mxu1 %v2891_v33  ;;  %v3360_v43 = vld [vmem:[#allocation16 + $0x3e0] sm:$0xff]  ;;  %v3262_v21 = vld [vmem:[#allocation16 + $0xd0] sm:$0xff] }
 0xe42   : > { %3151 = vmatpush.msrb.mxu2 %v2754_v38  ;;  %3171 = vmatpush.msrb.mxu3 %v2882_v40  ;;  %v3358_v33 = vld [vmem:[#allocation16 + $0x3d0] sm:$0xff]  ;;  %v3292_v38 = vld [vmem:[#allocation16 + $0x1c0] sm:$0xff] }
 0xe43   : > { %3191 = vmatpush.msrb.mxu0 %v2755_v0  ;;  %3211 = vmatpush.msrb.mxu1 %v2883_v1  ;;  %v3260_v40 = vld [vmem:[#allocation16 + $0xc0] sm:$0xff]  ;;  %v3330_v0 = vld [vmem:[#allocation16 + $0x2f0] sm:$0xff] }
 0xe44   : > { %3152 = vmatpush.msrb.mxu2 %v2746_v44  ;;  %3172 = vmatpush.msrb.mxu3 %v2874_v45  ;;  %v3356_v1 = vld [vmem:[#allocation16 + $0x3c0] sm:$0xff]  ;;  %v3290_v44 = vld [vmem:[#allocation16 + $0x1b0] sm:$0xff] }
 0xe45   : > { %3192 = vmatpush.msrb.mxu0 %v2747_v36  ;;  %3212 = vmatpush.msrb.mxu1 %v2875_v46  ;;  %v3258_v45 = vld [vmem:[#allocation16 + $0xb0] sm:$0xff]  ;;  %v3328_v36 = vld [vmem:[#allocation16 + $0x2e0] sm:$0xff] }
 0xe46   : > { %3153 = vmatpush.msrb.mxu2 %v2738_v51  ;;  %3173 = vmatpush.msrb.mxu3 %v2866_v52  ;;  %v3354_v46 = vld [vmem:[#allocation16 + $0x3b0] sm:$0xff]  ;;  %v3288_v51 = vld [vmem:[#allocation16 + $0x1a0] sm:$0xff] }
 0xe47   : > { %3193 = vmatpush.msrb.mxu0 %v2739_v53  ;;  %3213 = vmatpush.msrb.mxu1 %v2867_v37  ;;  %v3256_v52 = vld [vmem:[#allocation16 + $0xa0] sm:$0xff]  ;;  %v3326_v53 = vld [vmem:[#allocation16 + $0x2d0] sm:$0xff] }
 0xe48   : > { %3154 = vmatpush.msrb.mxu2 %v2730_v54  ;;  %3174 = vmatpush.msrb.mxu3 %v2858_v55  ;;  %v3352_v37 = vld [vmem:[#allocation16 + $0x3a0] sm:$0xff]  ;;  %v3286_v54 = vld [vmem:[#allocation16 + $0x190] sm:$0xff] }
 0xe49   : > { %3194 = vmatpush.msrb.mxu0 %v2731_v47  ;;  %3214 = vmatpush.msrb.mxu1 %v2859_v56  ;;  %v3254_v55 = vld [vmem:[#allocation16 + $0x90] sm:$0xff]  ;;  %v3324_v47 = vld [vmem:[#allocation16 + $0x2c0] sm:$0xff] }
 0xe4a   : > { %3155 = vmatpush.msrb.mxu2 %v2722_v49  ;;  %3175 = vmatpush.msrb.mxu3 %v2850_v57  ;;  %v3350_v56 = vld [vmem:[#allocation16 + $0x390] sm:$0xff]  ;;  %v3284_v49 = vld [vmem:[#allocation16 + $0x180] sm:$0xff] }
 0xe4b   : > { %3195 = vmatpush.msrb.mxu0 %v2723_v48  ;;  %3215 = vmatpush.msrb.mxu1 %v2851_v58  ;;  %v3252_v57 = vld [vmem:[#allocation16 + $0x80] sm:$0xff]  ;;  %v3322_v48 = vld [vmem:[#allocation16 + $0x2b0] sm:$0xff] }
 0xe4c   : > { %3156 = vmatpush.msrb.mxu2 %v2714_v59  ;;  %3176 = vmatpush.msrb.mxu3 %v2842_v60  ;;  %v3348_v58 = vld [vmem:[#allocation16 + $0x380] sm:$0xff]  ;;  %v3282_v59 = vld [vmem:[#allocation16 + $0x170] sm:$0xff] }
 0xe4d   : > { %3196 = vmatpush.msrb.mxu0 %v2715_v62  ;;  %3216 = vmatpush.msrb.mxu1 %v2843_v63  ;;  %v3250_v60 = vld [vmem:[#allocation16 + $0x70] sm:$0xff]  ;;  %v3320_v62 = vld [vmem:[#allocation16 + $0x2a0] sm:$0xff] }
 0xe4e   : > { %3157 = vmatpush.msrb.mxu2 %v2706_v2  ;;  %3177 = vmatpush.msrb.mxu3 %v2834_v3  ;;  %v3346_v63 = vld [vmem:[#allocation16 + $0x370] sm:$0xff]  ;;  %v3280_v2 = vld [vmem:[#allocation16 + $0x160] sm:$0xff] }
 0xe4f   : > { %3197 = vmatpush.msrb.mxu0 %v2707_v4  ;;  %3217 = vmatpush.msrb.mxu1 %v2835_v5  ;;  %v3248_v3 = vld [vmem:[#allocation16 + $0x60] sm:$0xff]  ;;  %v3318_v4 = vld [vmem:[#allocation16 + $0x290] sm:$0xff] }
 0xe50   : > { %3158 = vmatpush.msrb.mxu2 %v2698_v6  ;;  %3178 = vmatpush.msrb.mxu3 %v2826_v7  ;;  %v3344_v5 = vld [vmem:[#allocation16 + $0x360] sm:$0xff]  ;;  %v3278_v6 = vld [vmem:[#allocation16 + $0x150] sm:$0xff] }
 0xe51   : > { %3198 = vmatpush.msrb.mxu0 %v2699_v8  ;;  %3218 = vmatpush.msrb.mxu1 %v2827_v9  ;;  %v3246_v7 = vld [vmem:[#allocation16 + $0x50] sm:$0xff]  ;;  %v3316_v8 = vld [vmem:[#allocation16 + $0x280] sm:$0xff] }
 0xe52   : > { %3159 = vmatpush.msrb.mxu2 %v2690_v10  ;;  %3179 = vmatpush.msrb.mxu3 %v2818_v11  ;;  %v3342_v9 = vld [vmem:[#allocation16 + $0x350] sm:$0xff]  ;;  %v3276_v10 = vld [vmem:[#allocation16 + $0x140] sm:$0xff] }
 0xe53   : > { %3199 = vmatpush.msrb.mxu0 %v2691_v42  ;;  %3219 = vmatpush.msrb.mxu1 %v2819_v12  ;;  %v3244_v11 = vld [vmem:[#allocation16 + $0x40] sm:$0xff]  ;;  %v3314_v42 = vld [vmem:[#allocation16 + $0x270] sm:$0xff] }
 0xe54   : > { %3160 = vmatpush.msrb.mxu2 %v2682_v13  ;;  %3180 = vmatpush.msrb.mxu3 %v2810_v14  ;;  %v3340_v12 = vld [vmem:[#allocation16 + $0x340] sm:$0xff]  ;;  %v3274_v13 = vld [vmem:[#allocation16 + $0x130] sm:$0xff] }
 0xe55   : > { %3200 = vmatpush.msrb.mxu0 %v2683_v15  ;;  %3220 = vmatpush.msrb.mxu1 %v2811_v16  ;;  %v3242_v14 = vld [vmem:[#allocation16 + $0x30] sm:$0xff]  ;;  %v3312_v15 = vld [vmem:[#allocation16 + $0x260] sm:$0xff] }
 0xe56   : > { %3161 = vmatpush.msrb.mxu2 %v2674_v17  ;;  %3181 = vmatpush.msrb.mxu3 %v2802_v18  ;;  %v3338_v16 = vld [vmem:[#allocation16 + $0x330] sm:$0xff]  ;;  %v3272_v17 = vld [vmem:[#allocation16 + $0x120] sm:$0xff] }
 0xe57   : > { %3201 = vmatpush.msrb.mxu0 %v2675_v19  ;;  %3221 = vmatpush.msrb.mxu1 %v2803_v20  ;;  %v3240_v18 = vld [vmem:[#allocation16 + $0x20] sm:$0xff]  ;;  %v3270_v19 = vld [vmem:[#allocation16 + $0x110] sm:$0xff] }
 0xe58   : > { %3162 = vmatpush.msrb.mxu2 %v2666_v22  ;;  %3182 = vmatpush.msrb.mxu3 %v2794_v23  ;;  %v3238_v20 = vld [vmem:[#allocation16 + $0x10] sm:$0xff]  ;;  %v3336_v23 = vld [vmem:[#allocation16 + $0x320] sm:$0xff] }
 0xe59   : > { %3202 = vmatpush.msrb.mxu0 %v2667_v27  ;;  %3222 = vmatpush.msrb.mxu1 %v2795_v28  ;;  %v3310_v22 = vld [vmem:[#allocation16 + $0x250] sm:$0xff]  ;;  %v3308_v27 = vld [vmem:[#allocation16 + $0x240] sm:$0xff] }
 0xe5a   : > { %3163 = vmatpush.msrb.mxu2 %v2658_v29  ;;  %3183 = vmatpush.msrb.mxu3 %v2786_v41  ;;  %v3334_v28 = vld [vmem:[#allocation16 + $0x310] sm:$0xff]  ;;  %v3268_v29 = vld [vmem:[#allocation16 + $0x100] sm:$0xff] }
 0xe5b   : > { %3203 = vmatpush.msrb.mxu0 %v2659_v50  ;;  %3223 = vmatpush.msrb.mxu1 %v2787_v30  ;;  %v3236_v41 = vld [vmem:[#allocation16] sm:$0xff]  ;;  %v3426_v50 = vld [vmem:[#allocation16 + $0x5f0] sm:$0xff] }
 0xe5c   : > { %3164 = vmatmul.f32.vlgmr.msrb.gmra.mxu2 %v5263_v24  ;;  %3184 = vmatmul.f32.vlgmr.msrb.gmra.mxu3 %v5266_v25  ;;  %v3394_v30 = vld [vmem:[#allocation16 + $0x4f0] sm:$0xff] }
 0xe5d   : > { %3204 = vmatmul.f32.vlgmr.msrb.gmra.mxu0 %v5263_v24  ;;  %3224 = vmatmul.f32.vlgmr.msrb.gmra.mxu1 %v5266_v25 }
 0xe5e   : > { %3512 = vmatpush.msra.mxu3 %v3298_v35  ;;  %3492 = vmatpush.msra.mxu2 %v3266_v31  ;;  %v3306_v35 = vld [vmem:[#allocation16 + $0x230] sm:$0xff]  ;;  %v3332_v31 = vld [vmem:[#allocation16 + $0x300] sm:$0xff] }
 0xe5f   : > { %3552 = vmatpush.msra.mxu1 %v3362_v39  ;;  %3532 = vmatpush.msra.mxu0 %v3330_v0  ;;  %v3424_v39 = vld [vmem:[#allocation16 + $0x5e0] sm:$0xff]  ;;  %v3302_v0 = vld [vmem:[#allocation16 + $0x210] sm:$0xff] }
 0xe60   : > { %3513 = vmatpush.msra.mxu3 %v3296_v26  ;;  %3493 = vmatpush.msra.mxu2 %v3264_v32  ;;  %v3392_v26 = vld [vmem:[#allocation16 + $0x4e0] sm:$0xff]  ;;  %v3490_v32 = vld [vmem:[#allocation16 + $0x7f0] sm:$0xff] }
 0xe61   : > { %3553 = vmatpush.msra.mxu1 %v3360_v43  ;;  %3533 = vmatpush.msra.mxu0 %v3328_v36  ;;  %v3304_v43 = vld [vmem:[#allocation16 + $0x220] sm:$0xff] }
 0xe62   : > { %3514 = vmatpush.msra.mxu3 %v3294_v34  ;;  %3494 = vmatpush.msra.mxu2 %v3262_v21  ;;  %v3422_v34 = vld [vmem:[#allocation16 + $0x5d0] sm:$0xff]  ;;  %v3300_v36 = vld [vmem:[#allocation16 + $0x200] sm:$0xff] }
 0xe63   : > { %3554 = vmatpush.msra.mxu1 %v3358_v33  ;;  %3534 = vmatpush.msra.mxu0 %v3326_v53  ;;  %v3390_v21 = vld [vmem:[#allocation16 + $0x4d0] sm:$0xff]  ;;  %v3488_v33 = vld [vmem:[#allocation16 + $0x7e0] sm:$0xff] }
 0xe64   : > { %3515 = vmatpush.msra.mxu3 %v3292_v38  ;;  %3495 = vmatpush.msra.mxu2 %v3260_v40  ;;  %v3420_v38 = vld [vmem:[#allocation16 + $0x5c0] sm:$0xff] }
 0xe65   : > { %3555 = vmatpush.msra.mxu1 %v3356_v1  ;;  %3535 = vmatpush.msra.mxu0 %v3324_v47  ;;  %v3388_v40 = vld [vmem:[#allocation16 + $0x4c0] sm:$0xff]  ;;  %v3486_v1 = vld [vmem:[#allocation16 + $0x7d0] sm:$0xff] }
 0xe66   : > { %3516 = vmatpush.msra.mxu3 %v3290_v44  ;;  %3496 = vmatpush.msra.mxu2 %v3258_v45  ;;  %v3418_v44 = vld [vmem:[#allocation16 + $0x5b0] sm:$0xff]  ;;  %v3384_v53 = vld [vmem:[#allocation16 + $0x4a0] sm:$0xff] }
 0xe67   : > { %3556 = vmatpush.msra.mxu1 %v3354_v46  ;;  %3536 = vmatpush.msra.mxu0 %v3322_v48  ;;  %v3386_v45 = vld [vmem:[#allocation16 + $0x4b0] sm:$0xff]  ;;  %v3380_v48 = vld [vmem:[#allocation16 + $0x480] sm:$0xff] }
 0xe68   : > { %3517 = vmatpush.msra.mxu3 %v3288_v51  ;;  %3497 = vmatpush.msra.mxu2 %v3256_v52  ;;  %v3458_v46 = vld [vmem:[#allocation16 + $0x6f0] sm:$0xff]  ;;  %v3484_v51 = vld [vmem:[#allocation16 + $0x7c0] sm:$0xff] }
 0xe69   : > { %3557 = vmatpush.msra.mxu1 %v3352_v37  ;;  %3537 = vmatpush.msra.mxu0 %v3320_v62  ;;  %v3416_v52 = vld [vmem:[#allocation16 + $0x5a0] sm:$0xff]  ;;  %v3382_v47 = vld [vmem:[#allocation16 + $0x490] sm:$0xff] }
 0xe6a   : > { %3518 = vmatpush.msra.mxu3 %v3286_v54  ;;  %3498 = vmatpush.msra.mxu2 %v3254_v55  ;;  %v3456_v37 = vld [vmem:[#allocation16 + $0x6e0] sm:$0xff]  ;;  %v3482_v54 = vld [vmem:[#allocation16 + $0x7b0] sm:$0xff] }
 0xe6b   : > { %3558 = vmatpush.msra.mxu1 %v3350_v56  ;;  %3538 = vmatpush.msra.mxu0 %v3318_v4  ;;  %v3414_v55 = vld [vmem:[#allocation16 + $0x590] sm:$0xff]  ;;  %v3376_v4 = vld [vmem:[#allocation16 + $0x460] sm:$0xff] }
 0xe6c   : > { %3519 = vmatpush.msra.mxu3 %v3284_v49  ;;  %3499 = vmatpush.msra.mxu2 %v3252_v57  ;;  %v3454_v56 = vld [vmem:[#allocation16 + $0x6d0] sm:$0xff]  ;;  %v3480_v49 = vld [vmem:[#allocation16 + $0x7a0] sm:$0xff] }
 0xe6d   : > { %3559 = vmatpush.msra.mxu1 %v3348_v58  ;;  %3539 = vmatpush.msra.mxu0 %v3316_v8  ;;  %v3412_v57 = vld [vmem:[#allocation16 + $0x580] sm:$0xff]  ;;  %v3378_v62 = vld [vmem:[#allocation16 + $0x470] sm:$0xff] }
 0xe6e   : > { %3520 = vmatpush.msra.mxu3 %v3282_v59  ;;  %3500 = vmatpush.msra.mxu2 %v3250_v60  ;;  %v3452_v58 = vld [vmem:[#allocation16 + $0x6c0] sm:$0xff]  ;;  %v3478_v59 = vld [vmem:[#allocation16 + $0x790] sm:$0xff] }
 0xe6f   : > { %3560 = vmatpush.msra.mxu1 %v3346_v63  ;;  %3540 = vmatpush.msra.mxu0 %v3314_v42  ;;  %v3410_v60 = vld [vmem:[#allocation16 + $0x570] sm:$0xff]  ;;  %v3372_v42 = vld [vmem:[#allocation16 + $0x440] sm:$0xff] }
 0xe70   : > { %3521 = vmatpush.msra.mxu3 %v3280_v2  ;;  %3501 = vmatpush.msra.mxu2 %v3248_v3  ;;  %v3450_v63 = vld [vmem:[#allocation16 + $0x6b0] sm:$0xff]  ;;  %v3476_v2 = vld [vmem:[#allocation16 + $0x780] sm:$0xff] }
 0xe71   : > { %3561 = vmatpush.msra.mxu1 %v3344_v5  ;;  %3541 = vmatpush.msra.mxu0 %v3312_v15  ;;  %v3408_v3 = vld [vmem:[#allocation16 + $0x560] sm:$0xff]  ;;  %v3374_v8 = vld [vmem:[#allocation16 + $0x450] sm:$0xff] }
 0xe72   : > { %3522 = vmatpush.msra.mxu3 %v3278_v6  ;;  %3502 = vmatpush.msra.mxu2 %v3246_v7  ;;  %v3448_v5 = vld [vmem:[#allocation16 + $0x6a0] sm:$0xff]  ;;  %v3474_v6 = vld [vmem:[#allocation16 + $0x770] sm:$0xff] }
 0xe73   : > { %3562 = vmatpush.msra.mxu1 %v3342_v9  ;;  %3542 = vmatpush.msra.mxu0 %v3310_v22  ;;  %v3406_v7 = vld [vmem:[#allocation16 + $0x550] sm:$0xff]  ;;  %v3368_v22 = vld [vmem:[#allocation16 + $0x420] sm:$0xff] }
 0xe74   : > { %3523 = vmatpush.msra.mxu3 %v3276_v10  ;;  %3503 = vmatpush.msra.mxu2 %v3244_v11  ;;  %v3446_v9 = vld [vmem:[#allocation16 + $0x690] sm:$0xff]  ;;  %v3472_v10 = vld [vmem:[#allocation16 + $0x760] sm:$0xff] }
 0xe75   : > { %3563 = vmatpush.msra.mxu1 %v3340_v12  ;;  %3543 = vmatpush.msra.mxu0 %v3308_v27  ;;  %v3404_v11 = vld [vmem:[#allocation16 + $0x540] sm:$0xff]  ;;  %v3370_v15 = vld [vmem:[#allocation16 + $0x430] sm:$0xff] }
 0xe76   : > { %3524 = vmatpush.msra.mxu3 %v3274_v13  ;;  %3504 = vmatpush.msra.mxu2 %v3242_v14  ;;  %v3444_v12 = vld [vmem:[#allocation16 + $0x680] sm:$0xff]  ;;  %v3470_v13 = vld [vmem:[#allocation16 + $0x750] sm:$0xff] }
 0xe77   : > { %3564 = vmatpush.msra.mxu1 %v3338_v16  ;;  %3544 = vmatpush.msra.mxu0 %v3306_v35  ;;  %v3402_v14 = vld [vmem:[#allocation16 + $0x530] sm:$0xff]  ;;  %v3440_v27 = vld [vmem:[#allocation16 + $0x660] sm:$0xff] }
 0xe78   : > { %3525 = vmatpush.msra.mxu3 %v3272_v17  ;;  %3505 = vmatpush.msra.mxu2 %v3240_v18  ;;  %v3442_v16 = vld [vmem:[#allocation16 + $0x670] sm:$0xff]  ;;  %v3468_v17 = vld [vmem:[#allocation16 + $0x740] sm:$0xff] }
 0xe79   : > { %3565 = vmatpush.msra.mxu1 %v3336_v23  ;;  %3545 = vmatpush.msra.mxu0 %v3304_v43  ;;  %v3364_v35 = vld [vmem:[#allocation16 + $0x400] sm:$0xff]  ;;  %v3438_v43 = vld [vmem:[#allocation16 + $0x650] sm:$0xff] }
 0xe7a   : > { %3526 = vmatpush.msra.mxu3 %v3270_v19  ;;  %3506 = vmatpush.msra.mxu2 %v3238_v20  ;;  %v3400_v20 = vld [vmem:[#allocation16 + $0x520] sm:$0xff] }
 0xe7b   : > { %3566 = vmatpush.msra.mxu1 %v3334_v28  ;;  %3546 = vmatpush.msra.mxu0 %v3302_v0  ;;  %v3466_v28 = vld [vmem:[#allocation16 + $0x730] sm:$0xff]  ;;  %v3295_v0 = vld [vmem:[#allocation16 + $0x1d8] sm:$0xff] }
 0xe7c   : > { %3527 = vmatpush.msra.mxu3 %v3268_v29  ;;  %3507 = vmatpush.msra.mxu2 %v3236_v41  ;;  %v3398_v29 = vld [vmem:[#allocation16 + $0x510] sm:$0xff] }
 0xe7d   : > { %3567 = vmatpush.msra.mxu1 %v3332_v31  ;;  %3547 = vmatpush.msra.mxu0 %v3300_v36  ;;  %v3366_v41 = vld [vmem:[#allocation16 + $0x410] sm:$0xff]  ;;  %v3299_v31 = vld [vmem:[#allocation16 + $0x1f8] sm:$0xff]  ;;  %v3265_v36 = vld [vmem:[#allocation16 + $0xe8] sm:$0xff] }
 0xe7e   : > { %3592 = vmatpush.msrb.mxu3 %v3426_v50  ;;  %3572 = vmatpush.msrb.mxu2 %v3394_v30  ;;  %v3396_v30 = vld [vmem:[#allocation16 + $0x500] sm:$0xff] }
 0xe7f   : > { %3632 = vmatpush.msrb.mxu1 %v3490_v32  ;;  %3612 = vmatpush.msrb.mxu0 %v3458_v46  ;;  %v3434_v46 = vld [vmem:[#allocation16 + $0x630] sm:$0xff] }
 0xe80   : > { %3593 = vmatpush.msrb.mxu3 %v3424_v39  ;;  %3573 = vmatpush.msrb.mxu2 %v3392_v26 }
 0xe81   : > { %3633 = vmatpush.msrb.mxu1 %v3488_v33  ;;  %3613 = vmatpush.msrb.mxu0 %v3456_v37  ;;  %v3263_v37 = vld [vmem:[#allocation16 + $0xd8] sm:$0xff] }
 0xe82   : > { %3594 = vmatpush.msrb.mxu3 %v3422_v34  ;;  %3574 = vmatpush.msrb.mxu2 %v3390_v21  ;;  %v3464_v34 = vld [vmem:[#allocation16 + $0x720] sm:$0xff]  ;;  %v3297_v21 = vld [vmem:[#allocation16 + $0x1e8] sm:$0xff] }
 0xe83   : > { %3634 = vmatpush.msrb.mxu1 %v3486_v1  ;;  %3614 = vmatpush.msrb.mxu0 %v3454_v56  ;;  %v3462_v1 = vld [vmem:[#allocation16 + $0x710] sm:$0xff]  ;;  %v3261_v56 = vld [vmem:[#allocation16 + $0xc8] sm:$0xff] }
 0xe84   : > { %3595 = vmatpush.msrb.mxu3 %v3420_v38  ;;  %3575 = vmatpush.msrb.mxu2 %v3388_v40  ;;  %v3267_v38 = vld [vmem:[#allocation16 + $0xf8] sm:$0xff]  ;;  %v3436_v40 = vld [vmem:[#allocation16 + $0x640] sm:$0xff] }
 0xe85   : > { %3635 = vmatpush.msrb.mxu1 %v3484_v51  ;;  %3615 = vmatpush.msrb.mxu0 %v3452_v58  ;;  %v3289_v58 = vld [vmem:[#allocation16 + $0x1a8] sm:$0xff] }
 0xe86   : > { %3596 = vmatpush.msrb.mxu3 %v3418_v44  ;;  %3576 = vmatpush.msrb.mxu2 %v3386_v45 }
 0xe87   : > { %3636 = vmatpush.msrb.mxu1 %v3482_v54  ;;  %3616 = vmatpush.msrb.mxu0 %v3450_v63  ;;  %v3430_v63 = vld [vmem:[#allocation16 + $0x610] sm:$0xff] }
 0xe88   : > { %3597 = vmatpush.msrb.mxu3 %v3416_v52  ;;  %3577 = vmatpush.msrb.mxu2 %v3384_v53  ;;  %v3293_v52 = vld [vmem:[#allocation16 + $0x1c8] sm:$0xff]  ;;  %v3460_v53 = vld [vmem:[#allocation16 + $0x700] sm:$0xff] }
 0xe89   : > { %3637 = vmatpush.msrb.mxu1 %v3480_v49  ;;  %3617 = vmatpush.msrb.mxu0 %v3448_v5  ;;  %v3432_v49 = vld [vmem:[#allocation16 + $0x620] sm:$0xff]  ;;  %v3359_v5 = vld [vmem:[#allocation16 + $0x3d8] sm:$0xff] }
 0xe8a   : > { %3598 = vmatpush.msrb.mxu3 %v3414_v55  ;;  %3578 = vmatpush.msrb.mxu2 %v3382_v47  ;;  %v3291_v55 = vld [vmem:[#allocation16 + $0x1b8] sm:$0xff] }
 0xe8b   : > { %3638 = vmatpush.msrb.mxu1 %v3478_v59  ;;  %3618 = vmatpush.msrb.mxu0 %v3446_v9  ;;  %v3363_v47 = vld [vmem:[#allocation16 + $0x3f8] sm:$0xff]  ;;  %v3361_v59 = vld [vmem:[#allocation16 + $0x3e8] sm:$0xff] }
 0xe8c   : > { %3599 = vmatpush.msrb.mxu3 %v3412_v57  ;;  %3579 = vmatpush.msrb.mxu2 %v3380_v48  ;;  %v3331_v9 = vld [vmem:[#allocation16 + $0x2f8] sm:$0xff] }
 0xe8d   : > { %3639 = vmatpush.msrb.mxu1 %v3476_v2  ;;  %3619 = vmatpush.msrb.mxu0 %v3444_v12  ;;  %v3287_v2 = vld [vmem:[#allocation16 + $0x198] sm:$0xff]  ;;  %v3329_v12 = vld [vmem:[#allocation16 + $0x2e8] sm:$0xff] }
 0xe8e   : > { %3600 = vmatpush.msrb.mxu3 %v3410_v60  ;;  %3580 = vmatpush.msrb.mxu2 %v3378_v62  ;;  %v3259_v62 = vld [vmem:[#allocation16 + $0xb8] sm:$0xff] }
 0xe8f   : > { %3640 = vmatpush.msrb.mxu1 %v3474_v6  ;;  %3620 = vmatpush.msrb.mxu0 %v3442_v16  ;;  %v3285_v6 = vld [vmem:[#allocation16 + $0x188] sm:$0xff]  ;;  %v3327_v16 = vld [vmem:[#allocation16 + $0x2d8] sm:$0xff] }
 0xe90   : > { %3601 = vmatpush.msrb.mxu3 %v3408_v3  ;;  %3581 = vmatpush.msrb.mxu2 %v3376_v4  ;;  %v3257_v4 = vld [vmem:[#allocation16 + $0xa8] sm:$0xff] }
 0xe91   : > { %3641 = vmatpush.msrb.mxu1 %v3472_v10  ;;  %3621 = vmatpush.msrb.mxu0 %v3440_v27  ;;  %v3283_v10 = vld [vmem:[#allocation16 + $0x178] sm:$0xff] }
 0xe92   : > { %3602 = vmatpush.msrb.mxu3 %v3406_v7  ;;  %3582 = vmatpush.msrb.mxu2 %v3374_v8  ;;  %v3428_v7 = vld [vmem:[#allocation16 + $0x600] sm:$0xff]  ;;  %v3255_v8 = vld [vmem:[#allocation16 + $0x98] sm:$0xff] }
 0xe93   : > { %3642 = vmatpush.msrb.mxu1 %v3470_v13  ;;  %3622 = vmatpush.msrb.mxu0 %v3438_v43  ;;  %v3281_v13 = vld [vmem:[#allocation16 + $0x168] sm:$0xff]  ;;  %v3351_v27 = vld [vmem:[#allocation16 + $0x398] sm:$0xff] }
 0xe94   : > { %3603 = vmatpush.msrb.mxu3 %v3404_v11  ;;  %3583 = vmatpush.msrb.mxu2 %v3372_v42  ;;  %v2965_v18 = vpop.f32.mrf.mxu0  ;;  %v2985_v19 = vpop.f32.mrf.mxu1  ;;  %v3357_v11 = vld [vmem:[#allocation16 + $0x3c8] sm:$0xff]  ;;  %v3243_v43 = vld [vmem:[#allocation16 + $0x38] sm:$0xff] }
 0xe95   : > { %v5284_v23 = vadd.f32 %v2985_v19, %v2965_v18  ;;  %3643 = vmatpush.msrb.mxu1 %v3468_v17  ;;  %3623 = vmatpush.msrb.mxu0 %v3436_v40  ;;  %v3253_v42 = vld [vmem:[#allocation16 + $0x88] sm:$0xff]  ;;  %v3279_v17 = vld [vmem:[#allocation16 + $0x158] sm:$0xff] }
 0xe96   : > { %3604 = vmatpush.msrb.mxu3 %v3402_v14  ;;  %3584 = vmatpush.msrb.mxu2 %v3370_v15  ;;  %v3355_v14 = vld [vmem:[#allocation16 + $0x3b8] sm:$0xff]  ;;  %v3353_v18 = vld [vmem:[#allocation16 + $0x3a8] sm:$0xff] }
 0xe97   : > { %v3229_v50 = vmax.f32 %v5284_v23, 0.0  ;;  %3644 = vmatpush.msrb.mxu1 %v3466_v28  ;;  %3624 = vmatpush.msrb.mxu0 %v3434_v46  ;;  %v3251_v15 = vld [vmem:[#allocation16 + $0x78] sm:$0xff]  ;;  %v3249_v19 = vld [vmem:[#allocation16 + $0x68] sm:$0xff] }
 0xe98   : > { %3605 = vmatpush.msrb.mxu3 %v3400_v20  ;;  %3585 = vmatpush.msrb.mxu2 %v3368_v22  ;;  %v3325_v20 = vld [vmem:[#allocation16 + $0x2c8] sm:$0xff]  ;;  %v3247_v28 = vld [vmem:[#allocation16 + $0x58] sm:$0xff] }
 0xe99   : > { %v2925_v39 = vpop.f32.mrf.mxu2  ;;  %v2945_v26 = vpop.f32.mrf.mxu3  ;;  %3528 = vmatmul.f32.vlgmr.msra.gmra.mxu3 %v3229_v50  ;;  %3645 = vmatpush.msrb.mxu1 %v3464_v34  ;;  %v3277_v22 = vld [vmem:[#allocation16 + $0x148] sm:$0xff]  ;;  %v3319_v34 = vld [vmem:[#allocation16 + $0x298] sm:$0xff] }
 0xe9a   : > { %3606 = vmatpush.msrb.mxu3 %v3398_v29  ;;  %3586 = vmatpush.msrb.mxu2 %v3366_v41  ;;  %v5289_v32 = vadd.f32 %v2945_v26, %v2925_v39  ;;  %v3323_v29 = vld [vmem:[#allocation16 + $0x2b8] sm:$0xff]  ;;  %v3273_v39 = vld [vmem:[#allocation16 + $0x128] sm:$0xff] }
 0xe9b   : > { %3646 = vmatpush.msrb.mxu1 %v3462_v1  ;;  %3625 = vmatpush.msrb.mxu0 %v3432_v49  ;;  %v3275_v41 = vld [vmem:[#allocation16 + $0x138] sm:$0xff]  ;;  %v3241_v40 = vld [vmem:[#allocation16 + $0x28] sm:$0xff] }
 0xe9c   : > { %3607 = vmatpush.msrb.mxu3 %v3396_v30  ;;  %3587 = vmatpush.msrb.mxu2 %v3364_v35  ;;  %v3228_v33 = vmax.f32 %v5289_v32, 0.0  ;;  %v3349_v30 = vld [vmem:[#allocation16 + $0x388] sm:$0xff]  ;;  %v3347_v26 = vld [vmem:[#allocation16 + $0x378] sm:$0xff] }
 0xe9d   : > { %3647 = vmatpush.msrb.mxu1 %v3460_v53  ;;  %3626 = vmatpush.msrb.mxu0 %v3430_v63  ;;  %v3245_v35 = vld [vmem:[#allocation16 + $0x48] sm:$0xff]  ;;  %v3239_v46 = vld [vmem:[#allocation16 + $0x18] sm:$0xff] }
 0xe9e   : > { %3672 = vmatpush.msra.mxu3 %v3299_v31  ;;  %v3045_v44 = vpop.f32.mrf.mxu0  ;;  %v3065_v45 = vpop.f32.mrf.mxu1  ;;  %3508 = vmatmul.f32.vlgmr.msra.gmra.mxu2 %v3228_v33  ;;  %v3321_v31 = vld [vmem:[#allocation16 + $0x2a8] sm:$0xff] }
 0xe9f   : > { %v5294_v51 = vadd.f32 %v3065_v45, %v3045_v44  ;;  %3652 = vmatpush.msra.mxu2 %v3267_v38  ;;  %3627 = vmatpush.msrb.mxu0 %v3428_v7  ;;  %v3345_v38 = vld [vmem:[#allocation16 + $0x368] sm:$0xff]  ;;  %v3343_v44 = vld [vmem:[#allocation16 + $0x358] sm:$0xff] }
 0xea0   : > { %3673 = vmatpush.msra.mxu3 %v3297_v21  ;;  %v3271_v21 = vld [vmem:[#allocation16 + $0x118] sm:$0xff]  ;;  %v3269_v1 = vld [vmem:[#allocation16 + $0x108] sm:$0xff] }
 0xea1   : > { %v3231_v54 = vmax.f32 %v5294_v51, 0.0  ;;  %3653 = vmatpush.msra.mxu2 %v3265_v36  ;;  %v3313_v49 = vld [vmem:[#allocation16 + $0x268] sm:$0xff]  ;;  %v3447_v51 = vld [vmem:[#allocation16 + $0x698] sm:$0xff] }
 0xea2   : > { %3674 = vmatpush.msra.mxu3 %v3295_v0  ;;  %v3317_v0 = vld [vmem:[#allocation16 + $0x288] sm:$0xff] }
 0xea3   : > { %3568 = vmatmul.f32.vlgmr.msra.gmra.mxu1 %v3231_v54  ;;  %v3005_v57 = vpop.f32.mrf.mxu2  ;;  %v3025_v48 = vpop.f32.mrf.mxu3  ;;  %3654 = vmatpush.msra.mxu2 %v3263_v37  ;;  %v3341_v37 = vld [vmem:[#allocation16 + $0x348] sm:$0xff] }
 0xea4   : > { %3675 = vmatpush.msra.mxu3 %v3293_v52  ;;  %v5299_v60 = vadd.f32 %v3025_v48, %v3005_v57  ;;  %3712 = vmatpush.msra.mxu1 %v3363_v47  ;;  %v3315_v52 = vld [vmem:[#allocation16 + $0x278] sm:$0xff]  ;;  %v3309_v7 = vld [vmem:[#allocation16 + $0x248] sm:$0xff] }
 0xea5   : > { %3655 = vmatpush.msra.mxu2 %v3261_v56  ;;  %v3427_v56 = vld [vmem:[#allocation16 + $0x5f8] sm:$0xff]  ;;  %v3385_v23 = vld [vmem:[#allocation16 + $0x4a8] sm:$0xff] }
 0xea6   : > { %3676 = vmatpush.msra.mxu3 %v3291_v55  ;;  %v3230_v3 = vmax.f32 %v5299_v60, 0.0  ;;  %3713 = vmatpush.msra.mxu1 %v3361_v59  ;;  %v3237_v55 = vld [vmem:[#allocation16 + $0x8] sm:$0xff]  ;;  %v3339_v57 = vld [vmem:[#allocation16 + $0x338] sm:$0xff] }
 0xea7   : > { %3656 = vmatpush.msra.mxu2 %v3259_v62  ;;  %v3425_v59 = vld [vmem:[#allocation16 + $0x5e8] sm:$0xff]  ;;  %v3311_v62 = vld [vmem:[#allocation16 + $0x258] sm:$0xff] }
 0xea8   : > { %3677 = vmatpush.msra.mxu3 %v3289_v58  ;;  %3548 = vmatmul.f32.vlgmr.msra.gmra.mxu0 %v3230_v3  ;;  %v3377_v32 = vld [vmem:[#allocation16 + $0x468] sm:$0xff]  ;;  %v3467_v60 = vld [vmem:[#allocation16 + $0x738] sm:$0xff] }
 0xea9   : > { %3657 = vmatpush.msra.mxu2 %v3257_v4  ;;  %3714 = vmatpush.msra.mxu1 %v3359_v5  ;;  %v3423_v4 = vld [vmem:[#allocation16 + $0x5d8] sm:$0xff] }
 0xeaa   : > { %3678 = vmatpush.msra.mxu3 %v3287_v2  ;;  %3692 = vmatpush.msra.mxu0 %v3331_v9  ;;  %v3337_v2 = vld [vmem:[#allocation16 + $0x328] sm:$0xff]  ;;  %v3335_v9 = vld [vmem:[#allocation16 + $0x318] sm:$0xff] }
 0xeab   : > { %3658 = vmatpush.msra.mxu2 %v3255_v8  ;;  %3715 = vmatpush.msra.mxu1 %v3357_v11  ;;  %v3421_v8 = vld [vmem:[#allocation16 + $0x5c8] sm:$0xff]  ;;  %v3419_v11 = vld [vmem:[#allocation16 + $0x5b8] sm:$0xff] }
 0xeac   : > { %3679 = vmatpush.msra.mxu3 %v3285_v6  ;;  %3693 = vmatpush.msra.mxu0 %v3329_v12  ;;  %v3395_v6 = vld [vmem:[#allocation16 + $0x4f8] sm:$0xff] }
 0xead   : > { %3659 = vmatpush.msra.mxu2 %v3253_v42  ;;  %3716 = vmatpush.msra.mxu1 %v3355_v14  ;;  %v3307_v42 = vld [vmem:[#allocation16 + $0x238] sm:$0xff]  ;;  %v3417_v14 = vld [vmem:[#allocation16 + $0x5a8] sm:$0xff] }
 0xeae   : > { %3680 = vmatpush.msra.mxu3 %v3283_v10  ;;  %3694 = vmatpush.msra.mxu0 %v3327_v16  ;;  %v3393_v10 = vld [vmem:[#allocation16 + $0x4e8] sm:$0xff]  ;;  %v3391_v12 = vld [vmem:[#allocation16 + $0x4d8] sm:$0xff] }
 0xeaf   : > { %3660 = vmatpush.msra.mxu2 %v3251_v15  ;;  %3717 = vmatpush.msra.mxu1 %v3353_v18  ;;  %v3305_v15 = vld [vmem:[#allocation16 + $0x228] sm:$0xff]  ;;  %v3387_v18 = vld [vmem:[#allocation16 + $0x4b8] sm:$0xff] }
 0xeb0   : > { %3681 = vmatpush.msra.mxu3 %v3281_v13  ;;  %3695 = vmatpush.msra.mxu0 %v3325_v20  ;;  %v3333_v13 = vld [vmem:[#allocation16 + $0x308] sm:$0xff] }
 0xeb1   : > { %3661 = vmatpush.msra.mxu2 %v3249_v19  ;;  %3718 = vmatpush.msra.mxu1 %v3351_v27  ;;  %v3389_v16 = vld [vmem:[#allocation16 + $0x4c8] sm:$0xff]  ;;  %v3303_v19 = vld [vmem:[#allocation16 + $0x218] sm:$0xff] }
 0xeb2   : > { %3682 = vmatpush.msra.mxu3 %v3279_v17  ;;  %3696 = vmatpush.msra.mxu0 %v3323_v29  ;;  %v3415_v17 = vld [vmem:[#allocation16 + $0x598] sm:$0xff]  ;;  %v3413_v20 = vld [vmem:[#allocation16 + $0x588] sm:$0xff] }
 0xeb3   : > { %3662 = vmatpush.msra.mxu2 %v3247_v28  ;;  %3719 = vmatpush.msra.mxu1 %v3349_v30  ;;  %v3383_v27 = vld [vmem:[#allocation16 + $0x498] sm:$0xff]  ;;  %v3409_v28 = vld [vmem:[#allocation16 + $0x568] sm:$0xff] }
 0xeb4   : > { %3683 = vmatpush.msra.mxu3 %v3277_v22  ;;  %3697 = vmatpush.msra.mxu0 %v3321_v31  ;;  %v3411_v22 = vld [vmem:[#allocation16 + $0x578] sm:$0xff]  ;;  %v3381_v29 = vld [vmem:[#allocation16 + $0x488] sm:$0xff] }
 0xeb5   : > { %3663 = vmatpush.msra.mxu2 %v3245_v35  ;;  %3720 = vmatpush.msra.mxu1 %v3347_v26  ;;  %v3379_v30 = vld [vmem:[#allocation16 + $0x478] sm:$0xff]  ;;  %v3405_v35 = vld [vmem:[#allocation16 + $0x548] sm:$0xff] }
 0xeb6   : > { %3684 = vmatpush.msra.mxu3 %v3275_v41  ;;  %3698 = vmatpush.msra.mxu0 %v3319_v34  ;;  %v3407_v41 = vld [vmem:[#allocation16 + $0x558] sm:$0xff]  ;;  %v3373_v26 = vld [vmem:[#allocation16 + $0x448] sm:$0xff] }
 0xeb7   : > { %3664 = vmatpush.msra.mxu2 %v3243_v43  ;;  %3721 = vmatpush.msra.mxu1 %v3345_v38  ;;  %v3375_v31 = vld [vmem:[#allocation16 + $0x458] sm:$0xff] }
 0xeb8   : > { %3685 = vmatpush.msra.mxu3 %v3273_v39  ;;  %v3125_v45 = vpop.f32.mrf.mxu0  ;;  %v3145_v36 = vpop.f32.mrf.mxu1  ;;  %3699 = vmatpush.msra.mxu0 %v3317_v0  ;;  %v3401_v39 = vld [vmem:[#allocation16 + $0x528] sm:$0xff]  ;;  %v3399_v43 = vld [vmem:[#allocation16 + $0x518] sm:$0xff] }
 0xeb9   : > { %v5304_v53 = vadd.f32 %v3145_v36, %v3125_v45  ;;  %3665 = vmatpush.msra.mxu2 %v3241_v40  ;;  %3722 = vmatpush.msra.mxu1 %v3343_v44  ;;  %v3371_v34 = vld [vmem:[#allocation16 + $0x438] sm:$0xff]  ;;  %v3369_v0 = vld [vmem:[#allocation16 + $0x428] sm:$0xff] }
 0xeba   : > { %3686 = vmatpush.msra.mxu3 %v3271_v21  ;;  %3700 = vmatpush.msra.mxu0 %v3315_v52  ;;  %v3397_v21 = vld [vmem:[#allocation16 + $0x508] sm:$0xff]  ;;  %v3367_v44 = vld [vmem:[#allocation16 + $0x418] sm:$0xff] }
 0xebb   : > { %v3233_v47 = vmax.f32 %v5304_v53, 0.0  ;;  %3666 = vmatpush.msra.mxu2 %v3239_v46  ;;  %3723 = vmatpush.msra.mxu1 %v3341_v37  ;;  %v3491_v36 = vld [vmem:[#allocation16 + $0x7f8] sm:$0xff]  ;;  %v3365_v46 = vld [vmem:[#allocation16 + $0x408] sm:$0xff] }
 0xebc   : > { %3687 = vmatpush.msra.mxu3 %v3269_v1  ;;  %3701 = vmatpush.msra.mxu0 %v3313_v49  ;;  %v3487_v49 = vld [vmem:[#allocation16 + $0x7d8] sm:$0xff] }
 0xebd   : > { %3608 = vmatmul.f32.vlgmr.msrb.gmra.mxu3 %v3233_v47  ;;  %v3085_v48 = vpop.f32.mrf.mxu2  ;;  %v3105_v58 = vpop.f32.mrf.mxu3  ;;  %3667 = vmatpush.msra.mxu2 %v3237_v55  ;;  %v3489_v55 = vld [vmem:[#allocation16 + $0x7e8] sm:$0xff]  ;;  %v3459_v53 = vld [vmem:[#allocation16 + $0x6f8] sm:$0xff] }
 0xebe   : > { %3752 = vmatpush.msrb.mxu3 %v3427_v56  ;;  %v5309_v63 = vadd.f32 %v3105_v58, %v3085_v48  ;;  %3724 = vmatpush.msra.mxu1 %v3339_v57  ;;  %v3457_v48 = vld [vmem:[#allocation16 + $0x6e8] sm:$0xff]  ;;  %v3483_v58 = vld [vmem:[#allocation16 + $0x7b8] sm:$0xff] }
 0xebf   : > { %3702 = vmatpush.msra.mxu0 %v3311_v62  ;;  %v3481_v62 = vld [vmem:[#allocation16 + $0x7a8] sm:$0xff] }
 0xec0   : > { %v3232_v5 = vmax.f32 %v5309_v63, 0.0  ;;  %3753 = vmatpush.msrb.mxu3 %v3425_v59  ;;  %3725 = vmatpush.msra.mxu1 %v3337_v2  ;;  %v3455_v59 = vld [vmem:[#allocation16 + $0x6d8] sm:$0xff]  ;;  %v3453_v2 = vld [vmem:[#allocation16 + $0x6c8] sm:$0xff] }
 0xec1   : > { %3703 = vmatpush.msra.mxu0 %v3309_v7  ;;  %v3479_v63 = vld [vmem:[#allocation16 + $0x798] sm:$0xff] }
 0xec2   : > { %3754 = vmatpush.msrb.mxu3 %v3423_v4  ;;  %3588 = vmatmul.f32.vlgmr.msrb.gmra.mxu2 %v3232_v5  ;;  %v3451_v4 = vld [vmem:[#allocation16 + $0x6b8] sm:$0xff] }
 0xec3   : > { %3732 = vmatpush.msrb.mxu2 %v3395_v6  ;;  %3726 = vmatpush.msra.mxu1 %v3335_v9  ;;  %v3449_v6 = vld [vmem:[#allocation16 + $0x6a8] sm:$0xff]  ;;  %v3475_v7 = vld [vmem:[#allocation16 + $0x778] sm:$0xff] }
 0xec4   : > { %3755 = vmatpush.msrb.mxu3 %v3421_v8  ;;  %3704 = vmatpush.msra.mxu0 %v3307_v42  ;;  %v3445_v8 = vld [vmem:[#allocation16 + $0x688] sm:$0xff]  ;;  %v3471_v9 = vld [vmem:[#allocation16 + $0x758] sm:$0xff] }
 0xec5   : > { %3688 = vmatmul.f32.vlgmr.msra.gmra.mxu3 %v3229_v50  ;;  %3733 = vmatpush.msrb.mxu2 %v3393_v10  ;;  %v3301_v50 = vld [vmem:[#allocation16 + $0x208] sm:$0xff]  ;;  %v3443_v10 = vld [vmem:[#allocation16 + $0x678] sm:$0xff] }
 0xec6   : > { %3756 = vmatpush.msrb.mxu3 %v3419_v11  ;;  %3727 = vmatpush.msra.mxu1 %v3333_v13  ;;  %v3469_v11 = vld [vmem:[#allocation16 + $0x748] sm:$0xff] }
 0xec7   : > { %3734 = vmatpush.msrb.mxu2 %v3391_v12  ;;  %3705 = vmatpush.msra.mxu0 %v3305_v15  ;;  %v3441_v42 = vld [vmem:[#allocation16 + $0x668] sm:$0xff]  ;;  %v3435_v15 = vld [vmem:[#allocation16 + $0x638] sm:$0xff] }
 0xec8   : > { %3757 = vmatpush.msrb.mxu3 %v3417_v14  ;;  %v3465_v12 = vld [vmem:[#allocation16 + $0x728] sm:$0xff]  ;;  %v3463_v14 = vld [vmem:[#allocation16 + $0x718] sm:$0xff] }
 0xec9   : > { %3735 = vmatpush.msrb.mxu2 %v3389_v16  ;;  %3706 = vmatpush.msra.mxu0 %v3303_v19  ;;  %v3437_v13 = vld [vmem:[#allocation16 + $0x648] sm:$0xff] }
 0xeca   : > { %3758 = vmatpush.msrb.mxu3 %v3415_v17  ;;  %3668 = vmatmul.f32.vlgmr.msra.gmra.mxu2 %v3228_v33  ;;  %v3403_v33 = vld [vmem:[#allocation16 + $0x538] sm:$0xff]  ;;  %v3461_v16 = vld [vmem:[#allocation16 + $0x708] sm:$0xff] }
 0xecb   : > { %3736 = vmatpush.msrb.mxu2 %v3387_v18  ;;  %3707 = vmatpush.msra.mxu0 %v3301_v50  ;;  %v3433_v17 = vld [vmem:[#allocation16 + $0x628] sm:$0xff]  ;;  %v3431_v18 = vld [vmem:[#allocation16 + $0x618] sm:$0xff] }
 0xecc   : > { %3759 = vmatpush.msrb.mxu3 %v3413_v20  ;;  %v3429_v19 = vld [vmem:[#allocation16 + $0x608] sm:$0xff] }
 0xecd   : > { %3737 = vmatpush.msrb.mxu2 %v3385_v23 }
 0xece   : > { %3760 = vmatpush.msrb.mxu3 %v3411_v22 }
 0xecf   : > { %3738 = vmatpush.msrb.mxu2 %v3383_v27 }
 0xed0   : > { %3761 = vmatpush.msrb.mxu3 %v3409_v28 }
 0xed1   : > { %3739 = vmatpush.msrb.mxu2 %v3381_v29 }
 0xed2   : > { %3762 = vmatpush.msrb.mxu3 %v3407_v41 }
 0xed3   : > { %3740 = vmatpush.msrb.mxu2 %v3379_v30 }
 0xed4   : > { %3763 = vmatpush.msrb.mxu3 %v3405_v35 }
 0xed5   : > { %3741 = vmatpush.msrb.mxu2 %v3377_v32 }
 0xed6   : > { %3764 = vmatpush.msrb.mxu3 %v3403_v33 }
 0xed7   : > { %3742 = vmatpush.msrb.mxu2 %v3375_v31 }
 0xed8   : > { %3765 = vmatpush.msrb.mxu3 %v3401_v39 }
 0xed9   : > { %3743 = vmatpush.msrb.mxu2 %v3373_v26 }
 0xeda   : > { %v3205_v38 = vpop.f32.mrf.mxu0  ;;  %v3225_v40 = vpop.f32.mrf.mxu1  ;;  %3766 = vmatpush.msrb.mxu3 %v3399_v43 }
 0xedb   : > { %v5318_v1 = vadd.f32 %v3225_v40, %v3205_v38  ;;  %3744 = vmatpush.msrb.mxu2 %v3371_v34 }
 0xedc   : > { %3767 = vmatpush.msrb.mxu3 %v3397_v21 }
 0xedd   : > { %v3235_v45 = vmax.f32 %v5318_v1, 0.0  ;;  %3768 = vmatmul.f32.vlgmr.msrb.gmra.mxu3 %v3233_v47  ;;  %3745 = vmatpush.msrb.mxu2 %v3369_v0  ;;  %v3485_v47 = vld [vmem:[#allocation16 + $0x7c8] sm:$0xff] }
 0xedf   : > { %3648 = vmatmul.f32.vlgmr.msrb.gmra.mxu1 %v3235_v45  ;;  %v3165_v52 = vpop.f32.mrf.mxu2  ;;  %v3185_v37 = vpop.f32.mrf.mxu3  ;;  %3746 = vmatpush.msrb.mxu2 %v3367_v44 }
 0xee0   : > { %3792 = vmatpush.msrb.mxu1 %v3491_v36  ;;  %v5325_v56 = vadd.f32 %v3185_v37, %v3165_v52 }
 0xee1   : > { %3747 = vmatpush.msrb.mxu2 %v3365_v46 }
 0xee2   : > { %v3234_v57 = vmax.f32 %v5325_v56, 0.0  ;;  %3793 = vmatpush.msrb.mxu1 %v3489_v55  ;;  %3748 = vmatmul.f32.vlgmr.msrb.gmra.mxu2 %v3232_v5  ;;  %v3477_v5 = vld [vmem:[#allocation16 + $0x788] sm:$0xff] }
 0xee4   : > { %3794 = vmatpush.msrb.mxu1 %v3487_v49  ;;  %3628 = vmatmul.f32.vlgmr.msrb.gmra.mxu0 %v3234_v57 }
 0xee5   : > { %3772 = vmatpush.msrb.mxu0 %v3459_v53 }
 0xee6   : > { %3795 = vmatpush.msrb.mxu1 %v3485_v47 }
 0xee7   : > { %3728 = vmatmul.f32.vlgmr.msra.gmra.mxu1 %v3231_v54  ;;  %3773 = vmatpush.msrb.mxu0 %v3457_v48  ;;  %v3473_v54 = vld [vmem:[#allocation16 + $0x768] sm:$0xff] }
 0xee8   : > { %3796 = vmatpush.msrb.mxu1 %v3483_v58 }
 0xee9   : > { %3774 = vmatpush.msrb.mxu0 %v3455_v59 }
 0xeea   : > { %3797 = vmatpush.msrb.mxu1 %v3481_v62 }
 0xeeb   : > { %3775 = vmatpush.msrb.mxu0 %v3453_v2 }
 0xeec   : > { %3798 = vmatpush.msrb.mxu1 %v3479_v63  ;;  %3708 = vmatmul.f32.vlgmr.msra.gmra.mxu0 %v3230_v3  ;;  %v3439_v3 = vld [vmem:[#allocation16 + $0x658] sm:$0xff] }
 0xeed   : > { %3776 = vmatpush.msrb.mxu0 %v3451_v4 }
 0xeee   : > { %3799 = vmatpush.msrb.mxu1 %v3477_v5 }
 0xeef   : > { %3777 = vmatpush.msrb.mxu0 %v3449_v6 }
 0xef0   : > { %3800 = vmatpush.msrb.mxu1 %v3475_v7 }
 0xef1   : > { %3778 = vmatpush.msrb.mxu0 %v3447_v51 }
 0xef2   : > { %3801 = vmatpush.msrb.mxu1 %v3473_v54 }
 0xef3   : > { %3779 = vmatpush.msrb.mxu0 %v3445_v8 }
 0xef4   : > { %3802 = vmatpush.msrb.mxu1 %v3471_v9  ;;  %v3814_v9 = vld [vmem:[%s5437_s8] sm:$0x3] }
 0xef5   : > { %3780 = vmatpush.msrb.mxu0 %v3443_v10 }
 0xef6   : > { %3803 = vmatpush.msrb.mxu1 %v3469_v11  ;;  %v3815_v11 = vld [vmem:[#allocation19] sm:$0x3] }
 0xef7   : > { %3781 = vmatpush.msrb.mxu0 %v3441_v42 }
 0xef8   : > { %3804 = vmatpush.msrb.mxu1 %v3467_v60  ;;  %v3842_v60 = vperm.slane %v3814_v9, 0 }
 0xef9   : > { %3782 = vmatpush.msrb.mxu0 %v3439_v3  ;;  %v3843_v3 = vperm.slane %v3814_v9, 1 }
 0xefa   : > { %3805 = vmatpush.msrb.mxu1 %v3465_v12  ;;  %v3849_v12 = vperm.slane %v3815_v11, 0 }
 0xefb   : > { %3783 = vmatpush.msrb.mxu0 %v3437_v13  ;;  %v3850_v13 = vperm.slane %v3815_v11, 1 }
 0xefc   : > { %3806 = vmatpush.msrb.mxu1 %v3463_v14 }
 0xefd   : > { %3784 = vmatpush.msrb.mxu0 %v3435_v15 }
 0xefe   : > { %3807 = vmatpush.msrb.mxu1 %v3461_v16 }
 0xeff   : > { %3808 = vmatmul.f32.vlgmr.msrb.gmra.mxu1 %v3235_v45  ;;  %3785 = vmatpush.msrb.mxu0 %v3433_v17 }
 0xf01   : > { %3786 = vmatpush.msrb.mxu0 %v3431_v18 }
 0xf03   : > { %3787 = vmatpush.msrb.mxu0 %v3429_v19 }
 0xf04   : > { %3788 = vmatmul.f32.vlgmr.msrb.gmra.mxu0 %v3234_v57 }
 0xf1c   : > { %v3529_v23 = vpop.f32.mrf.mxu3 }
 0xf20   : > { %v3569_v22 = vpop.f32.mrf.mxu1 }
 0xf21   : > { %v3509_v20 = vpop.f32.mrf.mxu2 }
 0xf22   : > { %v3530_v30 = vadd.f32 %v3529_v23, %v3509_v20 }
 0xf25   : > { %v3549_v50 = vpop.f32.mrf.mxu0 }
 0xf26   : > { %v3550_v31 = vadd.f32 %v3549_v50, %v3530_v30 }
 0xf28   : > { %v3570_v43 = vadd.f32 %v3569_v22, %v3550_v31 }
 0xf40   : > { %v3609_v28 = vpop.f32.mrf.mxu3 }
 0xf45   : > { %v3589_v27 = vpop.f32.mrf.mxu2 }
 0xf46   : > { %v3590_v21 = vadd.f32 %v3589_v27, %v3570_v43 }
 0xf48   : > { %v3689_v32 = vpop.f32.mrf.mxu3  ;;  %v3610_v0 = vadd.f32 %v3609_v28, %v3590_v21 }
 0xf4d   : > { %v3669_v35 = vpop.f32.mrf.mxu2 }
 0xf4e   : > { %v3690_v39 = vadd.f32 %v3689_v32, %v3669_v35 }
 0xf5c   : > { %v3649_v41 = vpop.f32.mrf.mxu1 }
 0xf60   : > { %v3769_v45 = vpop.f32.mrf.mxu3 }
 0xf61   : > { %v3629_v29 = vpop.f32.mrf.mxu0 }
 0xf62   : > { %v3630_v44 = vadd.f32 %v3629_v29, %v3610_v0 }
 0xf64   : > { %v3729_v34 = vpop.f32.mrf.mxu1  ;;  %v3650_v52 = vadd.f32 %v3649_v41, %v3630_v44 }
 0xf65   : > { %v3749_v40 = vpop.f32.mrf.mxu2 }
 0xf66   : > { %v3812_v49 = vmax.f32 %v3650_v52, 0.0 }
 0xf69   : > { %v3709_v33 = vpop.f32.mrf.mxu0 }
 0xf6a   : > { %v3710_v26 = vadd.f32 %v3709_v33, %v3690_v39 }
 0xf6c   : > { %v3730_v38 = vadd.f32 %v3729_v34, %v3710_v26 }
 0xf6e   : > { %v3750_v1 = vadd.f32 %v3749_v40, %v3730_v38 }
 0xf70   : > { %v3770_v36 = vadd.f32 %v3769_v45, %v3750_v1 }
 0xf7c   : > { %v3809_v55 = vpop.f32.mrf.mxu1 }
 0xf81   : > { %v3789_v46 = vpop.f32.mrf.mxu0 }
 0xf82   : > { %v3790_v37 = vadd.f32 %v3789_v46, %v3770_v36 }
 0xf84   : > { %v3810_v56 = vadd.f32 %v3809_v55, %v3790_v37 }
 0xf86   : > { %v3813_v57 = vmax.f32 %v3810_v56, 0.0 }
 0xf88   : > { %v3816_v53 = vadd.f32 %v3813_v57, %v3812_v49 }
 0xf8a   : > { %3817 = vadd.xlane.f32.xlu2 %v3816_v53 }
 0xffd   : > { %v3818_v47 = vpop.xlane.xlu2 %3817 }
 0xffe   : > { %v3819_v48 = vmul.f32 %v3818_v47, %v5138_v61 }
0x1000   : > { %v3820_v58 = vsub.f32 %v3812_v49, %v3819_v48  ;;  %v3821_v59 = vsub.f32 %v3813_v57, %v3819_v48 }
0x1002   : > { %v3822_v62 = vmul.f32 %v3820_v58, %v3820_v58  ;;  %v3823_v2 = vmul.f32 %v3821_v59, %v3821_v59 }
0x1004   : > { %v3824_v63 = vadd.f32 %v3823_v2, %v3822_v62 }
0x1006   : > { %3825 = vadd.xlane.f32.xlu1 %v3824_v63 }
0x1079   : > { %v3826_v4 = vpop.xlane.xlu1 %3825 }
0x107a   : > { %v3827_v5 = vmul.f32 %v3826_v4, %v5138_v61 }
0x107c   : > { %v3828_v6 = vadd.f32 1e-05, %v3827_v5 }
0x107e   : > { %4323 = vrsqrt.f32 %v3828_v6  ;;  %vm3835_vm10 = vweird.f32 %v3828_v6 }
0x1084   : > { %v4324_v7 = vpop.eup %4323 }
0x1085   : > { %v3830_v51 = vmul.f32 %v4324_v7, %v3828_v6  ;;  %vm3836_vm9 = vweird.f32 %v4324_v7 }
0x1086   : > { %vm3837_vm11 = vmor %vm3835_vm10, %vm3836_vm9 }
0x1087   : > { %v3831_v54 = vmul.f32 %v4324_v7, %v3830_v51 }
0x1089   : > { %v3832_v8 = vmul.f32 0.5, %v3831_v54 }
0x108b   : > { %v3833_v10 = vsub.f32 1.5, %v3832_v8 }
0x108d   : > { %v3834_v42 = vmul.f32 %v4324_v7, %v3833_v10 }
0x108f   : > { %v3838_v61 = vsel %vm3837_vm11, %v4324_v7, %v3834_v42 }
0x1090   : > { %v3839_v14 = vmul.f32 %v3838_v61, %v3820_v58  ;;  %v3840_v15 = vmul.f32 %v3838_v61, %v3821_v59 }
0x1092   : > { %v3846_v16 = vmul.f32 %v3842_v60, %v3839_v14  ;;  %v3847_v17 = vmul.f32 %v3843_v3, %v3840_v15 }
0x1094   : > { %v3853_v18 = vadd.f32 %v3849_v12, %v3846_v16  ;;  %v3854_v19 = vadd.f32 %v3850_v13, %v3847_v17 }
0x1096   : > { %v3855_v20 = vadd.f32 %v3853_v18, %v5263_v24  ;;  %v3856_v23 = vadd.f32 %v3854_v19, %v5266_v25 }
0x1098   : > { %3857 = vst [vmem:[%s696_s17] sm:$0xff] %v3855_v20 }
0x1099   : > { %3858 = vst [vmem:[%s696_s17 + $0x8] sm:$0xff] %v3856_v23 }
0x109a   : > { %4684 = shalt.err (!%p4681_p10)
}
0x109b   : > { %4173 = dma.vmem_to_hbm [thread:$0]  (%p4970_p0), %s3874_s22, 256, %s3876_s23, %s3860_s25  }
0x109c PF: > { %s3887_s6 = sand.u32 1, %s4735_s18   ;;  %p5439_p12 = scmp.ge.s32.totalorder %s4747_s21, 2 }
0x109d   : > { %s3888_s28 = scalar_lea.sflag [#allocation4], %s3887_s6 }
0x109e   : > { %p4211_p5 = pnand %p5439_p12, %p4976_p6 }
0x10a0   : > { %p4212_p11 = pneg %p4211_p5 }
0x10a2   : > { %4730 = dma.done.wait (%p4212_p11), %s3888_s28, 256  }
0x10a3   : > { %4732 = vsyncadd (%p4212_p11), %s3888_s28, 4294967040  ;;  %p35_p2 = scmp.ge.s32.totalorder %s4946_s30, 4   ;;  %s5440_s18 = smov %s4739_s19 }
0x10a4   : > { %s5441_s19 = smov %s4743_s20  ;;  %s5442_s20 = smov %s4958_s27 }
0x10a5   : > { %s5443_s21 = smov %s4946_s30  ;;  %37 = sbr.rel (!%p35_p2) target bundleno = 26 (0x1a), region = 174 }
0x10aa   :  { %3894 = vsyncpa [#allocation3], 1 }
0x10ab   :  { %3896 = vsyncpa [#allocation3 + $0x1], 1 }
0x10ac   :  { %3897 = vsyncpa [#allocation6], 1 }
0x10ad   :  { %3899 = vsyncpa [#allocation6 + $0x1], 1 }
0x10ae   :  { %3900 = vsyncpa [#allocation9], 1 }
0x10af   :  { %3901 = vsyncpa [#allocation12], 1 }
0x10b0   :  { %3902 = vsyncpa [#allocation15], 1 }
0x10b1   :  { %3903 = vsyncpa [#allocation18], 1 }
0x10b2   :  { %3904 = vsyncpa [#allocation4], 1 }
0x10b3   :  { %3906 = vsyncpa [#allocation4 + $0x1], 1 }

</bundles_post_ra>
